<compile_context>
chip_gen: v7x
topology: tpu7x:2x2x1
jax: 0.10.0
libtpu: 0.0.40
codegen_flags: <defaults>
</compile_context>

<pallas_src>
import jax
import jax.numpy as jnp
import numpy as np
from jax.experimental import pallas as pl
from jax.experimental.pallas import tpu as pltpu


_BLOCK_N = 8   # max batch rows per grid step


# ----------------------------------------------------------------------------
# Wrapper-side algebra: compose two back-to-back VALID 3x3 convs into one 5x5.
# ----------------------------------------------------------------------------
def _compose_conv3x3_pair(w1, b1, w2, b2):
    """Exact composition (PyTorch cross-correlation convention), all f32."""
    w1 = w1.astype(jnp.float32)
    w2 = w2.astype(jnp.float32)
    co2, _, kh2, kw2 = w2.shape
    _, cin, kh1, kw1 = w1.shape
    K = kh1 + kh2 - 1
    w_eff = jnp.zeros((co2, cin, K, K), jnp.float32)
    for p in range(kh2):
        for q in range(kw2):
            contrib = jnp.einsum('om,mcab->ocab', w2[:, :, p, q], w1)
            w_eff = w_eff.at[:, :, p:p + kh1, q:q + kw1].add(contrib)
    b_eff = b2.astype(jnp.float32) + jnp.einsum('omab,m->o', w2,
                                                b1.astype(jnp.float32))
    return w_eff, b_eff


def _flatten_conv_weight(w):
    """OIHW -> (kh*kw*cin, cout); lane order (kh, kw, cin) matches the slab."""
    co, ci, kh, kw = w.shape
    return (jnp.transpose(w, (2, 3, 1, 0))
            .reshape(kh * kw * ci, co).astype(jnp.float32))


# ----------------------------------------------------------------------------
# Fused forward pass (one pallas_call).
# ----------------------------------------------------------------------------
def _forward(x_nchw, params):
    N, Cin, H, W = x_nchw.shape
    HA, WA = H - 4, W - 4                  # composed conv A output
    # TODO(synk): odd pool inputs (PyTorch floor mode) are asserted out, not implemented.
    assert HA >= 2 and WA >= 2 and HA % 2 == 0 and WA % 2 == 0, (
        "maxpool(2,2) input must be even-sized")
    PH, PW = HA // 2, WA // 2              # pool output
    HB, WB = PH - 4, PW - 4                # composed conv B output
    assert HB >= 1 and WB >= 1, "input spatial size too small for this network"

    CA, CB = 16, 16                        # output channels of conv A / conv B

    # Exact algebraic composition of the two conv pairs (no nonlinearity between them).
    wA, bA = _compose_conv3x3_pair(params["conv11_w"], params["conv11_b"],
                                   params["conv12_w"], params["conv12_b"])
    wB, bB = _compose_conv3x3_pair(params["conv21_w"], params["conv21_b"],
                                   params["conv2_w"], params["conv2_b"])
    wA = _flatten_conv_weight(wA)          # (25*Cin, 16)
    bA = bA.reshape(1, CA)
    wB = _flatten_conv_weight(wB)          # (400, 16)
    bB = bB.reshape(1, CB)

    # NCHW -> NHWC (channels on lanes).  Choose BN so the grid has >= 2 steps
    # whenever N >= 2: restores double-buffered DMA overlap and lets the batch
    # axis shard across both TensorCores on v7x.
    x = jnp.transpose(x_nchw, (0, 2, 3, 1)).astype(jnp.float32)
    BN = max(1, min(_BLOCK_N, N // 2))
    Npad = -(-N // BN) * BN
    if Npad != N:
        x = jnp.pad(x, ((0, Npad - N), (0, 0), (0, 0), (0, 0)))

    def kernel(x_ref, wA_ref, bA_ref, wB_ref, bB_ref, o_ref,
               colA, slabA, actp, colB, slabB):

        def conv5x5(src_ref, col_ref, slab_ref, w_ref, b_ref):
            bn, h, _w, c = src_ref.shape
            oh, ow = h - 4, _w - 4
            # Two-stage im2col: stage 1 gathers the 5 horizontal taps (one
            # store per kw, covering ALL rows); stage 2 gathers the 5 vertical
            # taps (one 5*c-lane-wide store per kh).  10 wide stores instead
            # of 25 narrow per-tap stores.
            for kw in range(5):
                col_ref[:, :, :, kw * c:(kw + 1) * c] = src_ref[:, :, kw:kw + ow, :]
            for kh in range(5):
                slab_ref[:, :, :, kh * 5 * c:(kh + 1) * 5 * c] = (
                    col_ref[:, kh:kh + oh, :, :])
            patches = slab_ref[...].reshape(bn * oh * ow, 25 * c)
            # Single MXU matmul; MXU is far from the bottleneck here, so no
            # further tuning of its shape (per review).
            return jnp.dot(patches, w_ref[...],
                           preferred_element_type=jnp.float32) + b_ref[...]

        # conv A (= conv11 o conv12)
        y1 = conv5x5(x_ref, colA, slabA, wA_ref, bA_ref)      # (BN*HA*WA, CA)

        # maxpool 2x2 stride 2, computed directly on the value (no scratch
        # round-trip): pool along W via a row-pair split, then along H.
        z = y1.reshape(BN * HA * PW, 2, CA)
        zw = jnp.maximum(z[:, 0, :], z[:, 1, :])               # (BN*HA*PW, CA)
        z4 = zw.reshape(BN * PH, 2, PW, CA)
        actp[...] = jnp.maximum(z4[:, 0, :, :], z4[:, 1, :, :]).reshape(actp.shape)

        # conv B (= conv21 o conv2) + the module's single ReLU
        y2 = conv5x5(actp, colB, slabB, wB_ref, bB_ref)        # (BN*HB*WB, CB)
        o_ref[...] = jnp.maximum(y2, 0.0).reshape(o_ref.shape)

    const2d = lambda i: (0, 0)

    out = pl.pallas_call(
        kernel,
        out_shape=jax.ShapeDtypeStruct((Npad, HB * WB, CB), jnp.float32),
        grid_spec=pltpu.PrefetchScalarGridSpec(
            num_scalar_prefetch=0,
            grid=(Npad // BN,),
            in_specs=[
                pl.BlockSpec((BN, H, W, Cin), lambda i: (i, 0, 0, 0)),
                pl.BlockSpec(wA.shape, const2d), pl.BlockSpec(bA.shape, const2d),
                pl.BlockSpec(wB.shape, const2d), pl.BlockSpec(bB.shape, const2d),
            ],
            out_specs=pl.BlockSpec((BN, HB * WB, CB), lambda i: (i, 0, 0)),
            scratch_shapes=[
                pltpu.VMEM((BN, H, WA, 5 * Cin), jnp.float32),    # colA  (horiz taps)
                pltpu.VMEM((BN, HA, WA, 25 * Cin), jnp.float32),  # slabA (conv A patches)
                pltpu.VMEM((BN, PH, PW, CA), jnp.float32),        # actp  (pool output)
                pltpu.VMEM((BN, PH, WB, 5 * CA), jnp.float32),    # colB  (horiz taps)
                pltpu.VMEM((BN, HB, WB, 25 * CA), jnp.float32),   # slabB (conv B patches)
            ],
        ),
        # Scratch + double-buffered I/O is ~7 MiB at BN=8; set the scoped-VMEM
        # limit explicitly so larger BN stays safe on v5e (16 MiB default) and
        # within v7x's 64 MiB physical VMEM.
        compiler_params=pltpu.CompilerParams(
            dimension_semantics=("parallel",),
            vmem_limit_bytes=32 * 1024 * 1024),
    )(x, wA, bA, wB, bB)

    out = out.reshape(Npad, HB, WB, CB)[:N]
    return jnp.transpose(out, (0, 3, 1, 2))                    # NHWC -> NCHW


lenet_forward = jax.jit(_forward)


# ----------------------------------------------------------------------------
# Deterministic synthetic parameters (PyTorch shapes / default-init style).
# ----------------------------------------------------------------------------
def init_params(n_channels, key):
    ks = jax.random.split(key, 8)

    def uni(k, shape, fan_in):
        bound = 1.0 / np.sqrt(fan_in)
        return jax.random.uniform(k, shape, jnp.float32, -bound, bound)

    p = {}
    p["conv11_w"] = uni(ks[0], (8, n_channels, 3, 3), n_channels * 9)
    p["conv11_b"] = uni(ks[1], (8,), n_channels * 9)
    p["conv12_w"] = uni(ks[2], (16, 8, 3, 3), 8 * 9)
    p["conv12_b"] = uni(ks[3], (16,), 8 * 9)
    p["conv21_w"] = uni(ks[4], (16, 16, 3, 3), 16 * 9)
    p["conv21_b"] = uni(ks[5], (16,), 16 * 9)
    p["conv2_w"]  = uni(ks[6], (16, 16, 3, 3), 16 * 9)
    p["conv2_b"]  = uni(ks[7], (16,), 16 * 9)
    return p


# ----------------------------------------------------------------------------
# Pure-JAX reference (mirrors the PyTorch forward, UNcomposed) for correctness.
# ----------------------------------------------------------------------------
def lenet_reference(x_nchw, params):
    def conv(x, w, b):
        y = jax.lax.conv_general_dilated(
            x, w, window_strides=(1, 1), padding="VALID",
            dimension_numbers=("NCHW", "OIHW", "NCHW"))
        return y + b[None, :, None, None]

    x = conv(x_nchw, params["conv11_w"], params["conv11_b"])
    x = conv(x, params["conv12_w"], params["conv12_b"])
    n, c, h, w = x.shape
    x = x.reshape(n, c, h // 2, 2, w // 2, 2).max(axis=(3, 5))
    x = conv(x, params["conv21_w"], params["conv21_b"])
    x = conv(x, params["conv2_w"], params["conv2_b"])
    return jnp.maximum(x, 0.0)


if __name__ == "__main__":
    key = jax.random.PRNGKey(0)
    k_x, k_p = jax.random.split(key)

    N_CHANNELS = 4
    x = jax.random.normal(k_x, (2, N_CHANNELS, 16, 16), jnp.float32)   # NCHW
    params = init_params(N_CHANNELS, k_p)

    out = jax.block_until_ready(lenet_forward(x, params))
    assert out.shape == (2, 16, 2, 2), out.shape

    ref = jax.block_until_ready(lenet_reference(x, params))
    # The conv composition reassociates f32 sums; tolerance covers that.
    np.testing.assert_allclose(np.asarray(out), np.asarray(ref),
                               rtol=1e-4, atol=2e-4)

    print("KERNEL_OK")
</pallas_src>

<mosaic_0001>
module attributes {stable_mosaic.version = 11 : i64} {
  func.func @kernel(%arg0: i32, %arg1: memref<1x16x16x4xf32, #tpu.memory_space<vmem>>, %arg2: memref<100x16xf32, #tpu.memory_space<vmem>>, %arg3: memref<1x16xf32, #tpu.memory_space<vmem>>, %arg4: memref<400x16xf32, #tpu.memory_space<vmem>>, %arg5: memref<1x16xf32, #tpu.memory_space<vmem>>, %arg6: memref<1x4x16xf32, #tpu.memory_space<vmem>>, %arg7: memref<1x16x12x20xf32, #tpu.memory_space<vmem>>, %arg8: memref<1x12x12x100xf32, #tpu.memory_space<vmem>>, %arg9: memref<1x6x6x16xf32, #tpu.memory_space<vmem>>, %arg10: memref<1x6x2x80xf32, #tpu.memory_space<vmem>>, %arg11: memref<1x2x2x400xf32, #tpu.memory_space<vmem>>) attributes {dimension_semantics = [#tpu.dimension_semantics<parallel>], iteration_bounds = array<i64: 2>, scalar_prefetch = 0 : i64, scratch_operands = 5 : i64, tpu.core_type = #tpu.core_type<tc>, window_params = [{transform_indices = @transform_0, window_bounds = array<i64: 1, 16, 16, 4>}, {pipeline_mode = #tpu.pipeline_mode<synchronous>, transform_indices = @transform_1, window_bounds = array<i64: 100, 16>}, {pipeline_mode = #tpu.pipeline_mode<synchronous>, transform_indices = @transform_2, window_bounds = array<i64: 1, 16>}, {pipeline_mode = #tpu.pipeline_mode<synchronous>, transform_indices = @transform_3, window_bounds = array<i64: 400, 16>}, {pipeline_mode = #tpu.pipeline_mode<synchronous>, transform_indices = @transform_4, window_bounds = array<i64: 1, 16>}, {transform_indices = @transform_5, window_bounds = array<i64: 1, 4, 16>}]} {
    %c0 = arith.constant 0 : index
    %c0_0 = arith.constant 0 : index
    %c0_1 = arith.constant 0 : index
    %c0_2 = arith.constant 0 : index
    %0 = vector.load %arg1[%c0, %c0_0, %c0_1, %c0_2] : memref<1x16x16x4xf32, #tpu.memory_space<vmem>>, vector<1x16x12x4xf32>
    %c0_3 = arith.constant 0 : index
    %c0_4 = arith.constant 0 : index
    %c0_5 = arith.constant 0 : index
    %c0_6 = arith.constant 0 : index
    %1 = vector.load %arg7[%c0_3, %c0_4, %c0_5, %c0_6] : memref<1x16x12x20xf32, #tpu.memory_space<vmem>>, vector<1x16x12x4xf32>
    tpu.vector_store %arg7[%c0_3, %c0_4, %c0_5, %c0_6], %0 {strides = array<i32>} : memref<1x16x12x20xf32, #tpu.memory_space<vmem>>, vector<1x16x12x4xf32>,
    %c0_7 = arith.constant 0 : index
    %c0_8 = arith.constant 0 : index
    %c1 = arith.constant 1 : index
    %c0_9 = arith.constant 0 : index
    %2 = vector.load %arg1[%c0_7, %c0_8, %c1, %c0_9] : memref<1x16x16x4xf32, #tpu.memory_space<vmem>>, vector<1x16x12x4xf32>
    %c0_10 = arith.constant 0 : index
    %c0_11 = arith.constant 0 : index
    %c0_12 = arith.constant 0 : index
    %c4 = arith.constant 4 : index
    %3 = vector.load %arg7[%c0_10, %c0_11, %c0_12, %c4] : memref<1x16x12x20xf32, #tpu.memory_space<vmem>>, vector<1x16x12x4xf32>
    tpu.vector_store %arg7[%c0_10, %c0_11, %c0_12, %c4], %2 {strides = array<i32>} : memref<1x16x12x20xf32, #tpu.memory_space<vmem>>, vector<1x16x12x4xf32>,
    %c0_13 = arith.constant 0 : index
    %c0_14 = arith.constant 0 : index
    %c2 = arith.constant 2 : index
    %c0_15 = arith.constant 0 : index
    %4 = vector.load %arg1[%c0_13, %c0_14, %c2, %c0_15] : memref<1x16x16x4xf32, #tpu.memory_space<vmem>>, vector<1x16x12x4xf32>
    %c0_16 = arith.constant 0 : index
    %c0_17 = arith.constant 0 : index
    %c0_18 = arith.constant 0 : index
    %c8 = arith.constant 8 : index
    %5 = vector.load %arg7[%c0_16, %c0_17, %c0_18, %c8] : memref<1x16x12x20xf32, #tpu.memory_space<vmem>>, vector<1x16x12x4xf32>
    tpu.vector_store %arg7[%c0_16, %c0_17, %c0_18, %c8], %4 {strides = array<i32>} : memref<1x16x12x20xf32, #tpu.memory_space<vmem>>, vector<1x16x12x4xf32>,
    %c0_19 = arith.constant 0 : index
    %c0_20 = arith.constant 0 : index
    %c3 = arith.constant 3 : index
    %c0_21 = arith.constant 0 : index
    %6 = vector.load %arg1[%c0_19, %c0_20, %c3, %c0_21] : memref<1x16x16x4xf32, #tpu.memory_space<vmem>>, vector<1x16x12x4xf32>
    %c0_22 = arith.constant 0 : index
    %c0_23 = arith.constant 0 : index
    %c0_24 = arith.constant 0 : index
    %c12 = arith.constant 12 : index
    %7 = vector.load %arg7[%c0_22, %c0_23, %c0_24, %c12] : memref<1x16x12x20xf32, #tpu.memory_space<vmem>>, vector<1x16x12x4xf32>
    tpu.vector_store %arg7[%c0_22, %c0_23, %c0_24, %c12], %6 {strides = array<i32>} : memref<1x16x12x20xf32, #tpu.memory_space<vmem>>, vector<1x16x12x4xf32>,
    %c0_25 = arith.constant 0 : index
    %c0_26 = arith.constant 0 : index
    %c4_27 = arith.constant 4 : index
    %c0_28 = arith.constant 0 : index
    %8 = vector.load %arg1[%c0_25, %c0_26, %c4_27, %c0_28] : memref<1x16x16x4xf32, #tpu.memory_space<vmem>>, vector<1x16x12x4xf32>
    %c0_29 = arith.constant 0 : index
    %c0_30 = arith.constant 0 : index
    %c0_31 = arith.constant 0 : index
    %c16 = arith.constant 16 : index
    %9 = vector.load %arg7[%c0_29, %c0_30, %c0_31, %c16] : memref<1x16x12x20xf32, #tpu.memory_space<vmem>>, vector<1x16x12x4xf32>
    tpu.vector_store %arg7[%c0_29, %c0_30, %c0_31, %c16], %8 {strides = array<i32>} : memref<1x16x12x20xf32, #tpu.memory_space<vmem>>, vector<1x16x12x4xf32>,
    %c0_32 = arith.constant 0 : index
    %c0_33 = arith.constant 0 : index
    %c0_34 = arith.constant 0 : index
    %c0_35 = arith.constant 0 : index
    %10 = vector.load %arg7[%c0_32, %c0_33, %c0_34, %c0_35] : memref<1x16x12x20xf32, #tpu.memory_space<vmem>>, vector<1x12x12x20xf32>
    %c0_36 = arith.constant 0 : index
    %c0_37 = arith.constant 0 : index
    %c0_38 = arith.constant 0 : index
    %c0_39 = arith.constant 0 : index
    %11 = vector.load %arg8[%c0_36, %c0_37, %c0_38, %c0_39] : memref<1x12x12x100xf32, #tpu.memory_space<vmem>>, vector<1x12x12x20xf32>
    tpu.vector_store %arg8[%c0_36, %c0_37, %c0_38, %c0_39], %10 {strides = array<i32>} : memref<1x12x12x100xf32, #tpu.memory_space<vmem>>, vector<1x12x12x20xf32>,
    %c0_40 = arith.constant 0 : index
    %c1_41 = arith.constant 1 : index
    %c0_42 = arith.constant 0 : index
    %c0_43 = arith.constant 0 : index
    %12 = vector.load %arg7[%c0_40, %c1_41, %c0_42, %c0_43] : memref<1x16x12x20xf32, #tpu.memory_space<vmem>>, vector<1x12x12x20xf32>
    %c0_44 = arith.constant 0 : index
    %c0_45 = arith.constant 0 : index
    %c0_46 = arith.constant 0 : index
    %c20 = arith.constant 20 : index
    %13 = vector.load %arg8[%c0_44, %c0_45, %c0_46, %c20] : memref<1x12x12x100xf32, #tpu.memory_space<vmem>>, vector<1x12x12x20xf32>
    tpu.vector_store %arg8[%c0_44, %c0_45, %c0_46, %c20], %12 {strides = array<i32>} : memref<1x12x12x100xf32, #tpu.memory_space<vmem>>, vector<1x12x12x20xf32>,
    %c0_47 = arith.constant 0 : index
    %c2_48 = arith.constant 2 : index
    %c0_49 = arith.constant 0 : index
    %c0_50 = arith.constant 0 : index
    %14 = vector.load %arg7[%c0_47, %c2_48, %c0_49, %c0_50] : memref<1x16x12x20xf32, #tpu.memory_space<vmem>>, vector<1x12x12x20xf32>
    %c0_51 = arith.constant 0 : index
    %c0_52 = arith.constant 0 : index
    %c0_53 = arith.constant 0 : index
    %c40 = arith.constant 40 : index
    %15 = vector.load %arg8[%c0_51, %c0_52, %c0_53, %c40] : memref<1x12x12x100xf32, #tpu.memory_space<vmem>>, vector<1x12x12x20xf32>
    tpu.vector_store %arg8[%c0_51, %c0_52, %c0_53, %c40], %14 {strides = array<i32>} : memref<1x12x12x100xf32, #tpu.memory_space<vmem>>, vector<1x12x12x20xf32>,
    %c0_54 = arith.constant 0 : index
    %c3_55 = arith.constant 3 : index
    %c0_56 = arith.constant 0 : index
    %c0_57 = arith.constant 0 : index
    %16 = vector.load %arg7[%c0_54, %c3_55, %c0_56, %c0_57] : memref<1x16x12x20xf32, #tpu.memory_space<vmem>>, vector<1x12x12x20xf32>
    %c0_58 = arith.constant 0 : index
    %c0_59 = arith.constant 0 : index
    %c0_60 = arith.constant 0 : index
    %c60 = arith.constant 60 : index
    %17 = vector.load %arg8[%c0_58, %c0_59, %c0_60, %c60] : memref<1x12x12x100xf32, #tpu.memory_space<vmem>>, vector<1x12x12x20xf32>
    tpu.vector_store %arg8[%c0_58, %c0_59, %c0_60, %c60], %16 {strides = array<i32>} : memref<1x12x12x100xf32, #tpu.memory_space<vmem>>, vector<1x12x12x20xf32>,
    %c0_61 = arith.constant 0 : index
    %c4_62 = arith.constant 4 : index
    %c0_63 = arith.constant 0 : index
    %c0_64 = arith.constant 0 : index
    %18 = vector.load %arg7[%c0_61, %c4_62, %c0_63, %c0_64] : memref<1x16x12x20xf32, #tpu.memory_space<vmem>>, vector<1x12x12x20xf32>
    %c0_65 = arith.constant 0 : index
    %c0_66 = arith.constant 0 : index
    %c0_67 = arith.constant 0 : index
    %c80 = arith.constant 80 : index
    %19 = vector.load %arg8[%c0_65, %c0_66, %c0_67, %c80] : memref<1x12x12x100xf32, #tpu.memory_space<vmem>>, vector<1x12x12x20xf32>
    tpu.vector_store %arg8[%c0_65, %c0_66, %c0_67, %c80], %18 {strides = array<i32>} : memref<1x12x12x100xf32, #tpu.memory_space<vmem>>, vector<1x12x12x20xf32>,
    %c0_68 = arith.constant 0 : index
    %c0_69 = arith.constant 0 : index
    %c0_70 = arith.constant 0 : index
    %c0_71 = arith.constant 0 : index
    %20 = vector.load %arg8[%c0_68, %c0_69, %c0_70, %c0_71] : memref<1x12x12x100xf32, #tpu.memory_space<vmem>>, vector<1x12x12x100xf32>
    %21 = vector.shape_cast %20 : vector<1x12x12x100xf32> to vector<144x100xf32>
    %c0_72 = arith.constant 0 : index
    %c0_73 = arith.constant 0 : index
    %22 = vector.load %arg2[%c0_72, %c0_73] : memref<100x16xf32, #tpu.memory_space<vmem>>, vector<100x16xf32>
    %cst = arith.constant dense<0.000000e+00> : vector<144x16xf32>
    %23 = tpu.matmul %21, %22, %cst {dimension_numbers = #tpu.dot_dimension_numbers<[1], [0], [0], [1], [0, 0, 1, 1], [], []>} : vector<144x100xf32>, vector<100x16xf32>, vector<144x16xf32> -> vector<144x16xf32>
    %c0_74 = arith.constant 0 : index
    %c0_75 = arith.constant 0 : index
    %24 = vector.load %arg3[%c0_74, %c0_75] : memref<1x16xf32, #tpu.memory_space<vmem>>, vector<1x16xf32>
    %25 = vector.broadcast %24 : vector<1x16xf32> to vector<144x16xf32>
    %26 = arith.addf %23, %25 : vector<144x16xf32>
    %27 = vector.shape_cast %26 : vector<144x16xf32> to vector<72x2x16xf32>
    %28 = vector.extract_strided_slice %27 {offsets = [0, 0, 0], sizes = [72, 1, 16], strides = [1, 1, 1]} : vector<72x2x16xf32> to vector<72x1x16xf32>
    %29 = vector.shape_cast %28 : vector<72x1x16xf32> to vector<72x16xf32>
    %30 = vector.extract_strided_slice %27 {offsets = [0, 1, 0], sizes = [72, 1, 16], strides = [1, 1, 1]} : vector<72x2x16xf32> to vector<72x1x16xf32>
    %31 = vector.shape_cast %30 : vector<72x1x16xf32> to vector<72x16xf32>
    %32 = arith.maximumf %29, %31 : vector<72x16xf32>
    %33 = vector.shape_cast %32 : vector<72x16xf32> to vector<6x2x6x16xf32>
    %34 = vector.extract_strided_slice %33 {offsets = [0, 0, 0, 0], sizes = [6, 1, 6, 16], strides = [1, 1, 1, 1]} : vector<6x2x6x16xf32> to vector<6x1x6x16xf32>
    %35 = vector.shape_cast %34 : vector<6x1x6x16xf32> to vector<6x6x16xf32>
    %36 = vector.extract_strided_slice %33 {offsets = [0, 1, 0, 0], sizes = [6, 1, 6, 16], strides = [1, 1, 1, 1]} : vector<6x2x6x16xf32> to vector<6x1x6x16xf32>
    %37 = vector.shape_cast %36 : vector<6x1x6x16xf32> to vector<6x6x16xf32>
    %38 = arith.maximumf %35, %37 : vector<6x6x16xf32>
    %39 = vector.shape_cast %38 : vector<6x6x16xf32> to vector<1x6x6x16xf32>
    %c0_76 = arith.constant 0 : index
    %c0_77 = arith.constant 0 : index
    %c0_78 = arith.constant 0 : index
    %c0_79 = arith.constant 0 : index
    %40 = vector.load %arg9[%c0_76, %c0_77, %c0_78, %c0_79] : memref<1x6x6x16xf32, #tpu.memory_space<vmem>>, vector<1x6x6x16xf32>
    tpu.vector_store %arg9[%c0_76, %c0_77, %c0_78, %c0_79], %39 {strides = array<i32>} : memref<1x6x6x16xf32, #tpu.memory_space<vmem>>, vector<1x6x6x16xf32>,
    %c0_80 = arith.constant 0 : index
    %c0_81 = arith.constant 0 : index
    %c0_82 = arith.constant 0 : index
    %c0_83 = arith.constant 0 : index
    %41 = vector.load %arg9[%c0_80, %c0_81, %c0_82, %c0_83] : memref<1x6x6x16xf32, #tpu.memory_space<vmem>>, vector<1x6x2x16xf32>
    %c0_84 = arith.constant 0 : index
    %c0_85 = arith.constant 0 : index
    %c0_86 = arith.constant 0 : index
    %c0_87 = arith.constant 0 : index
    %42 = vector.load %arg10[%c0_84, %c0_85, %c0_86, %c0_87] : memref<1x6x2x80xf32, #tpu.memory_space<vmem>>, vector<1x6x2x16xf32>
    tpu.vector_store %arg10[%c0_84, %c0_85, %c0_86, %c0_87], %41 {strides = array<i32>} : memref<1x6x2x80xf32, #tpu.memory_space<vmem>>, vector<1x6x2x16xf32>,
    %c0_88 = arith.constant 0 : index
    %c0_89 = arith.constant 0 : index
    %c1_90 = arith.constant 1 : index
    %c0_91 = arith.constant 0 : index
    %43 = vector.load %arg9[%c0_88, %c0_89, %c1_90, %c0_91] : memref<1x6x6x16xf32, #tpu.memory_space<vmem>>, vector<1x6x2x16xf32>
    %c0_92 = arith.constant 0 : index
    %c0_93 = arith.constant 0 : index
    %c0_94 = arith.constant 0 : index
    %c16_95 = arith.constant 16 : index
    %44 = vector.load %arg10[%c0_92, %c0_93, %c0_94, %c16_95] : memref<1x6x2x80xf32, #tpu.memory_space<vmem>>, vector<1x6x2x16xf32>
    tpu.vector_store %arg10[%c0_92, %c0_93, %c0_94, %c16_95], %43 {strides = array<i32>} : memref<1x6x2x80xf32, #tpu.memory_space<vmem>>, vector<1x6x2x16xf32>,
    %c0_96 = arith.constant 0 : index
    %c0_97 = arith.constant 0 : index
    %c2_98 = arith.constant 2 : index
    %c0_99 = arith.constant 0 : index
    %45 = vector.load %arg9[%c0_96, %c0_97, %c2_98, %c0_99] : memref<1x6x6x16xf32, #tpu.memory_space<vmem>>, vector<1x6x2x16xf32>
    %c0_100 = arith.constant 0 : index
    %c0_101 = arith.constant 0 : index
    %c0_102 = arith.constant 0 : index
    %c32 = arith.constant 32 : index
    %46 = vector.load %arg10[%c0_100, %c0_101, %c0_102, %c32] : memref<1x6x2x80xf32, #tpu.memory_space<vmem>>, vector<1x6x2x16xf32>
    tpu.vector_store %arg10[%c0_100, %c0_101, %c0_102, %c32], %45 {strides = array<i32>} : memref<1x6x2x80xf32, #tpu.memory_space<vmem>>, vector<1x6x2x16xf32>,
    %c0_103 = arith.constant 0 : index
    %c0_104 = arith.constant 0 : index
    %c3_105 = arith.constant 3 : index
    %c0_106 = arith.constant 0 : index
    %47 = vector.load %arg9[%c0_103, %c0_104, %c3_105, %c0_106] : memref<1x6x6x16xf32, #tpu.memory_space<vmem>>, vector<1x6x2x16xf32>
    %c0_107 = arith.constant 0 : index
    %c0_108 = arith.constant 0 : index
    %c0_109 = arith.constant 0 : index
    %c48 = arith.constant 48 : index
    %48 = vector.load %arg10[%c0_107, %c0_108, %c0_109, %c48] : memref<1x6x2x80xf32, #tpu.memory_space<vmem>>, vector<1x6x2x16xf32>
    tpu.vector_store %arg10[%c0_107, %c0_108, %c0_109, %c48], %47 {strides = array<i32>} : memref<1x6x2x80xf32, #tpu.memory_space<vmem>>, vector<1x6x2x16xf32>,
    %c0_110 = arith.constant 0 : index
    %c0_111 = arith.constant 0 : index
    %c4_112 = arith.constant 4 : index
    %c0_113 = arith.constant 0 : index
    %49 = vector.load %arg9[%c0_110, %c0_111, %c4_112, %c0_113] : memref<1x6x6x16xf32, #tpu.memory_space<vmem>>, vector<1x6x2x16xf32>
    %c0_114 = arith.constant 0 : index
    %c0_115 = arith.constant 0 : index
    %c0_116 = arith.constant 0 : index
    %c64 = arith.constant 64 : index
    %50 = vector.load %arg10[%c0_114, %c0_115, %c0_116, %c64] : memref<1x6x2x80xf32, #tpu.memory_space<vmem>>, vector<1x6x2x16xf32>
    tpu.vector_store %arg10[%c0_114, %c0_115, %c0_116, %c64], %49 {strides = array<i32>} : memref<1x6x2x80xf32, #tpu.memory_space<vmem>>, vector<1x6x2x16xf32>,
    %c0_117 = arith.constant 0 : index
    %c0_118 = arith.constant 0 : index
    %c0_119 = arith.constant 0 : index
    %c0_120 = arith.constant 0 : index
    %51 = vector.load %arg10[%c0_117, %c0_118, %c0_119, %c0_120] : memref<1x6x2x80xf32, #tpu.memory_space<vmem>>, vector<1x2x2x80xf32>
    %c0_121 = arith.constant 0 : index
    %c0_122 = arith.constant 0 : index
    %c0_123 = arith.constant 0 : index
    %c0_124 = arith.constant 0 : index
    %52 = vector.load %arg11[%c0_121, %c0_122, %c0_123, %c0_124] : memref<1x2x2x400xf32, #tpu.memory_space<vmem>>, vector<1x2x2x80xf32>
    tpu.vector_store %arg11[%c0_121, %c0_122, %c0_123, %c0_124], %51 {strides = array<i32>} : memref<1x2x2x400xf32, #tpu.memory_space<vmem>>, vector<1x2x2x80xf32>,
    %c0_125 = arith.constant 0 : index
    %c1_126 = arith.constant 1 : index
    %c0_127 = arith.constant 0 : index
    %c0_128 = arith.constant 0 : index
    %53 = vector.load %arg10[%c0_125, %c1_126, %c0_127, %c0_128] : memref<1x6x2x80xf32, #tpu.memory_space<vmem>>, vector<1x2x2x80xf32>
    %c0_129 = arith.constant 0 : index
    %c0_130 = arith.constant 0 : index
    %c0_131 = arith.constant 0 : index
    %c80_132 = arith.constant 80 : index
    %54 = vector.load %arg11[%c0_129, %c0_130, %c0_131, %c80_132] : memref<1x2x2x400xf32, #tpu.memory_space<vmem>>, vector<1x2x2x80xf32>
    tpu.vector_store %arg11[%c0_129, %c0_130, %c0_131, %c80_132], %53 {strides = array<i32>} : memref<1x2x2x400xf32, #tpu.memory_space<vmem>>, vector<1x2x2x80xf32>,
    %c0_133 = arith.constant 0 : index
    %c2_134 = arith.constant 2 : index
    %c0_135 = arith.constant 0 : index
    %c0_136 = arith.constant 0 : index
    %55 = vector.load %arg10[%c0_133, %c2_134, %c0_135, %c0_136] : memref<1x6x2x80xf32, #tpu.memory_space<vmem>>, vector<1x2x2x80xf32>
    %c0_137 = arith.constant 0 : index
    %c0_138 = arith.constant 0 : index
    %c0_139 = arith.constant 0 : index
    %c160 = arith.constant 160 : index
    %56 = vector.load %arg11[%c0_137, %c0_138, %c0_139, %c160] : memref<1x2x2x400xf32, #tpu.memory_space<vmem>>, vector<1x2x2x80xf32>
    tpu.vector_store %arg11[%c0_137, %c0_138, %c0_139, %c160], %55 {strides = array<i32>} : memref<1x2x2x400xf32, #tpu.memory_space<vmem>>, vector<1x2x2x80xf32>,
    %c0_140 = arith.constant 0 : index
    %c3_141 = arith.constant 3 : index
    %c0_142 = arith.constant 0 : index
    %c0_143 = arith.constant 0 : index
    %57 = vector.load %arg10[%c0_140, %c3_141, %c0_142, %c0_143] : memref<1x6x2x80xf32, #tpu.memory_space<vmem>>, vector<1x2x2x80xf32>
    %c0_144 = arith.constant 0 : index
    %c0_145 = arith.constant 0 : index
    %c0_146 = arith.constant 0 : index
    %c240 = arith.constant 240 : index
    %58 = vector.load %arg11[%c0_144, %c0_145, %c0_146, %c240] : memref<1x2x2x400xf32, #tpu.memory_space<vmem>>, vector<1x2x2x80xf32>
    tpu.vector_store %arg11[%c0_144, %c0_145, %c0_146, %c240], %57 {strides = array<i32>} : memref<1x2x2x400xf32, #tpu.memory_space<vmem>>, vector<1x2x2x80xf32>,
    %c0_147 = arith.constant 0 : index
    %c4_148 = arith.constant 4 : index
    %c0_149 = arith.constant 0 : index
    %c0_150 = arith.constant 0 : index
    %59 = vector.load %arg10[%c0_147, %c4_148, %c0_149, %c0_150] : memref<1x6x2x80xf32, #tpu.memory_space<vmem>>, vector<1x2x2x80xf32>
    %c0_151 = arith.constant 0 : index
    %c0_152 = arith.constant 0 : index
    %c0_153 = arith.constant 0 : index
    %c320 = arith.constant 320 : index
    %60 = vector.load %arg11[%c0_151, %c0_152, %c0_153, %c320] : memref<1x2x2x400xf32, #tpu.memory_space<vmem>>, vector<1x2x2x80xf32>
    tpu.vector_store %arg11[%c0_151, %c0_152, %c0_153, %c320], %59 {strides = array<i32>} : memref<1x2x2x400xf32, #tpu.memory_space<vmem>>, vector<1x2x2x80xf32>,
    %c0_154 = arith.constant 0 : index
    %c0_155 = arith.constant 0 : index
    %c0_156 = arith.constant 0 : index
    %c0_157 = arith.constant 0 : index
    %61 = vector.load %arg11[%c0_154, %c0_155, %c0_156, %c0_157] : memref<1x2x2x400xf32, #tpu.memory_space<vmem>>, vector<1x2x2x400xf32>
    %62 = vector.shape_cast %61 : vector<1x2x2x400xf32> to vector<4x400xf32>
    %c0_158 = arith.constant 0 : index
    %c0_159 = arith.constant 0 : index
    %63 = vector.load %arg4[%c0_158, %c0_159] : memref<400x16xf32, #tpu.memory_space<vmem>>, vector<400x16xf32>
    %cst_160 = arith.constant dense<0.000000e+00> : vector<4x16xf32>
    %64 = tpu.matmul %62, %63, %cst_160 {dimension_numbers = #tpu.dot_dimension_numbers<[1], [0], [0], [1], [0, 0, 1, 1], [], []>} : vector<4x400xf32>, vector<400x16xf32>, vector<4x16xf32> -> vector<4x16xf32>
    %c0_161 = arith.constant 0 : index
    %c0_162 = arith.constant 0 : index
    %65 = vector.load %arg5[%c0_161, %c0_162] : memref<1x16xf32, #tpu.memory_space<vmem>>, vector<1x16xf32>
    %66 = vector.broadcast %65 : vector<1x16xf32> to vector<4x16xf32>
    %67 = arith.addf %64, %66 : vector<4x16xf32>
    %cst_163 = arith.constant 0.000000e+00 : f32
    %68 = vector.broadcast %cst_163 : f32 to vector<4x16xf32>
    %69 = arith.maximumf %67, %68 : vector<4x16xf32>
    %70 = vector.shape_cast %69 : vector<4x16xf32> to vector<1x4x16xf32>
    %c0_164 = arith.constant 0 : index
    %c0_165 = arith.constant 0 : index
    %c0_166 = arith.constant 0 : index
    %71 = vector.load %arg6[%c0_164, %c0_165, %c0_166] : memref<1x4x16xf32, #tpu.memory_space<vmem>>, vector<1x4x16xf32>
    tpu.vector_store %arg6[%c0_164, %c0_165, %c0_166], %70 {strides = array<i32>} : memref<1x4x16xf32, #tpu.memory_space<vmem>>, vector<1x4x16xf32>,
    return
  }
  func.func @transform_0(%arg0: i32) -> (i32, i32, i32, i32) {
    %c0_i32 = arith.constant 0 : i32
    %c0_i32_0 = arith.constant 0 : i32
    %c0_i32_1 = arith.constant 0 : i32
    %c0_i32_2 = arith.constant 0 : i32
    return %arg0, %c0_i32, %c0_i32_0, %c0_i32_1 : i32, i32, i32, i32
  }
  func.func @transform_1(%arg0: i32) -> (i32, i32) {
    %c0_i32 = arith.constant 0 : i32
    %c0_i32_0 = arith.constant 0 : i32
    %c0_i32_1 = arith.constant 0 : i32
    return %c0_i32, %c0_i32_0 : i32, i32
  }
  func.func @transform_2(%arg0: i32) -> (i32, i32) {
    %c0_i32 = arith.constant 0 : i32
    %c0_i32_0 = arith.constant 0 : i32
    %c0_i32_1 = arith.constant 0 : i32
    return %c0_i32, %c0_i32_0 : i32, i32
  }
  func.func @transform_3(%arg0: i32) -> (i32, i32) {
    %c0_i32 = arith.constant 0 : i32
    %c0_i32_0 = arith.constant 0 : i32
    %c0_i32_1 = arith.constant 0 : i32
    return %c0_i32, %c0_i32_0 : i32, i32
  }
  func.func @transform_4(%arg0: i32) -> (i32, i32) {
    %c0_i32 = arith.constant 0 : i32
    %c0_i32_0 = arith.constant 0 : i32
    %c0_i32_1 = arith.constant 0 : i32
    return %c0_i32, %c0_i32_0 : i32, i32
  }
  func.func @transform_5(%arg0: i32) -> (i32, i32, i32) {
    %c0_i32 = arith.constant 0 : i32
    %c0_i32_0 = arith.constant 0 : i32
    %c0_i32_1 = arith.constant 0 : i32
    return %arg0, %c0_i32, %c0_i32_0 : i32, i32, i32
  }
}

</mosaic_0001>

<bundles_post_ra>
// kernel: _forward.1
= control target key start
LH: loop header
LB: loop body
LE: loop exit
PB: predicated region body
PF: predicated region fallthrough
CT: control target
= control target key end

     0   :  { %10 = vsyncpa [#allocation8], 0  ;;  %s5308_s0 = inlined_call_operand.vmem [shape: f32[2,16,16,4], index: 0, kind: input, shape index: {}]   ;;  %s5309_s1 = inlined_call_operand.vmem [shape: f32[100,16], index: 1, kind: input, shape index: {}]   ;;  %s5310_s2 = inlined_call_operand.vmem [shape: f32[1,16], index: 2, kind: input, shape index: {}]   ;;  %s5311_s3 = inlined_call_operand.vmem [shape: f32[400,16], index: 3, kind: input, shape index: {}]   ;;  %s5312_s4 = inlined_call_operand.vmem [shape: f32[1,16], index: 4, kind: input, shape index: {}]   ;;  %s5313_s5 = inlined_call_operand.hbm [shape: f32[2,4,16], index: 5, kind: output, shape index: {}]  }
   0x1   :  { %12 = vsyncpa [#allocation8 + $0x1], 0  ;;  %s4039_s18 = smov 0   ;;  %s4041_s19 = smov 0  }
   0x2   :  { %s4043_s20 = smov 0   ;;  %s4045_s21 = smov 0  }
   0x3 LB: > { %s4060_s22 = sadd.s32 4294967295, %s3992_s21   ;;  %s3545_s23 = sadd.s32 4294967294, %s3992_s21   ;;  %s3992_s21 = sphi %s4045_s21, %s5319_s21   ;;  %s3988_s20 = sphi %s4043_s20, %s5318_s20   ;;  %s3984_s19 = sphi %s4041_s19, %s5317_s19   ;;  %s3980_s18 = sphi %s4039_s18, %s5316_s18  }
   0x4   : > { %s4064_s24 = sadd.s32 1, %s3992_s21   ;;  %s135_s25 = sadd.s32 1, %s3988_s20 }
   0x5   : > { %s132_s26 = ssub.s32 %s3992_s21, %s4064_s24  ;;  %p145_p0 = scmp.ne.s32.totalorder %s3988_s20, %s3984_s19 }
   0x6   : > { %p133_p1 = scmp.eq.s32.totalorder %s132_s26, 0  ;;  %p146_p2 = scmp.eq.s32.totalorder %s4060_s22, 1 }
   0x7   : > { %p151_p3 = scmp.ne.s32.totalorder %s3984_s19, %s3980_s18  ;;  %p152_p4 = scmp.eq.s32.totalorder %s3545_s23, 1 }
   0x8   : > { %s4075_s27 = scalar_select %p133_p1, %s3988_s20, %s135_s25  }
   0x9   : > { %p4077_p5 = por %p146_p2, %p145_p0  ;;  %p4081_p6 = por %p152_p4, %p151_p3 }
   0xa   : > { %p3548_p7 = scmp.ge.s32.totalorder %s3992_s21, 1  ;;  %p190_p8 = scmp.lt.s32.totalorder %s3992_s21, 3 }
   0xc   : > { %p191_p9 = pnand %p3548_p7, %p190_p8 }
   0xd   : > { %p218_p10 = scmp.lt.s32.totalorder (!%p191_p9), %s4060_s22, 1  ;;  %s3994_s10 = smov (!%p191_p9), 8   ;;  %vm255_vm0 = vcmask (!%p191_p9), 31744   ;;  %vm257_vm1 = vcmask (!%p191_p9), 27648   ;;  %vm449_vm2 = vcmask (!%p191_p9), 64544   ;;  %vm643_vm3 = vcmask (!%p191_p9), 97344  }
   0xe   : > { %194 = sbr.rel (%p191_p9) target bundleno = 1343 (0x53f), region = 40  ;;  %s3995_s11 = smov (!%p191_p9), 4   ;;  %vm837_vm4 = vcmask (!%p191_p9), 130144   ;;  %vm451_vm5 = vcmask (!%p191_p9), 60448   ;;  %vm1031_vm6 = vcmask (!%p191_p9), 162944   ;;  %vm645_vm7 = vcmask (!%p191_p9), 93248  }
   0xf   : > { %s3996_s12 = smov (!%p191_p9), 12   ;;  %s3997_s13 = smov (!%p191_p9), 16   ;;  %vm1089_vm8 = vcmask (!%p191_p9), 162816   ;;  %vm839_vm9 = vcmask (!%p191_p9), 126048   ;;  %vm1033_vm10 = vcmask (!%p191_p9), 158848   ;;  %vm1091_vm11 = vcmask (!%p191_p9), 158720  }
  0x10   : > { %s3998_s23 = smov (!%p191_p9), 40   ;;  %s3999_s25 = smov (!%p191_p9), 20   ;;  %vm1838_vm12 = vcmask (!%p191_p9), 1043456   ;;  %vm1236_vm13 = vcmask (!%p191_p9), 326816   ;;  %vm1383_vm14 = vcmask (!%p191_p9), 490816   ;;  %vm1530_vm15 = vcmask (!%p191_p9), 654816  }
  0x11   : > { %s4000_s8 = smov (!%p191_p9), 60   ;;  %s4001_s14 = smov (!%p191_p9), 80  }
  0x12   : > { %s4004_s26 = smov (!%p191_p9), 32   ;;  %s3655_s15 = sshll.u32 (!%p191_p9), %s4060_s22, 6 }
  0x15   : > { %s219_s30 = scalar_select %p218_p10, %s4060_s22, 1 }
  0x16   : > { %s4008_s22 = smov [#allocation7]  }
  0x17   : > { %s3658_s6 = sshll.u32 %s219_s30, 8  ;;  %s4005_s30 = smov 48  }
  0x18   : > { %s4092_s9 = scalar_lea.vmem %s5308_s0, %s3658_s6 }
  0x19   : > { %v485_v0 = vld [vmem:[%s4092_s9 + $0x12] sm:$0xff]  ;;  %v293_v3 = vld [vmem:[%s4092_s9 + $0x21] sm:$0xff]  ;;  %v294_v10 = vld [vmem:[%s4092_s9 + $0x29] sm:$0xf] }
  0x1a   : > { %v291_v1 = vld [vmem:[%s4092_s9 + $0x11] sm:$0xff]  ;;  %551 = vrot.lane.b32.xlu1 %v485_v0, %s3994_s10  ;;  %v487_v5 = vld [vmem:[%s4092_s9 + $0x22] sm:$0xff]  ;;  %v292_v7 = vld [vmem:[%s4092_s9 + $0x19] sm:$0xf] }
  0x1b   : > { %357 = vrot.lane.b32.xlu0 %v291_v1, %s3995_s11  ;;  %v295_v2 = vld [vmem:[%s4092_s9 + $0x31] sm:$0xff]  ;;  %v297_v6 = vld [vmem:[%s4092_s9 + $0x41] sm:$0xff]  ;;  %v486_v14 = vld [vmem:[%s4092_s9 + $0x1a] sm:$0xf] }
  0x1c   : > { %v679_v4 = vld [vmem:[%s4092_s9 + $0x13] sm:$0xff]  ;;  %v681_v8 = vld [vmem:[%s4092_s9 + $0x23] sm:$0xff]  ;;  %v680_v28 = vld [vmem:[%s4092_s9 + $0x1b] sm:$0xf] }
  0x1d   : > { %v489_v9 = vld [vmem:[%s4092_s9 + $0x32] sm:$0xff]  ;;  %v491_v12 = vld [vmem:[%s4092_s9 + $0x42] sm:$0xff]  ;;  %v488_v23 = vld [vmem:[%s4092_s9 + $0x2a] sm:$0xf] }
  0x1e   : > { %365 = vrot.lane.b32.xlu1 %v295_v2, %s3995_s11  ;;  %v873_v11 = vld [vmem:[%s4092_s9 + $0x14] sm:$0xff]  ;;  %v227_v16 = vld [vmem:[%s4092_s9 + $0x20] sm:$0xff]  ;;  %v228_v21 = vld [vmem:[%s4092_s9 + $0x28] sm:$0xf] }
  0x1f   : > { %361 = vrot.lane.b32.xlu0 %v293_v3, %s3995_s11  ;;  %v225_v13 = vld [vmem:[%s4092_s9 + $0x10] sm:$0xff]  ;;  %261 = vst.msk [vmem:[#allocation2 + $0x20] sm:$0xff] %vm255_vm0, %v227_v16  ;;  %v231_v17 = vld [vmem:[%s4092_s9 + $0x40] sm:$0xff]  ;;  %v226_v18 = vld [vmem:[%s4092_s9 + $0x18] sm:$0xf] }
  0x20   : > { %259 = vst.msk [vmem:[#allocation2 + $0x10] sm:$0xff] %vm255_vm0, %v225_v13  ;;  %v229_v15 = vld [vmem:[%s4092_s9 + $0x30] sm:$0xff]  ;;  %265 = vst.msk [vmem:[#allocation2 + $0x40] sm:$0xff] %vm255_vm0, %v231_v17  ;;  %v875_v19 = vld [vmem:[%s4092_s9 + $0x24] sm:$0xff] }
  0x21   : > { %263 = vst.msk [vmem:[#allocation2 + $0x30] sm:$0xff] %vm255_vm0, %v229_v15  ;;  %v683_v20 = vld [vmem:[%s4092_s9 + $0x33] sm:$0xff]  ;;  %v232_v25 = vld [vmem:[%s4092_s9 + $0x48] sm:$0xf]  ;;  %v874_v33 = vld [vmem:[%s4092_s9 + $0x1c] sm:$0xf] }
  0x22   : > { %745 = vrot.lane.b32.xlu1 %v679_v4, %s3996_s12  ;;  %260 = vst.msk [vmem:[#allocation2 + $0x18] sm:$0xf] %vm257_vm1, %v226_v18  ;;  %262 = vst.msk [vmem:[#allocation2 + $0x28] sm:$0xf] %vm257_vm1, %v228_v21  ;;  %v230_v22 = vld [vmem:[%s4092_s9 + $0x38] sm:$0xf] }
  0x23   : > { %555 = vrot.lane.b32.xlu0 %v487_v5, %s3994_s10  ;;  %v296_v24 = vld [vmem:[%s4092_s9 + $0x39] sm:$0xf]  ;;  %264 = vst.msk [vmem:[#allocation2 + $0x38] sm:$0xf] %vm257_vm1, %v230_v22  ;;  %266 = vst.msk [vmem:[#allocation2 + $0x48] sm:$0xf] %vm257_vm1, %v232_v25 }
  0x24   : > { %v233_v26 = vld [vmem:[%s4092_s9 + $0x50] sm:$0xff]  ;;  %v685_v27 = vld [vmem:[%s4092_s9 + $0x43] sm:$0xff]  ;;  %v490_v31 = vld [vmem:[%s4092_s9 + $0x3a] sm:$0xf] }
  0x25   : > { %267 = vst.msk [vmem:[#allocation2 + $0x50] sm:$0xff] %vm255_vm0, %v233_v26  ;;  %v298_v29 = vld [vmem:[%s4092_s9 + $0x49] sm:$0xf]  ;;  %v877_v30 = vld [vmem:[%s4092_s9 + $0x34] sm:$0xff]  ;;  %v235_v35 = vld [vmem:[%s4092_s9 + $0x60] sm:$0xff] }
  0x26   : > { %369 = vrot.lane.b32.xlu1 %v297_v6, %s3995_s11  ;;  %v299_v32 = vld [vmem:[%s4092_s9 + $0x51] sm:$0xff]  ;;  %v682_v34 = vld [vmem:[%s4092_s9 + $0x2b] sm:$0xf]  ;;  %269 = vst.msk [vmem:[#allocation2 + $0x60] sm:$0xff] %vm255_vm0, %v235_v35  ;;  %v684_v38 = vld [vmem:[%s4092_s9 + $0x3b] sm:$0xf] }
  0x27   : > { %359 = vrot.lane.b32.xlu0 %v292_v7, %s3995_s11  ;;  %v492_v36 = vld [vmem:[%s4092_s9 + $0x4a] sm:$0xf]  ;;  %v493_v39 = vld [vmem:[%s4092_s9 + $0x52] sm:$0xff]  ;;  %v301_v41 = vld [vmem:[%s4092_s9 + $0x61] sm:$0xff] }
  0x28   : > { %v879_v37 = vld [vmem:[%s4092_s9 + $0x44] sm:$0xff]  ;;  %v234_v40 = vld [vmem:[%s4092_s9 + $0x58] sm:$0xf]  ;;  %v876_v42 = vld [vmem:[%s4092_s9 + $0x2c] sm:$0xf] }
  0x29   : > { %268 = vst.msk [vmem:[#allocation2 + $0x58] sm:$0xf] %vm257_vm1, %v234_v40  ;;  %v687_v43 = vld [vmem:[%s4092_s9 + $0x53] sm:$0xff]  ;;  %v686_v44 = vld [vmem:[%s4092_s9 + $0x4b] sm:$0xf]  ;;  %v495_v48 = vld [vmem:[%s4092_s9 + $0x62] sm:$0xff] }
  0x2a   : > { %749 = vrot.lane.b32.xlu1 %v681_v8, %s3996_s12  ;;  %v300_v45 = vld [vmem:[%s4092_s9 + $0x59] sm:$0xf]  ;;  %v880_v47 = vld [vmem:[%s4092_s9 + $0x4c] sm:$0xf]  ;;  %v237_v49 = vld [vmem:[%s4092_s9 + $0x70] sm:$0xff] }
  0x2b   : > { %559 = vrot.lane.b32.xlu0 %v489_v9, %s3994_s10  ;;  %v878_v46 = vld [vmem:[%s4092_s9 + $0x3c] sm:$0xf]  ;;  %271 = vst.msk [vmem:[#allocation2 + $0x70] sm:$0xff] %vm255_vm0, %v237_v49  ;;  %v881_v51 = vld [vmem:[%s4092_s9 + $0x54] sm:$0xff]  ;;  %v236_v52 = vld [vmem:[%s4092_s9 + $0x68] sm:$0xf] }
  0x2c   : > { %v494_v50 = vld [vmem:[%s4092_s9 + $0x5a] sm:$0xf]  ;;  %270 = vst.msk [vmem:[#allocation2 + $0x68] sm:$0xf] %vm257_vm1, %v236_v52  ;;  %v689_v54 = vld [vmem:[%s4092_s9 + $0x63] sm:$0xff]  ;;  %v303_v56 = vld [vmem:[%s4092_s9 + $0x71] sm:$0xff] }
  0x2d   : > { %v688_v53 = vld [vmem:[%s4092_s9 + $0x5b] sm:$0xf]  ;;  %v883_v57 = vld [vmem:[%s4092_s9 + $0x64] sm:$0xff]  ;;  %v497_v62 = vld [vmem:[%s4092_s9 + $0x72] sm:$0xff] }
  0x2e   : > { %363 = vrot.lane.b32.xlu1 %v294_v10, %s3995_s11  ;;  %v238_v55 = vld [vmem:[%s4092_s9 + $0x78] sm:$0xf]  ;;  %v302_v58 = vld [vmem:[%s4092_s9 + $0x69] sm:$0xf]  ;;  %v882_v59 = vld [vmem:[%s4092_s9 + $0x5c] sm:$0xf] }
  0x2f   : > { %939 = vrot.lane.b32.xlu0 %v873_v11, %s3997_s13  ;;  %272 = vst.msk [vmem:[#allocation2 + $0x78] sm:$0xf] %vm257_vm1, %v238_v55  ;;  %v239_v60 = vld [vmem:[%s4092_s9 + $0x80] sm:$0xff]  ;;  %v304_v61 = vld [vmem:[%s4092_s9 + $0x79] sm:$0xf]  ;;  %v241_v8 = vld [vmem:[%s4092_s9 + $0x90] sm:$0xff] }
  0x30   : > { %273 = vst.msk [vmem:[#allocation2 + $0x80] sm:$0xff] %vm255_vm0, %v239_v60  ;;  %v691_v63 = vld [vmem:[%s4092_s9 + $0x73] sm:$0xff]  ;;  %v496_v0 = vld [vmem:[%s4092_s9 + $0x6a] sm:$0xf]  ;;  %v305_v2 = vld [vmem:[%s4092_s9 + $0x81] sm:$0xff] }
  0x31   : > { %v498_v1 = vld [vmem:[%s4092_s9 + $0x7a] sm:$0xf]  ;;  %v690_v4 = vld [vmem:[%s4092_s9 + $0x6b] sm:$0xf]  ;;  %v499_v7 = vld [vmem:[%s4092_s9 + $0x82] sm:$0xff]  ;;  %275 = vst.msk [vmem:[#allocation2 + $0x90] sm:$0xff] %vm255_vm0, %v241_v8 }
  0x32   : > { %563 = vrot.lane.b32.xlu1 %v491_v12, %s3994_s10  ;;  %v885_v3 = vld [vmem:[%s4092_s9 + $0x74] sm:$0xff]  ;;  %v240_v5 = vld [vmem:[%s4092_s9 + $0x88] sm:$0xf]  ;;  %v884_v10 = vld [vmem:[%s4092_s9 + $0x6c] sm:$0xf] }
  0x33   : > { %553 = vrot.lane.b32.xlu0 %v486_v14, %s3994_s10  ;;  %274 = vst.msk [vmem:[#allocation2 + $0x88] sm:$0xf] %vm257_vm1, %v240_v5  ;;  %v692_v6 = vld [vmem:[%s4092_s9 + $0x7b] sm:$0xf]  ;;  %v693_v9 = vld [vmem:[%s4092_s9 + $0x83] sm:$0xff]  ;;  %v307_v17 = vld [vmem:[%s4092_s9 + $0x91] sm:$0xff] }
  0x34   : > { %v306_v11 = vld [vmem:[%s4092_s9 + $0x89] sm:$0xf]  ;;  %v886_v12 = vld [vmem:[%s4092_s9 + $0x7c] sm:$0xf]  ;;  %v243_v13 = vld [vmem:[%s4092_s9 + $0xa0] sm:$0xff] }
  0x35   : > { %277 = vst.msk [vmem:[#allocation2 + $0xa0] sm:$0xff] %vm255_vm0, %v243_v13  ;;  %v887_v16 = vld [vmem:[%s4092_s9 + $0x84] sm:$0xff]  ;;  %v501_v21 = vld [vmem:[%s4092_s9 + $0x92] sm:$0xff]  ;;  %v700_v13 = vld [vmem:[%s4092_s9 + $0xbb] sm:$0xf] }
  0x36   : > { %943 = vrot.lane.b32.xlu1 %v875_v19, %s3997_s13  ;;  %v500_v22 = vld [vmem:[%s4092_s9 + $0x8a] sm:$0xf]  ;;  %v309_v26 = vld [vmem:[%s4092_s9 + $0xa1] sm:$0xff]  ;;  %v311_v49 = vld [vmem:[%s4092_s9 + $0xb1] sm:$0xff] }
  0x37   : > { %753 = vrot.lane.b32.xlu0 %v683_v20, %s3996_s12  ;;  %v242_v20 = vld [vmem:[%s4092_s9 + $0x98] sm:$0xf]  ;;  %v694_v25 = vld [vmem:[%s4092_s9 + $0x8b] sm:$0xf]  ;;  %v247_v55 = vld [vmem:[%s4092_s9 + $0xc0] sm:$0xff] }
  0x38   : > { %276 = vst.msk [vmem:[#allocation2 + $0x98] sm:$0xf] %vm257_vm1, %v242_v20  ;;  %v505_v60 = vld [vmem:[%s4092_s9 + $0xb2] sm:$0xff]  ;;  %v892_v20 = vld [vmem:[%s4092_s9 + $0xac] sm:$0xf] }
  0x39   : > { %281 = vst.msk [vmem:[#allocation2 + $0xc0] sm:$0xff] %vm255_vm0, %v247_v55  ;;  %v893_v8 = vld [vmem:[%s4092_s9 + $0xb4] sm:$0xff] }
  0x3a   : > { %557 = vrot.lane.b32.xlu1 %v488_v23, %s3994_s10  ;;  %v253_v55 = vld [vmem:[%s4092_s9 + $0xf0] sm:$0xff] }
  0x3b   : > { %367 = vrot.lane.b32.xlu0 %v296_v24, %s3995_s11  ;;  %287 = vst.msk [vmem:[#allocation2 + $0xf0] sm:$0xff] %vm255_vm0, %v253_v55  ;;  %v872_v55 = vld [vmem:[%s4092_s9 + $0xc] sm:$0xf] }
  0x3e   : > { %757 = vrot.lane.b32.xlu1 %v685_v27, %s3996_s12 }
  0x3f   : > { %747 = vrot.lane.b32.xlu0 %v680_v28, %s3996_s12 }
  0x42   : > { %371 = vrot.lane.b32.xlu1 %v298_v29, %s3995_s11  ;;  %v308_v29 = vld [vmem:[%s4092_s9 + $0x99] sm:$0xf] }
  0x43   : > { %947 = vrot.lane.b32.xlu0 %v877_v30, %s3997_s13  ;;  %v695_v30 = vld [vmem:[%s4092_s9 + $0x93] sm:$0xff] }
  0x46   : > { %561 = vrot.lane.b32.xlu1 %v490_v31, %s3994_s10 }
  0x47   : > { %373 = vrot.lane.b32.xlu0 %v299_v32, %s3995_s11 }
  0x4a   : > { %941 = vrot.lane.b32.xlu1 %v874_v33, %s3997_s13  ;;  %v888_v33 = vld [vmem:[%s4092_s9 + $0x8c] sm:$0xf] }
  0x4b   : > { %751 = vrot.lane.b32.xlu0 %v682_v34, %s3996_s12  ;;  %v503_v34 = vld [vmem:[%s4092_s9 + $0xa2] sm:$0xff] }
  0x4e   : > { %565 = vrot.lane.b32.xlu1 %v492_v36, %s3994_s10 }
  0x4f   : > { %951 = vrot.lane.b32.xlu0 %v879_v37, %s3997_s13  ;;  %v245_v37 = vld [vmem:[%s4092_s9 + $0xb0] sm:$0xff] }
  0x50   : > { %279 = vst.msk [vmem:[#allocation2 + $0xb0] sm:$0xff] %vm255_vm0, %v245_v37 }
  0x52   : > { %755 = vrot.lane.b32.xlu1 %v684_v38, %s3996_s12  ;;  %v502_v38 = vld [vmem:[%s4092_s9 + $0x9a] sm:$0xf] }
  0x53   : > { %567 = vrot.lane.b32.xlu0 %v493_v39, %s3994_s10  ;;  %v889_v39 = vld [vmem:[%s4092_s9 + $0x94] sm:$0xff] }
  0x56   : > { %377 = vrot.lane.b32.xlu1 %v301_v41, %s3995_s11 }
  0x57   : > { %945 = vrot.lane.b32.xlu0 %v876_v42, %s3997_s13  ;;  %v244_v42 = vld [vmem:[%s4092_s9 + $0xa8] sm:$0xf] }
  0x58   : > { %278 = vst.msk [vmem:[#allocation2 + $0xa8] sm:$0xf] %vm257_vm1, %v244_v42 }
  0x5a   : > { %761 = vrot.lane.b32.xlu1 %v687_v43, %s3996_s12  ;;  %v696_v43 = vld [vmem:[%s4092_s9 + $0x9b] sm:$0xf] }
  0x5b   : > { %759 = vrot.lane.b32.xlu0 %v686_v44, %s3996_s12  ;;  %v697_v44 = vld [vmem:[%s4092_s9 + $0xa3] sm:$0xff] }
  0x5e   : > { %375 = vrot.lane.b32.xlu1 %v300_v45, %s3995_s11 }
  0x5f   : > { %949 = vrot.lane.b32.xlu0 %v878_v46, %s3997_s13 }
  0x62   : > { %953 = vrot.lane.b32.xlu1 %v880_v47, %s3997_s13 }
  0x63   : > { %571 = vrot.lane.b32.xlu0 %v495_v48, %s3994_s10  ;;  %v246_v48 = vld [vmem:[%s4092_s9 + $0xb8] sm:$0xf] }
  0x64   : > { %280 = vst.msk [vmem:[#allocation2 + $0xb8] sm:$0xf] %vm257_vm1, %v246_v48 }
  0x66   : > { %569 = vrot.lane.b32.xlu1 %v494_v50, %s3994_s10  ;;  %v891_v50 = vld [vmem:[%s4092_s9 + $0xa4] sm:$0xff] }
  0x67   : > { %955 = vrot.lane.b32.xlu0 %v881_v51, %s3997_s13 }
  0x6a   : > { %763 = vrot.lane.b32.xlu1 %v688_v53, %s3996_s12  ;;  %v310_v53 = vld [vmem:[%s4092_s9 + $0xa9] sm:$0xf] }
  0x6b   : > { %765 = vrot.lane.b32.xlu0 %v689_v54, %s3996_s12  ;;  %v890_v54 = vld [vmem:[%s4092_s9 + $0x9c] sm:$0xf] }
  0x6e   : > { %381 = vrot.lane.b32.xlu1 %v303_v56, %s3995_s11 }
  0x6f   : > { %959 = vrot.lane.b32.xlu0 %v883_v57, %s3997_s13 }
  0x72   : > { %379 = vrot.lane.b32.xlu1 %v302_v58, %s3995_s11 }
  0x73   : > { %957 = vrot.lane.b32.xlu0 %v882_v59, %s3997_s13  ;;  %v312_v59 = vld [vmem:[%s4092_s9 + $0xb9] sm:$0xf] }
  0x76   : > { %383 = vrot.lane.b32.xlu1 %v304_v61, %s3995_s11 }
  0x77   : > { %575 = vrot.lane.b32.xlu0 %v497_v62, %s3994_s10 }
  0x7a   : > { %769 = vrot.lane.b32.xlu1 %v691_v63, %s3996_s12  ;;  %v699_v63 = vld [vmem:[%s4092_s9 + $0xb3] sm:$0xff] }
  0x7b   : > { %573 = vrot.lane.b32.xlu0 %v496_v0, %s3994_s10  ;;  %v504_v0 = vld [vmem:[%s4092_s9 + $0xaa] sm:$0xf] }
  0x7e   : > { %577 = vrot.lane.b32.xlu1 %v498_v1, %s3994_s10 }
  0x7f   : > { %385 = vrot.lane.b32.xlu0 %v305_v2, %s3995_s11 }
  0x82   : > { %963 = vrot.lane.b32.xlu1 %v885_v3, %s3997_s13  ;;  %v506_v3 = vld [vmem:[%s4092_s9 + $0xba] sm:$0xf] }
  0x83   : > { %767 = vrot.lane.b32.xlu0 %v690_v4, %s3996_s12  ;;  %v313_v4 = vld [vmem:[%s4092_s9 + $0xc1] sm:$0xff] }
  0x86   : > { %771 = vrot.lane.b32.xlu1 %v692_v6, %s3996_s12 }
  0x87   : > { %579 = vrot.lane.b32.xlu0 %v499_v7, %s3994_s10 }
  0x8a   : > { %773 = vrot.lane.b32.xlu1 %v693_v9, %s3996_s12  ;;  %v698_v9 = vld [vmem:[%s4092_s9 + $0xab] sm:$0xf] }
  0x8b   : > { %961 = vrot.lane.b32.xlu0 %v884_v10, %s3997_s13 }
  0x8c   : > { %v552_v14 = vpop.permute.xlu1 %551 }
  0x8d   : > { %v358_v15 = vpop.permute.xlu0 %357 }
  0x8e   : > { %453 = vst.msk [vmem:[#allocation2 + $0x10] sm:$0xff] %vm449_vm2, %v358_v15  ;;  %387 = vrot.lane.b32.xlu1 %v306_v11, %s3995_s11  ;;  %v249_v15 = vld [vmem:[%s4092_s9 + $0xd0] sm:$0xff] }
  0x8f   : > { %965 = vrot.lane.b32.xlu0 %v886_v12, %s3997_s13  ;;  %647 = vst.msk [vmem:[#allocation2 + $0x10] sm:$0xff] %vm643_vm3, %v552_v14  ;;  %v248_v12 = vld [vmem:[%s4092_s9 + $0xc8] sm:$0xf] }
  0x90   : > { %v366_v18 = vpop.permute.xlu1 %365  ;;  %282 = vst.msk [vmem:[#allocation2 + $0xc8] sm:$0xf] %vm257_vm1, %v248_v12  ;;  %v507_v14 = vld [vmem:[%s4092_s9 + $0xc2] sm:$0xff] }
  0x91   : > { %v362_v19 = vpop.permute.xlu0 %361  ;;  %457 = vst.msk [vmem:[#allocation2 + $0x30] sm:$0xff] %vm449_vm2, %v366_v18 }
  0x92   : > { %455 = vst.msk [vmem:[#allocation2 + $0x20] sm:$0xff] %vm449_vm2, %v362_v19  ;;  %967 = vrot.lane.b32.xlu1 %v887_v16, %s3997_s13  ;;  %v701_v19 = vld [vmem:[%s4092_s9 + $0xc3] sm:$0xff] }
  0x93   : > { %389 = vrot.lane.b32.xlu0 %v307_v17, %s3995_s11  ;;  %283 = vst.msk [vmem:[#allocation2 + $0xd0] sm:$0xff] %vm255_vm0, %v249_v15  ;;  %v513_v15 = vld [vmem:[%s4092_s9 + $0xf2] sm:$0xff] }
  0x94   : > { %v746_v23 = vpop.permute.xlu1 %745 }
  0x95   : > { %v556_v24 = vpop.permute.xlu0 %555  ;;  %841 = vst.msk [vmem:[#allocation2 + $0x10] sm:$0xff] %vm837_vm4, %v746_v23 }
  0x96   : > { %649 = vst.msk [vmem:[#allocation2 + $0x20] sm:$0xff] %vm643_vm3, %v556_v24  ;;  %583 = vrot.lane.b32.xlu1 %v501_v21, %s3994_s10  ;;  %v314_v24 = vld [vmem:[%s4092_s9 + $0xc9] sm:$0xf] }
  0x97   : > { %581 = vrot.lane.b32.xlu0 %v500_v22, %s3994_s10 }
  0x98   : > { %v370_v27 = vpop.permute.xlu1 %369 }
  0x99   : > { %v360_v28 = vpop.permute.xlu0 %359  ;;  %459 = vst.msk [vmem:[#allocation2 + $0x40] sm:$0xff] %vm449_vm2, %v370_v27 }
  0x9a   : > { %454 = vst.msk [vmem:[#allocation2 + $0x18] sm:$0xf] %vm451_vm5, %v360_v28  ;;  %775 = vrot.lane.b32.xlu1 %v694_v25, %s3996_s12  ;;  %v894_v25 = vld [vmem:[%s4092_s9 + $0xbc] sm:$0xf] }
  0x9b   : > { %393 = vrot.lane.b32.xlu0 %v309_v26, %s3995_s11  ;;  %v251_v26 = vld [vmem:[%s4092_s9 + $0xe0] sm:$0xff] }
  0x9c   : > { %v750_v31 = vpop.permute.xlu1 %749  ;;  %285 = vst.msk [vmem:[#allocation2 + $0xe0] sm:$0xff] %vm255_vm0, %v251_v26 }
  0x9d   : > { %v560_v32 = vpop.permute.xlu0 %559  ;;  %843 = vst.msk [vmem:[#allocation2 + $0x20] sm:$0xff] %vm837_vm4, %v750_v31 }
  0x9e   : > { %651 = vst.msk [vmem:[#allocation2 + $0x30] sm:$0xff] %vm643_vm3, %v560_v32  ;;  %391 = vrot.lane.b32.xlu1 %v308_v29, %s3995_s11  ;;  %v895_v29 = vld [vmem:[%s4092_s9 + $0xc4] sm:$0xff] }
  0x9f   : > { %777 = vrot.lane.b32.xlu0 %v695_v30, %s3996_s12  ;;  %v315_v30 = vld [vmem:[%s4092_s9 + $0xd1] sm:$0xff] }
  0xa0   : > { %v364_v35 = vpop.permute.xlu1 %363 }
  0xa1   : > { %v940_v36 = vpop.permute.xlu0 %939  ;;  %456 = vst.msk [vmem:[#allocation2 + $0x28] sm:$0xf] %vm451_vm5, %v364_v35  ;;  %v509_v35 = vld [vmem:[%s4092_s9 + $0xd2] sm:$0xff] }
  0xa2   : > { %1035 = vst.msk [vmem:[#allocation2 + $0x10] sm:$0xff] %vm1031_vm6, %v940_v36  ;;  %969 = vrot.lane.b32.xlu1 %v888_v33, %s3997_s13  ;;  %v250_v33 = vld [vmem:[%s4092_s9 + $0xd8] sm:$0xf]  ;;  %v508_v36 = vld [vmem:[%s4092_s9 + $0xca] sm:$0xf] }
  0xa3   : > { %587 = vrot.lane.b32.xlu0 %v503_v34, %s3994_s10  ;;  %284 = vst.msk [vmem:[#allocation2 + $0xd8] sm:$0xf] %vm257_vm1, %v250_v33  ;;  %v224_v33 = vld [vmem:[%s4092_s9 + $0x8] sm:$0xf] }
  0xa4   : > { %v564_v40 = vpop.permute.xlu1 %563  ;;  %258 = vst.msk [vmem:[#allocation2 + $0x8] sm:$0xf] %vm257_vm1, %v224_v33 }
  0xa5   : > { %v554_v41 = vpop.permute.xlu0 %553  ;;  %653 = vst.msk [vmem:[#allocation2 + $0x40] sm:$0xff] %vm643_vm3, %v564_v40  ;;  %v317_v40 = vld [vmem:[%s4092_s9 + $0xe1] sm:$0xff] }
  0xa6   : > { %648 = vst.msk [vmem:[#allocation2 + $0x18] sm:$0xf] %vm645_vm7, %v554_v41  ;;  %585 = vrot.lane.b32.xlu1 %v502_v38, %s3994_s10 }
  0xa7   : > { %971 = vrot.lane.b32.xlu0 %v889_v39, %s3997_s13  ;;  %v702_v39 = vld [vmem:[%s4092_s9 + $0xcb] sm:$0xf] }
  0xa8   : > { %v944_v45 = vpop.permute.xlu1 %943 }
  0xa9   : > { %v754_v46 = vpop.permute.xlu0 %753  ;;  %v4296_v47 = vld [vmem:[#allocation2 + $0x10] sm:$0xff]  ;;  %1037 = vst.msk [vmem:[#allocation2 + $0x20] sm:$0xff] %vm1031_vm6, %v944_v45 }
  0xaa   : > { %845 = vst.msk [vmem:[#allocation2 + $0x30] sm:$0xff] %vm837_vm4, %v754_v46  ;;  %779 = vrot.lane.b32.xlu1 %v696_v43, %s3996_s12  ;;  %v703_v45 = vld [vmem:[%s4092_s9 + $0xd3] sm:$0xff] }
  0xab   : > { %1093 = vst.msk [vmem:[#allocation3 + $0x10] sm:$0xff] %vm1089_vm8, %v4296_v47  ;;  %781 = vrot.lane.b32.xlu0 %v697_v44, %s3996_s12  ;;  %v316_v44 = vld [vmem:[%s4092_s9 + $0xd9] sm:$0xf] }
  0xac   : > { %v558_v51 = vpop.permute.xlu1 %557 }
  0xad   : > { %v368_v52 = vpop.permute.xlu0 %367  ;;  %650 = vst.msk [vmem:[#allocation2 + $0x28] sm:$0xf] %vm645_vm7, %v558_v51  ;;  %v511_v51 = vld [vmem:[%s4092_s9 + $0xe2] sm:$0xff] }
  0xae   : > { %458 = vst.msk [vmem:[#allocation2 + $0x38] sm:$0xf] %vm451_vm5, %v368_v52  ;;  %397 = vrot.lane.b32.xlu1 %v311_v49, %s3995_s11 }
  0xaf   : > { %975 = vrot.lane.b32.xlu0 %v891_v50, %s3997_s13  ;;  %v896_v50 = vld [vmem:[%s4092_s9 + $0xcc] sm:$0xf] }
  0xb0   : > { %v758_v56 = vpop.permute.xlu1 %757  ;;  %v4315_v58 = vld [vmem:[#allocation2 + $0x20] sm:$0xff] }
  0xb1   : > { %v748_v57 = vpop.permute.xlu0 %747  ;;  %847 = vst.msk [vmem:[#allocation2 + $0x40] sm:$0xff] %vm837_vm4, %v758_v56  ;;  %v510_v56 = vld [vmem:[%s4092_s9 + $0xda] sm:$0xf] }
  0xb2   : > { %842 = vst.msk [vmem:[#allocation2 + $0x18] sm:$0xf] %vm839_vm9, %v748_v57  ;;  %395 = vrot.lane.b32.xlu1 %v310_v53, %s3995_s11  ;;  %v897_v57 = vld [vmem:[%s4092_s9 + $0xd4] sm:$0xff] }
  0xb3   : > { %1095 = vst.msk [vmem:[#allocation3 + $0x20] sm:$0xff] %vm1089_vm8, %v4315_v58  ;;  %973 = vrot.lane.b32.xlu0 %v890_v54, %s3997_s13 }
  0xb4   : > { %v372_v61 = vpop.permute.xlu1 %371 }
  0xb5   : > { %v948_v62 = vpop.permute.xlu0 %947  ;;  %460 = vst.msk [vmem:[#allocation2 + $0x48] sm:$0xf] %vm451_vm5, %v372_v61  ;;  %v252_v61 = vld [vmem:[%s4092_s9 + $0xe8] sm:$0xf] }
  0xb6   : > { %1039 = vst.msk [vmem:[#allocation2 + $0x30] sm:$0xff] %vm1031_vm6, %v948_v62  ;;  %399 = vrot.lane.b32.xlu1 %v312_v59, %s3995_s11  ;;  %v704_v62 = vld [vmem:[%s4092_s9 + $0xdb] sm:$0xf] }
  0xb7   : > { %591 = vrot.lane.b32.xlu0 %v505_v60, %s3994_s10  ;;  %286 = vst.msk [vmem:[#allocation2 + $0xe8] sm:$0xf] %vm257_vm1, %v252_v61  ;;  %v1764_v61 = vld [vmem:[%s5309_s1 + $0x8] sm:$0xff] }
  0xb8   : > { %v562_v1 = vpop.permute.xlu1 %561 }
  0xb9   : > { %v374_v2 = vpop.permute.xlu0 %373  ;;  %652 = vst.msk [vmem:[#allocation2 + $0x38] sm:$0xf] %vm645_vm7, %v562_v1 }
  0xba   : > { %461 = vst.msk [vmem:[#allocation2 + $0x50] sm:$0xff] %vm449_vm2, %v374_v2  ;;  %785 = vrot.lane.b32.xlu1 %v699_v63, %s3996_s12  ;;  %v705_v63 = vld [vmem:[%s4092_s9 + $0xe3] sm:$0xff] }
  0xbb   : > { %589 = vrot.lane.b32.xlu0 %v504_v0, %s3994_s10 }
  0xbc   : > { %v942_v5 = vpop.permute.xlu1 %941 }
  0xbd   : > { %v752_v6 = vpop.permute.xlu0 %751  ;;  %v4338_v7 = vld [vmem:[#allocation2 + $0x30] sm:$0xff]  ;;  %1036 = vst.msk [vmem:[#allocation2 + $0x18] sm:$0xf] %vm1033_vm10, %v942_v5  ;;  %v899_v5 = vld [vmem:[%s4092_s9 + $0xe4] sm:$0xff] }
  0xbe   : > { %844 = vst.msk [vmem:[#allocation2 + $0x28] sm:$0xf] %vm839_vm9, %v752_v6  ;;  %593 = vrot.lane.b32.xlu1 %v506_v3, %s3994_s10  ;;  %v254_v3 = vld [vmem:[%s4092_s9 + $0xf8] sm:$0xf] }
  0xbf   : > { %1097 = vst.msk [vmem:[#allocation3 + $0x30] sm:$0xff] %vm1089_vm8, %v4338_v7  ;;  %401 = vrot.lane.b32.xlu0 %v313_v4, %s3995_s11  ;;  %v319_v4 = vld [vmem:[%s4092_s9 + $0xf1] sm:$0xff] }
  0xc0   : > { %v566_v10 = vpop.permute.xlu1 %565  ;;  %288 = vst.msk [vmem:[#allocation2 + $0xf8] sm:$0xf] %vm257_vm1, %v254_v3  ;;  %v1766_v3 = vld [vmem:[%s5309_s1 + $0x18] sm:$0xff]  ;;  %vm1677_vm1 = vcmask 818816  }
  0xc1   : > { %v952_v11 = vpop.permute.xlu0 %951  ;;  %654 = vst.msk [vmem:[#allocation2 + $0x48] sm:$0xf] %vm645_vm7, %v566_v10  ;;  %v318_v10 = vld [vmem:[%s4092_s9 + $0xe9] sm:$0xf] }
  0xc2   : > { %1041 = vst.msk [vmem:[#allocation2 + $0x40] sm:$0xff] %vm1031_vm6, %v952_v11  ;;  %979 = vrot.lane.b32.xlu1 %v893_v8, %s3997_s13  ;;  %v898_v11 = vld [vmem:[%s4092_s9 + $0xdc] sm:$0xf] }
  0xc3   : > { %783 = vrot.lane.b32.xlu0 %v698_v9, %s3996_s12 }
  0xc4   : > { %v756_v16 = vpop.permute.xlu1 %755  ;;  %v1068_v18 = vld [vmem:[#allocation2 + $0x18] sm:$0xf] }
  0xc5   : > { %v568_v17 = vpop.permute.xlu0 %567  ;;  %846 = vst.msk [vmem:[#allocation2 + $0x38] sm:$0xf] %vm839_vm9, %v756_v16 }
  0xc6   : > { %655 = vst.msk [vmem:[#allocation2 + $0x50] sm:$0xff] %vm643_vm3, %v568_v17  ;;  %787 = vrot.lane.b32.xlu1 %v700_v13, %s3996_s12 }
  0xc7   : > { %1094 = vst.msk [vmem:[#allocation3 + $0x18] sm:$0xf] %vm1091_vm11, %v1068_v18  ;;  %595 = vrot.lane.b32.xlu0 %v507_v14, %s3994_s10  ;;  %v320_v14 = vld [vmem:[%s4092_s9 + $0xf9] sm:$0xf] }
  0xc8   : > { %v378_v21 = vpop.permute.xlu1 %377  ;;  %v707_v18 = vld [vmem:[%s4092_s9 + $0xf3] sm:$0xff] }
  0xc9   : > { %v946_v22 = vpop.permute.xlu0 %945  ;;  %v4365_v23 = vld [vmem:[#allocation2 + $0x40] sm:$0xff]  ;;  %463 = vst.msk [vmem:[#allocation2 + $0x60] sm:$0xff] %vm449_vm2, %v378_v21 }
  0xca   : > { %1038 = vst.msk [vmem:[#allocation2 + $0x28] sm:$0xf] %vm1033_vm10, %v946_v22  ;;  %789 = vrot.lane.b32.xlu1 %v701_v19, %s3996_s12  ;;  %v512_v19 = vld [vmem:[%s4092_s9 + $0xea] sm:$0xf] }
  0xcb   : > { %1099 = vst.msk [vmem:[#allocation3 + $0x40] sm:$0xff] %vm1089_vm8, %v4365_v23  ;;  %977 = vrot.lane.b32.xlu0 %v892_v20, %s3997_s13  ;;  %v706_v22 = vld [vmem:[%s4092_s9 + $0xeb] sm:$0xf] }
  0xcc   : > { %v762_v27 = vpop.permute.xlu1 %761 }
  0xcd   : > { %v760_v28 = vpop.permute.xlu0 %759  ;;  %849 = vst.msk [vmem:[#allocation2 + $0x50] sm:$0xff] %vm837_vm4, %v762_v27 }
  0xce   : > { %848 = vst.msk [vmem:[#allocation2 + $0x48] sm:$0xf] %vm839_vm9, %v760_v28  ;;  %403 = vrot.lane.b32.xlu1 %v314_v24, %s3995_s11  ;;  %v514_v24 = vld [vmem:[%s4092_s9 + $0xfa] sm:$0xf]  ;;  %v223_v28 = vld [vmem:[%s4092_s9] sm:$0xff] }
  0xcf   : > { %981 = vrot.lane.b32.xlu0 %v894_v25, %s3997_s13  ;;  %256 = vst.msk [vmem:[#allocation2] sm:$0xff] %vm255_vm0, %v223_v28  ;;  %vm1238_vm0 = vcmask 322720  }
  0xd0   : > { %v376_v31 = vpop.permute.xlu1 %375 }
  0xd1   : > { %v950_v32 = vpop.permute.xlu0 %949  ;;  %462 = vst.msk [vmem:[#allocation2 + $0x58] sm:$0xf] %vm451_vm5, %v376_v31  ;;  %v1070_v34 = vld [vmem:[#allocation2 + $0x28] sm:$0xf] }
  0xd2   : > { %1040 = vst.msk [vmem:[#allocation2 + $0x38] sm:$0xf] %vm1033_vm10, %v950_v32  ;;  %983 = vrot.lane.b32.xlu1 %v895_v29, %s3997_s13  ;;  %v708_v29 = vld [vmem:[%s4092_s9 + $0xfb] sm:$0xf] }
  0xd3   : > { %405 = vrot.lane.b32.xlu0 %v315_v30, %s3995_s11  ;;  %1096 = vst.msk [vmem:[#allocation3 + $0x28] sm:$0xf] %vm1091_vm11, %v1070_v34  ;;  %v901_v30 = vld [vmem:[%s4092_s9 + $0xf4] sm:$0xff]  ;;  %v902_v34 = vld [vmem:[%s4092_s9 + $0xfc] sm:$0xf] }
  0xd4   : > { %v954_v37 = vpop.permute.xlu1 %953 }
  0xd5   : > { %v572_v38 = vpop.permute.xlu0 %571  ;;  %1042 = vst.msk [vmem:[#allocation2 + $0x48] sm:$0xf] %vm1033_vm10, %v954_v37 }
  0xd6   : > { %657 = vst.msk [vmem:[#allocation2 + $0x60] sm:$0xff] %vm643_vm3, %v572_v38  ;;  %599 = vrot.lane.b32.xlu1 %v509_v35, %s3994_s10  ;;  %v900_v35 = vld [vmem:[%s4092_s9 + $0xec] sm:$0xf] }
  0xd7   : > { %597 = vrot.lane.b32.xlu0 %v508_v36, %s3994_s10 }
  0xd8   : > { %v570_v41 = vpop.permute.xlu1 %569 }
  0xd9   : > { %v956_v42 = vpop.permute.xlu0 %955  ;;  %656 = vst.msk [vmem:[#allocation2 + $0x58] sm:$0xf] %vm645_vm7, %v570_v41  ;;  %v1072_v43 = vld [vmem:[#allocation2 + $0x38] sm:$0xf] }
  0xda   : > { %1043 = vst.msk [vmem:[#allocation2 + $0x50] sm:$0xff] %vm1031_vm6, %v956_v42  ;;  %791 = vrot.lane.b32.xlu1 %v702_v39, %s3996_s12  ;;  %v483_v39 = vld [vmem:[%s4092_s9 + $0x2] sm:$0xff]  ;;  %v1411_v28 = vld [vmem:[#allocation2 + $0x38] sm:$0xf] }
  0xdb   : > { %409 = vrot.lane.b32.xlu0 %v317_v40, %s3995_s11  ;;  %1098 = vst.msk [vmem:[#allocation3 + $0x38] sm:$0xf] %vm1091_vm11, %v1072_v43  ;;  %v289_v40 = vld [vmem:[%s4092_s9 + $0x1] sm:$0xff] }
  0xdc   : > { %v764_v46 = vpop.permute.xlu1 %763  ;;  %v1074_v49 = vld [vmem:[#allocation2 + $0x48] sm:$0xf] }
  0xdd   : > { %v766_v48 = vpop.permute.xlu0 %765  ;;  %850 = vst.msk [vmem:[#allocation2 + $0x58] sm:$0xf] %vm839_vm9, %v764_v46 }
  0xde   : > { %851 = vst.msk [vmem:[#allocation2 + $0x60] sm:$0xff] %vm837_vm4, %v766_v48  ;;  %407 = vrot.lane.b32.xlu1 %v316_v44, %s3995_s11  ;;  %v290_v44 = vld [vmem:[%s4092_s9 + $0x9] sm:$0xf] }
  0xdf   : > { %793 = vrot.lane.b32.xlu0 %v703_v45, %s3996_s12  ;;  %1100 = vst.msk [vmem:[#allocation3 + $0x48] sm:$0xf] %vm1091_vm11, %v1074_v49  ;;  %v677_v45 = vld [vmem:[%s4092_s9 + $0x3] sm:$0xff] }
  0xe0   : > { %v382_v52 = vpop.permute.xlu1 %381 }
  0xe1   : > { %v960_v53 = vpop.permute.xlu0 %959  ;;  %v4412_v54 = vld [vmem:[#allocation2 + $0x50] sm:$0xff]  ;;  %465 = vst.msk [vmem:[#allocation2 + $0x70] sm:$0xff] %vm449_vm2, %v382_v52 }
  0xe2   : > { %1045 = vst.msk [vmem:[#allocation2 + $0x60] sm:$0xff] %vm1031_vm6, %v960_v53  ;;  %985 = vrot.lane.b32.xlu1 %v896_v50, %s3997_s13  ;;  %v484_v50 = vld [vmem:[%s4092_s9 + $0xa] sm:$0xf] }
  0xe3   : > { %1101 = vst.msk [vmem:[#allocation3 + $0x50] sm:$0xff] %vm1089_vm8, %v4412_v54  ;;  %603 = vrot.lane.b32.xlu0 %v511_v51, %s3994_s10  ;;  %v871_v51 = vld [vmem:[%s4092_s9 + $0x4] sm:$0xff] }
  0xe4   : > { %v380_v59 = vpop.permute.xlu1 %379 }
  0xe5   : > { %v958_v60 = vpop.permute.xlu0 %957  ;;  %464 = vst.msk [vmem:[#allocation2 + $0x68] sm:$0xf] %vm451_vm5, %v380_v59 }
  0xe6   : > { %1044 = vst.msk [vmem:[#allocation2 + $0x58] sm:$0xf] %vm1033_vm10, %v958_v60  ;;  %601 = vrot.lane.b32.xlu1 %v510_v56, %s3994_s10  ;;  %v678_v56 = vld [vmem:[%s4092_s9 + $0xb] sm:$0xf]  ;;  %v1763_v60 = vld [vmem:[%s5309_s1] sm:$0xff]  ;;  %s3934_s9 = sshll.u32 %s4008_s22, 4  ;;  %s3935_s9 = int_to_ptr.vmem [resolvable:$false] %s3934_s9 }
  0xe7   : > { %987 = vrot.lane.b32.xlu0 %v897_v57, %s3997_s13 }
  0xe8   : > { %v384_v0 = vpop.permute.xlu1 %383 }
  0xe9   : > { %v576_v1 = vpop.permute.xlu0 %575  ;;  %v4432_v2 = vld [vmem:[#allocation2 + $0x60] sm:$0xff]  ;;  %466 = vst.msk [vmem:[#allocation2 + $0x78] sm:$0xf] %vm451_vm5, %v384_v0  ;;  %v3778_v0 = vpack.c.bf16 %v1764_v61, %v1763_v60  ;;  %v1268_v61 = vld [vmem:[#allocation2 + $0x48] sm:$0xf] }
  0xea   : > { %659 = vst.msk [vmem:[#allocation2 + $0x70] sm:$0xff] %vm643_vm3, %v576_v1  ;;  %795 = vrot.lane.b32.xlu1 %v704_v62, %s3996_s12  ;;  %v1765_v1 = vld [vmem:[%s5309_s1 + $0x10] sm:$0xff] }
  0xeb   : > { %1103 = vst.msk [vmem:[#allocation3 + $0x60] sm:$0xff] %vm1089_vm8, %v4432_v2  ;;  %797 = vrot.lane.b32.xlu0 %v705_v63, %s3996_s12  ;;  %3779 = vmatprep.subr.bf16.mxu0 %v3778_v0 }
  0xec   : > { %v770_v6 = vpop.permute.xlu1 %769  ;;  %3781 = vmatpush3.bf16.msra.mxu0 %v3778_v0 }
  0xed   : > { %v574_v8 = vpop.permute.xlu0 %573  ;;  %853 = vst.msk [vmem:[#allocation2 + $0x70] sm:$0xff] %vm837_vm4, %v770_v6  ;;  %v1076_v9 = vld [vmem:[#allocation2 + $0x58] sm:$0xf]  ;;  %v3782_v6 = vpack.c.bf16 %v1766_v3, %v1765_v1 }
  0xee   : > { %658 = vst.msk [vmem:[#allocation2 + $0x68] sm:$0xf] %vm645_vm7, %v574_v8  ;;  %413 = vrot.lane.b32.xlu1 %v319_v4, %s3995_s11  ;;  %v1117_v8 = vld [vmem:[#allocation2 + $0x18] sm:$0xf] }
  0xef   : > { %991 = vrot.lane.b32.xlu0 %v899_v5, %s3997_s13  ;;  %1102 = vst.msk [vmem:[#allocation3 + $0x58] sm:$0xf] %vm1091_vm11, %v1076_v9  ;;  %3783 = vmatprep.subr.bf16.mxu0 %v3782_v6  ;;  %v1270_v1 = vld [vmem:[#allocation2 + $0x58] sm:$0xf] }
  0xf0   : > { %v578_v12 = vpop.permute.xlu1 %577  ;;  %3785 = vmatpush3.bf16.msra.mxu0 %v3782_v6 }
  0xf1   : > { %v386_v13 = vpop.permute.xlu0 %385  ;;  %660 = vst.msk [vmem:[#allocation2 + $0x78] sm:$0xf] %vm645_vm7, %v578_v12 }
  0xf2   : > { %467 = vst.msk [vmem:[#allocation2 + $0x80] sm:$0xff] %vm449_vm2, %v386_v13  ;;  %411 = vrot.lane.b32.xlu1 %v318_v10, %s3995_s11  ;;  %v1768_v10 = vld [vmem:[%s5309_s1 + $0x28] sm:$0xff] }
  0xf3   : > { %989 = vrot.lane.b32.xlu0 %v898_v11, %s3997_s13 }
  0xf4   : > { %v964_v16 = vpop.permute.xlu1 %963 }
  0xf5   : > { %v768_v17 = vpop.permute.xlu0 %767  ;;  %1047 = vst.msk [vmem:[#allocation2 + $0x70] sm:$0xff] %vm1031_vm6, %v964_v16  ;;  %v1770_v16 = vld [vmem:[%s5309_s1 + $0x38] sm:$0xff] }
  0xf6   : > { %852 = vst.msk [vmem:[#allocation2 + $0x68] sm:$0xf] %vm839_vm9, %v768_v17  ;;  %415 = vrot.lane.b32.xlu1 %v320_v14, %s3995_s11 }
  0xf7   : > { %607 = vrot.lane.b32.xlu0 %v513_v15, %s3994_s10  ;;  %v1769_v15 = vld [vmem:[%s5309_s1 + $0x30] sm:$0xff] }
  0xf8   : > { %v772_v20 = vpop.permute.xlu1 %771 }
  0xf9   : > { %v580_v21 = vpop.permute.xlu0 %579  ;;  %854 = vst.msk [vmem:[#allocation2 + $0x78] sm:$0xf] %vm839_vm9, %v772_v20  ;;  %v1264_v20 = vld [vmem:[#allocation2 + $0x28] sm:$0xf] }
  0xfa   : > { %661 = vst.msk [vmem:[#allocation2 + $0x80] sm:$0xff] %vm643_vm3, %v580_v21  ;;  %801 = vrot.lane.b32.xlu1 %v707_v18, %s3996_s12  ;;  %v1772_v21 = vld [vmem:[%s5309_s1 + $0x48] sm:$0xff] }
  0xfb   : > { %605 = vrot.lane.b32.xlu0 %v512_v19, %s3994_s10  ;;  %v3790_v19 = vpack.c.bf16 %v1770_v16, %v1769_v15 }
  0xfc   : > { %v774_v25 = vpop.permute.xlu1 %773  ;;  %v4469_v27 = vld [vmem:[#allocation2 + $0x70] sm:$0xff] }
  0xfd   : > { %v962_v26 = vpop.permute.xlu0 %961  ;;  %855 = vst.msk [vmem:[#allocation2 + $0x80] sm:$0xff] %vm837_vm4, %v774_v25 }
  0xfe   : > { %1046 = vst.msk [vmem:[#allocation2 + $0x68] sm:$0xf] %vm1033_vm10, %v962_v26  ;;  %799 = vrot.lane.b32.xlu1 %v706_v22, %s3996_s12 }
  0xff   : > { %1105 = vst.msk [vmem:[#allocation3 + $0x70] sm:$0xff] %vm1089_vm8, %v4469_v27  ;;  %609 = vrot.lane.b32.xlu0 %v514_v24, %s3994_s10 }
 0x100   : > { %v388_v31 = vpop.permute.xlu1 %387 }
 0x101   : > { %v966_v32 = vpop.permute.xlu0 %965  ;;  %468 = vst.msk [vmem:[#allocation2 + $0x88] sm:$0xf] %vm451_vm5, %v388_v31 }
 0x102   : > { %1048 = vst.msk [vmem:[#allocation2 + $0x78] sm:$0xf] %vm1033_vm10, %v966_v32  ;;  %803 = vrot.lane.b32.xlu1 %v708_v29, %s3996_s12  ;;  %v1773_v29 = vld [vmem:[%s5309_s1 + $0x50] sm:$0xff] }
 0x103   : > { %995 = vrot.lane.b32.xlu0 %v901_v30, %s3997_s13  ;;  %v1774_v30 = vld [vmem:[%s5309_s1 + $0x58] sm:$0xff] }
 0x104   : > { %v968_v36 = vpop.permute.xlu1 %967  ;;  %v3798_v33 = vpack.c.bf16 %v1774_v30, %v1773_v29 }
 0x105   : > { %v390_v37 = vpop.permute.xlu0 %389  ;;  %1049 = vst.msk [vmem:[#allocation2 + $0x80] sm:$0xff] %vm1031_vm6, %v968_v36  ;;  %v1078_v38 = vld [vmem:[#allocation2 + $0x68] sm:$0xf] }
 0x106   : > { %469 = vst.msk [vmem:[#allocation2 + $0x90] sm:$0xff] %vm449_vm2, %v390_v37  ;;  %997 = vrot.lane.b32.xlu1 %v902_v34, %s3997_s13  ;;  %v1119_v34 = vld [vmem:[#allocation2 + $0x28] sm:$0xf] }
 0x107   : > { %993 = vrot.lane.b32.xlu0 %v900_v35, %s3997_s13  ;;  %1104 = vst.msk [vmem:[#allocation3 + $0x68] sm:$0xf] %vm1091_vm11, %v1078_v38  ;;  %v1558_v37 = vld [vmem:[#allocation2 + $0x48] sm:$0xf]  ;;  %v1775_v38 = vld [vmem:[%s5309_s1 + $0x60] sm:$0xf] }
 0x108   : > { %v584_v41 = vpop.permute.xlu1 %583 }
 0x109   : > { %v582_v42 = vpop.permute.xlu0 %581  ;;  %663 = vst.msk [vmem:[#allocation2 + $0x90] sm:$0xff] %vm643_vm3, %v584_v41  ;;  %v1080_v43 = vld [vmem:[#allocation2 + $0x78] sm:$0xf] }
 0x10a   : > { %662 = vst.msk [vmem:[#allocation2 + $0x88] sm:$0xf] %vm645_vm7, %v582_v42  ;;  %547 = vrot.lane.b32.xlu1 %v483_v39, %s3994_s10  ;;  %v1266_v41 = vld [vmem:[#allocation2 + $0x38] sm:$0xf] }
 0x10b   : > { %353 = vrot.lane.b32.xlu0 %v289_v40, %s3995_s11  ;;  %1106 = vst.msk [vmem:[#allocation3 + $0x78] sm:$0xf] %vm1091_vm11, %v1080_v43  ;;  %v1564_v15 = vld [vmem:[#allocation2 + $0x78] sm:$0xf] }
 0x10c   : > { %v776_v46 = vpop.permute.xlu1 %775  ;;  %v4503_v49 = vld [vmem:[#allocation2 + $0x80] sm:$0xff] }
 0x10d   : > { %v394_v48 = vpop.permute.xlu0 %393  ;;  %856 = vst.msk [vmem:[#allocation2 + $0x88] sm:$0xf] %vm839_vm9, %v776_v46 }
 0x10e   : > { %471 = vst.msk [vmem:[#allocation2 + $0xa0] sm:$0xff] %vm449_vm2, %v394_v48  ;;  %355 = vrot.lane.b32.xlu1 %v290_v44, %s3995_s11  ;;  %v1413_v44 = vld [vmem:[#allocation2 + $0x48] sm:$0xf] }
 0x10f   : > { %1107 = vst.msk [vmem:[#allocation3 + $0x80] sm:$0xff] %vm1089_vm8, %v4503_v49  ;;  %741 = vrot.lane.b32.xlu0 %v677_v45, %s3996_s12 }
 0x110   : > { %v392_v52 = vpop.permute.xlu1 %391 }
 0x111   : > { %v778_v53 = vpop.permute.xlu0 %777  ;;  %470 = vst.msk [vmem:[#allocation2 + $0x98] sm:$0xf] %vm451_vm5, %v392_v52  ;;  %v1121_v52 = vld [vmem:[#allocation2 + $0x38] sm:$0xf] }
 0x112   : > { %857 = vst.msk [vmem:[#allocation2 + $0x90] sm:$0xff] %vm837_vm4, %v778_v53  ;;  %549 = vrot.lane.b32.xlu1 %v484_v50, %s3994_s10  ;;  %v1560_v53 = vld [vmem:[#allocation2 + $0x58] sm:$0xf]  ;;  %s3936_s10 = scalar_lea.vmem %s3935_s9, 128 }
 0x113   : > { %935 = vrot.lane.b32.xlu0 %v871_v51, %s3997_s13 }
 0x114   : > { %v970_v57 = vpop.permute.xlu1 %969 }
 0x115   : > { %v588_v59 = vpop.permute.xlu0 %587  ;;  %1050 = vst.msk [vmem:[#allocation2 + $0x88] sm:$0xf] %vm1033_vm10, %v970_v57 }
 0x116   : > { %665 = vst.msk [vmem:[#allocation2 + $0xa0] sm:$0xff] %vm643_vm3, %v588_v59  ;;  %937 = vrot.lane.b32.xlu1 %v872_v55, %s3997_s13 }
 0x117   : > { %743 = vrot.lane.b32.xlu0 %v678_v56, %s3996_s12 }
 0x118   : > { %v586_v62 = vpop.permute.xlu1 %585 }
 0x119   : > { %v972_v63 = vpop.permute.xlu0 %971  ;;  %664 = vst.msk [vmem:[#allocation2 + $0x98] sm:$0xf] %vm645_vm7, %v586_v62 }
 0x11a   : > { %1051 = vst.msk [vmem:[#allocation2 + $0x90] sm:$0xff] %vm1031_vm6, %v972_v63  ;;  %1311 = vrot.lane.b32.xlu1 %v4315_v58, %s3998_s23 }
 0x11b   : > { %1164 = vrot.lane.b32.xlu0 %v4296_v47, %s3999_s25  ;;  %v1767_v47 = vld [vmem:[%s5309_s1 + $0x20] sm:$0xff] }
 0x11c   : > { %v780_v4 = vpop.permute.xlu1 %779  ;;  %v1082_v9 = vld [vmem:[#allocation2 + $0x88] sm:$0xf]  ;;  %v3786_v14 = vpack.c.bf16 %v1768_v10, %v1767_v47 }
 0x11d   : > { %v782_v5 = vpop.permute.xlu0 %781  ;;  %858 = vst.msk [vmem:[#allocation2 + $0x98] sm:$0xf] %vm839_vm9, %v780_v4  ;;  %v1562_v10 = vld [vmem:[#allocation2 + $0x68] sm:$0xf] }
 0x11e   : > { %859 = vst.msk [vmem:[#allocation2 + $0xa0] sm:$0xff] %vm837_vm4, %v782_v5  ;;  %1166 = vrot.lane.b32.xlu1 %v1117_v8, %s3999_s25  ;;  %3787 = vmatprep.subr.bf16.mxu0 %v3786_v14  ;;  %v1415_v5 = vld [vmem:[#allocation2 + $0x58] sm:$0xf]  ;;  %v1566_v30 = vld [vmem:[#allocation2 + $0x88] sm:$0xf] }
 0x11f   : > { %1458 = vrot.lane.b32.xlu0 %v4338_v7, %s4000_s8  ;;  %1108 = vst.msk [vmem:[#allocation3 + $0x88] sm:$0xf] %vm1091_vm11, %v1082_v9  ;;  %3789 = vmatpush3.bf16.msra.mxu0 %v3786_v14  ;;  %v1417_v9 = vld [vmem:[#allocation2 + $0x68] sm:$0xf]  ;;  %v1125_v14 = vld [vmem:[#allocation2 + $0x58] sm:$0xf] }
 0x120   : > { %v398_v11 = vpop.permute.xlu1 %397  ;;  %3791 = vmatprep.subr.bf16.mxu0 %v3790_v19 }
 0x121   : > { %v976_v12 = vpop.permute.xlu0 %975  ;;  %v4553_v13 = vld [vmem:[#allocation2 + $0x90] sm:$0xff]  ;;  %473 = vst.msk [vmem:[#allocation2 + $0xb0] sm:$0xff] %vm449_vm2, %v398_v11 }
 0x122   : > { %1053 = vst.msk [vmem:[#allocation2 + $0xa0] sm:$0xff] %vm1031_vm6, %v976_v12  ;;  %1605 = vrot.lane.b32.xlu1 %v4365_v23, %s4001_s14 }
 0x123   : > { %1109 = vst.msk [vmem:[#allocation3 + $0x90] sm:$0xff] %vm1089_vm8, %v4553_v13  ;;  %1168 = vrot.lane.b32.xlu0 %v4315_v58, %s3999_s25  ;;  %v1771_v58 = vld [vmem:[%s5309_s1 + $0x40] sm:$0xff]  ;;  %3793 = vmatpush3.bf16.msra.mxu0 %v3790_v19 }
 0x124   : > { %v396_v17 = vpop.permute.xlu1 %395  ;;  %v3794_v26 = vpack.c.bf16 %v1772_v21, %v1771_v58 }
 0x125   : > { %v974_v18 = vpop.permute.xlu0 %973  ;;  %472 = vst.msk [vmem:[#allocation2 + $0xa8] sm:$0xf] %vm451_vm5, %v396_v17 }
 0x126   : > { %1052 = vst.msk [vmem:[#allocation2 + $0x98] sm:$0xf] %vm1033_vm10, %v974_v18  ;;  %1315 = vrot.lane.b32.xlu1 %v4338_v7, %s3998_s23  ;;  %3795 = vmatprep.subr.bf16.mxu0 %v3794_v26 }
 0x127   : > { %1313 = vrot.lane.b32.xlu0 %v1264_v20, %s3998_s23  ;;  %3797 = vmatpush3.bf16.msra.mxu0 %v3794_v26  ;;  %v1272_v20 = vld [vmem:[#allocation2 + $0x68] sm:$0xf] }
 0x128   : > { %v400_v22 = vpop.permute.xlu1 %399  ;;  %3799 = vmatprep.subr.bf16.mxu0 %v3798_v33  ;;  %v1127_v26 = vld [vmem:[#allocation2 + $0x68] sm:$0xf] }
 0x129   : > { %v592_v24 = vpop.permute.xlu0 %591  ;;  %v4580_v25 = vld [vmem:[#allocation2 + $0xa0] sm:$0xff]  ;;  %474 = vst.msk [vmem:[#allocation2 + $0xb8] sm:$0xf] %vm451_vm5, %v400_v22  ;;  %v1419_v22 = vld [vmem:[#allocation2 + $0x78] sm:$0xf] }
 0x12a   : > { %667 = vst.msk [vmem:[#allocation2 + $0xb0] sm:$0xff] %vm643_vm3, %v592_v24  ;;  %1460 = vrot.lane.b32.xlu1 %v1411_v28, %s4000_s8 }
 0x12b   : > { %1111 = vst.msk [vmem:[#allocation3 + $0xa0] sm:$0xff] %vm1089_vm8, %v4580_v25  ;;  %1172 = vrot.lane.b32.xlu0 %v4338_v7, %s3999_s25  ;;  %3801 = vmatpush3.bf16.msra.mxu0 %v3798_v33 }
 0x12c   : > { %v786_v31 = vpop.permute.xlu1 %785  ;;  %3749 = vmatprep.subr.msk.mxu0 %vm1838_vm12, %v1775_v38 }
 0x12d   : > { %v590_v32 = vpop.permute.xlu0 %589  ;;  %861 = vst.msk [vmem:[#allocation2 + $0xb0] sm:$0xff] %vm837_vm4, %v786_v31  ;;  %v1084_v35 = vld [vmem:[#allocation2 + $0x98] sm:$0xf] }
 0x12e   : > { %666 = vst.msk [vmem:[#allocation2 + $0xa8] sm:$0xf] %vm645_vm7, %v590_v32  ;;  %1170 = vrot.lane.b32.xlu1 %v1119_v34, %s3999_s25  ;;  %v1274_v32 = vld [vmem:[#allocation2 + $0x78] sm:$0xf] }
 0x12f   : > { %1462 = vrot.lane.b32.xlu0 %v4365_v23, %s4000_s8  ;;  %1110 = vst.msk [vmem:[#allocation3 + $0x98] sm:$0xf] %vm1091_vm11, %v1084_v35  ;;  %3750 = vmatpush3.msk.msra.mxu0 %vm1838_vm12, %v1775_v38  ;;  %v1421_v35 = vld [vmem:[#allocation2 + $0x88] sm:$0xf]  ;;  %vm2951_vm12 = vcmask 123904  }
 0x130   : > { %v594_v7 = vpop.permute.xlu1 %593 }
 0x131   : > { %v402_v36 = vpop.permute.xlu0 %401  ;;  %668 = vst.msk [vmem:[#allocation2 + $0xb8] sm:$0xf] %vm645_vm7, %v594_v7 }
 0x132   : > { %475 = vst.msk [vmem:[#allocation2 + $0xc0] sm:$0xff] %vm449_vm2, %v402_v36  ;;  %1607 = vrot.lane.b32.xlu1 %v1558_v37, %s4001_s14 }
 0x133   : > { %1319 = vrot.lane.b32.xlu0 %v4365_v23, %s3998_s23 }
 0x134   : > { %v980_v39 = vpop.permute.xlu1 %979 }
 0x135   : > { %v784_v40 = vpop.permute.xlu0 %783  ;;  %1055 = vst.msk [vmem:[#allocation2 + $0xb0] sm:$0xff] %vm1031_vm6, %v980_v39  ;;  %v1129_v39 = vld [vmem:[#allocation2 + $0x78] sm:$0xf] }
 0x136   : > { %860 = vst.msk [vmem:[#allocation2 + $0xa8] sm:$0xf] %vm839_vm9, %v784_v40  ;;  %1317 = vrot.lane.b32.xlu1 %v1266_v41, %s3998_s23  ;;  %v1568_v40 = vld [vmem:[#allocation2 + $0x98] sm:$0xf] }
 0x137   : > { %1609 = vrot.lane.b32.xlu0 %v4412_v54, %s4001_s14 }
 0x138   : > { %v788_v42 = vpop.permute.xlu1 %787 }
 0x139   : > { %v596_v43 = vpop.permute.xlu0 %595  ;;  %862 = vst.msk [vmem:[#allocation2 + $0xb8] sm:$0xf] %vm839_vm9, %v788_v42 }
 0x13a   : > { %669 = vst.msk [vmem:[#allocation2 + $0xc0] sm:$0xff] %vm643_vm3, %v596_v43  ;;  %1464 = vrot.lane.b32.xlu1 %v1413_v44, %s4000_s8 }
 0x13b   : > { %1466 = vrot.lane.b32.xlu0 %v4412_v54, %s4000_s8 }
 0x13c   : > { %v790_v45 = vpop.permute.xlu1 %789  ;;  %v4619_v48 = vld [vmem:[#allocation2 + $0xb0] sm:$0xff] }
 0x13d   : > { %v978_v46 = vpop.permute.xlu0 %977  ;;  %863 = vst.msk [vmem:[#allocation2 + $0xc0] sm:$0xff] %vm837_vm4, %v790_v45  ;;  %v1276_v45 = vld [vmem:[#allocation2 + $0x88] sm:$0xf] }
 0x13e   : > { %1054 = vst.msk [vmem:[#allocation2 + $0xa8] sm:$0xf] %vm1033_vm10, %v978_v46  ;;  %1176 = vrot.lane.b32.xlu1 %v4365_v23, %s3999_s25  ;;  %v1123_v23 = vld [vmem:[#allocation2 + $0x48] sm:$0xf] }
 0x13f   : > { %1113 = vst.msk [vmem:[#allocation3 + $0xb0] sm:$0xff] %vm1089_vm8, %v4619_v48  ;;  %1613 = vrot.lane.b32.xlu0 %v4432_v2, %s4001_s14 }
 0x140   : > { %v404_v50 = vpop.permute.xlu1 %403 }
 0x141   : > { %v982_v51 = vpop.permute.xlu0 %981  ;;  %476 = vst.msk [vmem:[#allocation2 + $0xc8] sm:$0xf] %vm451_vm5, %v404_v50 }
 0x142   : > { %1056 = vst.msk [vmem:[#allocation2 + $0xb8] sm:$0xf] %vm1033_vm10, %v982_v51  ;;  %1174 = vrot.lane.b32.xlu1 %v1121_v52, %s3999_s25  ;;  %v1278_v52 = vld [vmem:[#allocation2 + $0x98] sm:$0xf] }
 0x143   : > { %1611 = vrot.lane.b32.xlu0 %v1560_v53, %s4001_s14 }
 0x144   : > { %v984_v55 = vpop.permute.xlu1 %983 }
 0x145   : > { %v406_v56 = vpop.permute.xlu0 %405  ;;  %1057 = vst.msk [vmem:[#allocation2 + $0xc0] sm:$0xff] %vm1031_vm6, %v984_v55  ;;  %v1086_v57 = vld [vmem:[#allocation2 + $0xa8] sm:$0xf] }
 0x146   : > { %477 = vst.msk [vmem:[#allocation2 + $0xd0] sm:$0xff] %vm449_vm2, %v406_v56  ;;  %1178 = vrot.lane.b32.xlu1 %v1123_v23, %s3999_s25  ;;  %v1423_v23 = vld [vmem:[#allocation2 + $0x98] sm:$0xf] }
 0x147   : > { %1323 = vrot.lane.b32.xlu0 %v4412_v54, %s3998_s23  ;;  %1112 = vst.msk [vmem:[#allocation3 + $0xa8] sm:$0xf] %vm1091_vm11, %v1086_v57 }
 0x148   : > { %v600_v59 = vpop.permute.xlu1 %599 }
 0x149   : > { %v598_v60 = vpop.permute.xlu0 %597  ;;  %671 = vst.msk [vmem:[#allocation2 + $0xd0] sm:$0xff] %vm643_vm3, %v600_v59  ;;  %v1088_v62 = vld [vmem:[#allocation2 + $0xb8] sm:$0xf]  ;;  %v1425_v59 = vld [vmem:[#allocation2 + $0xa8] sm:$0xf] }
 0x14a   : > { %670 = vst.msk [vmem:[#allocation2 + $0xc8] sm:$0xf] %vm645_vm7, %v598_v60  ;;  %1470 = vrot.lane.b32.xlu1 %v4432_v2, %s4000_s8 }
 0x14b   : > { %1321 = vrot.lane.b32.xlu0 %v1268_v61, %s3998_s23  ;;  %1114 = vst.msk [vmem:[#allocation3 + $0xb8] sm:$0xf] %vm1091_vm11, %v1088_v62  ;;  %v1570_v62 = vld [vmem:[#allocation2 + $0xa8] sm:$0xf] }
 0x14c   : > { %v792_v63 = vpop.permute.xlu1 %791 }
 0x14d   : > { %v410_v0 = vpop.permute.xlu0 %409  ;;  %864 = vst.msk [vmem:[#allocation2 + $0xc8] sm:$0xf] %vm839_vm9, %v792_v63 }
 0x14e   : > { %479 = vst.msk [vmem:[#allocation2 + $0xe0] sm:$0xff] %vm449_vm2, %v410_v0  ;;  %1325 = vrot.lane.b32.xlu1 %v1270_v1, %s3998_s23 }
 0x14f   : > { %1180 = vrot.lane.b32.xlu0 %v4412_v54, %s3999_s25 }
 0x150   : > { %v408_v3 = vpop.permute.xlu1 %407 }
 0x151   : > { %v794_v4 = vpop.permute.xlu0 %793  ;;  %478 = vst.msk [vmem:[#allocation2 + $0xd8] sm:$0xf] %vm451_vm5, %v408_v3  ;;  %v1133_v3 = vld [vmem:[#allocation2 + $0x98] sm:$0xf] }
 0x152   : > { %865 = vst.msk [vmem:[#allocation2 + $0xd0] sm:$0xff] %vm837_vm4, %v794_v4  ;;  %1617 = vrot.lane.b32.xlu1 %v4469_v27, %s4001_s14  ;;  %v1572_v4 = vld [vmem:[#allocation2 + $0xb8] sm:$0xf] }
 0x153   : > { %1468 = vrot.lane.b32.xlu0 %v1415_v5, %s4000_s8 }
 0x154   : > { %v986_v6 = vpop.permute.xlu1 %985 }
 0x155   : > { %v604_v8 = vpop.permute.xlu0 %603  ;;  %1058 = vst.msk [vmem:[#allocation2 + $0xc8] sm:$0xf] %vm1033_vm10, %v986_v6 }
 0x156   : > { %673 = vst.msk [vmem:[#allocation2 + $0xe0] sm:$0xff] %vm643_vm3, %v604_v8  ;;  %1472 = vrot.lane.b32.xlu1 %v1417_v9, %s4000_s8 }
 0x157   : > { %1327 = vrot.lane.b32.xlu0 %v4432_v2, %s3998_s23 }
 0x158   : > { %v602_v54 = vpop.permute.xlu1 %601 }
 0x159   : > { %v988_v47 = vpop.permute.xlu0 %987  ;;  %672 = vst.msk [vmem:[#allocation2 + $0xd8] sm:$0xf] %vm645_vm7, %v602_v54  ;;  %v1573_v54 = vld [vmem:[#allocation2 + $0xc0] sm:$0xff] }
 0x15a   : > { %1059 = vst.msk [vmem:[#allocation2 + $0xd0] sm:$0xff] %vm1031_vm6, %v988_v47  ;;  %1474 = vrot.lane.b32.xlu1 %v4469_v27, %s4000_s8 }
 0x15b   : > { %1615 = vrot.lane.b32.xlu0 %v1562_v10, %s4001_s14 }
 0x15c   : > { %v796_v11 = vpop.permute.xlu1 %795 }
 0x15d   : > { %v798_v12 = vpop.permute.xlu0 %797  ;;  %866 = vst.msk [vmem:[#allocation2 + $0xd8] sm:$0xf] %vm839_vm9, %v796_v11  ;;  %v1280_v11 = vld [vmem:[#allocation2 + $0xa8] sm:$0xf] }
 0x15e   : > { %867 = vst.msk [vmem:[#allocation2 + $0xe0] sm:$0xff] %vm837_vm4, %v798_v12  ;;  %1182 = vrot.lane.b32.xlu1 %v1125_v14, %s3999_s25 }
 0x15f   : > { %1619 = vrot.lane.b32.xlu0 %v1564_v15, %s4001_s14 }
 0x160   : > { %v414_v16 = vpop.permute.xlu1 %413 }
 0x161   : > { %v992_v17 = vpop.permute.xlu0 %991  ;;  %481 = vst.msk [vmem:[#allocation2 + $0xf0] sm:$0xff] %vm449_vm2, %v414_v16 }
 0x162   : > { %1061 = vst.msk [vmem:[#allocation2 + $0xe0] sm:$0xff] %vm1031_vm6, %v992_v17  ;;  %1621 = vrot.lane.b32.xlu1 %v4503_v49, %s4001_s14  ;;  %v1135_v17 = vld [vmem:[#allocation2 + $0xa8] sm:$0xf] }
 0x163   : > { %1184 = vrot.lane.b32.xlu0 %v4432_v2, %s3999_s25 }
 0x164   : > { %v412_v18 = vpop.permute.xlu1 %411 }
 0x165   : > { %v990_v19 = vpop.permute.xlu0 %989  ;;  %480 = vst.msk [vmem:[#allocation2 + $0xe8] sm:$0xf] %vm451_vm5, %v412_v18 }
 0x166   : > { %1060 = vst.msk [vmem:[#allocation2 + $0xd8] sm:$0xf] %vm1033_vm10, %v990_v19  ;;  %1331 = vrot.lane.b32.xlu1 %v4469_v27, %s3998_s23 }
 0x167   : > { %1329 = vrot.lane.b32.xlu0 %v1272_v20, %s3998_s23 }
 0x168   : > { %v416_v58 = vpop.permute.xlu1 %415 }
 0x169   : > { %v608_v21 = vpop.permute.xlu0 %607  ;;  %482 = vst.msk [vmem:[#allocation2 + $0xf8] sm:$0xf] %vm451_vm5, %v416_v58 }
 0x16a   : > { %675 = vst.msk [vmem:[#allocation2 + $0xf0] sm:$0xff] %vm643_vm3, %v608_v21  ;;  %1476 = vrot.lane.b32.xlu1 %v1419_v22, %s4000_s8 }
 0x16b   : > { %1188 = vrot.lane.b32.xlu0 %v4469_v27, %s3999_s25 }
 0x16c   : > { %v802_v2 = vpop.permute.xlu1 %801 }
 0x16d   : > { %v606_v24 = vpop.permute.xlu0 %605  ;;  %869 = vst.msk [vmem:[#allocation2 + $0xf0] sm:$0xff] %vm837_vm4, %v802_v2 }
 0x16e   : > { %674 = vst.msk [vmem:[#allocation2 + $0xe8] sm:$0xf] %vm645_vm7, %v606_v24  ;;  %1186 = vrot.lane.b32.xlu1 %v1127_v26, %s3999_s25  ;;  %v1282_v24 = vld [vmem:[#allocation2 + $0xb8] sm:$0xf]  ;;  %v1575_v26 = vld [vmem:[#allocation2 + $0xd0] sm:$0xff] }
 0x16f   : > { %1478 = vrot.lane.b32.xlu0 %v4503_v49, %s4000_s8 }
 0x170   : > { %v800_v28 = vpop.permute.xlu1 %799 }
 0x171   : > { %v610_v29 = vpop.permute.xlu0 %609  ;;  %868 = vst.msk [vmem:[#allocation2 + $0xe8] sm:$0xf] %vm839_vm9, %v800_v28 }
 0x172   : > { %676 = vst.msk [vmem:[#allocation2 + $0xf8] sm:$0xf] %vm645_vm7, %v610_v29  ;;  %1623 = vrot.lane.b32.xlu1 %v1566_v30, %s4001_s14 }
 0x173   : > { %1335 = vrot.lane.b32.xlu0 %v4503_v49, %s3998_s23 }
 0x174   : > { %v804_v27 = vpop.permute.xlu1 %803 }
 0x175   : > { %v996_v31 = vpop.permute.xlu0 %995  ;;  %870 = vst.msk [vmem:[#allocation2 + $0xf8] sm:$0xf] %vm839_vm9, %v804_v27  ;;  %v1429_v27 = vld [vmem:[#allocation2 + $0xc8] sm:$0xf] }
 0x176   : > { %1063 = vst.msk [vmem:[#allocation2 + $0xf0] sm:$0xff] %vm1031_vm6, %v996_v31  ;;  %1333 = vrot.lane.b32.xlu1 %v1274_v32, %s3998_s23 }
 0x177   : > { %1625 = vrot.lane.b32.xlu0 %v4553_v13, %s4001_s14 }
 0x178   : > { %v998_v33 = vpop.permute.xlu1 %997 }
 0x179   : > { %v994_v34 = vpop.permute.xlu0 %993  ;;  %1064 = vst.msk [vmem:[#allocation2 + $0xf8] sm:$0xf] %vm1033_vm10, %v998_v33 }
 0x17a   : > { %1062 = vst.msk [vmem:[#allocation2 + $0xe8] sm:$0xf] %vm1033_vm10, %v994_v34  ;;  %1480 = vrot.lane.b32.xlu1 %v1421_v35, %s4000_s8 }
 0x17b   : > { %1482 = vrot.lane.b32.xlu0 %v4553_v13, %s4000_s8 }
 0x17c   : > { %v548_v7 = vpop.permute.xlu1 %547 }
 0x17d   : > { %v354_v36 = vpop.permute.xlu0 %353 }
 0x17e   : > { %450 = vst.msk [vmem:[#allocation2] sm:$0xff] %vm449_vm2, %v354_v36  ;;  %1192 = vrot.lane.b32.xlu1 %v4503_v49, %s3999_s25  ;;  %v1131_v49 = vld [vmem:[#allocation2 + $0x88] sm:$0xf]  ;;  %vm1385_vm2 = vcmask 486720  }
 0x17f   : > { %644 = vst.msk [vmem:[#allocation2] sm:$0xff] %vm643_vm3, %v548_v7  ;;  %1629 = vrot.lane.b32.xlu0 %v4580_v25, %s4001_s14  ;;  %vm1532_vm3 = vcmask 650720   ;;  %v1577_v7 = vld [vmem:[#allocation2 + $0xe0] sm:$0xff] }
 0x180   : > { %v356_v37 = vpop.permute.xlu1 %355 }
 0x181   : > { %v742_v38 = vpop.permute.xlu0 %741  ;;  %452 = vst.msk [vmem:[#allocation2 + $0x8] sm:$0xf] %vm451_vm5, %v356_v37  ;;  %vm1679_vm5 = vcmask 814720  }
 0x182   : > { %838 = vst.msk [vmem:[#allocation2] sm:$0xff] %vm837_vm4, %v742_v38  ;;  %1190 = vrot.lane.b32.xlu1 %v1129_v39, %s3999_s25  ;;  %vm1801_vm4 = vcmask 818176  }
 0x183   : > { %1627 = vrot.lane.b32.xlu0 %v1568_v40, %s4001_s14  ;;  %v1137_v40 = vld [vmem:[#allocation2 + $0xb8] sm:$0xf] }
 0x184   : > { %v550_v41 = vpop.permute.xlu1 %549 }
 0x185   : > { %v936_v42 = vpop.permute.xlu0 %935  ;;  %646 = vst.msk [vmem:[#allocation2 + $0x8] sm:$0xf] %vm645_vm7, %v550_v41  ;;  %v1576_v41 = vld [vmem:[#allocation2 + $0xd8] sm:$0xf]  ;;  %vm2899_vm7 = vcmask 1042434  }
 0x186   : > { %1032 = vst.msk [vmem:[#allocation2] sm:$0xff] %vm1031_vm6, %v936_v42  ;;  %1194 = vrot.lane.b32.xlu1 %v1131_v49, %s3999_s25  ;;  %vm2897_vm6 = vcmask 1041409  }
 0x187   : > { %1339 = vrot.lane.b32.xlu0 %v4553_v13, %s3998_s23 }
 0x188   : > { %v938_v43 = vpop.permute.xlu1 %937 }
 0x189   : > { %v744_v44 = vpop.permute.xlu0 %743 }
 0x18a   : > { %840 = vst.msk [vmem:[#allocation2 + $0x8] sm:$0xf] %vm839_vm9, %v744_v44  ;;  %1486 = vrot.lane.b32.xlu1 %v4580_v25, %s4000_s8  ;;  %vm2903_vm9 = vcmask 1044484  }
 0x18b   : > { %1034 = vst.msk [vmem:[#allocation2 + $0x8] sm:$0xf] %vm1033_vm10, %v938_v43  ;;  %1337 = vrot.lane.b32.xlu0 %v1276_v45, %s3998_s23  ;;  %v1139_v43 = vld [vmem:[#allocation2 + $0xc8] sm:$0xf]  ;;  %vm2905_vm10 = vcmask 1045509  }
 0x18c   : > { %v1312_v46 = vpop.permute.xlu1 %1311 }
 0x18d   : > { %v1165_v50 = vpop.permute.xlu0 %1164  ;;  %v1065_v51 = vld [vmem:[#allocation2] sm:$0xff] }
 0x18e   : > { %1090 = vst.msk [vmem:[#allocation3] sm:$0xff] %vm1089_vm8, %v1065_v51  ;;  %1341 = vrot.lane.b32.xlu1 %v1278_v52, %s3998_s23  ;;  %v1431_v52 = vld [vmem:[#allocation2 + $0xd8] sm:$0xf]  ;;  %vm2901_vm8 = vcmask 1043459  }
 0x18f   : > { %1237 = vst.msk [vmem:[#allocation3] sm:$0xff] %vm1236_vm13, %v1165_v50  ;;  %1196 = vrot.lane.b32.xlu0 %v4553_v13, %s3999_s25 }
 0x190   : > { %1384 = vst.msk [vmem:[#allocation3] sm:$0xff] %vm1383_vm14, %v1312_v46  ;;  %v1167_v53 = vpop.permute.xlu1 %1166  ;;  %v1284_v46 = vld [vmem:[#allocation2 + $0xc8] sm:$0xf] }
 0x191   : > { %v1459_v55 = vpop.permute.xlu0 %1458 }
 0x192   : > { %v1066_v56 = vld [vmem:[#allocation2 + $0x8] sm:$0xf]  ;;  %1531 = vst.msk [vmem:[#allocation3] sm:$0xff] %vm1530_vm15, %v1459_v55  ;;  %1633 = vrot.lane.b32.xlu1 %v4619_v48, %s4001_s14 }
 0x193   : > { %1092 = vst.msk [vmem:[#allocation3 + $0x8] sm:$0xf] %vm1091_vm11, %v1066_v56  ;;  %1484 = vrot.lane.b32.xlu0 %v1423_v23, %s4000_s8  ;;  %v1433_v23 = vld [vmem:[#allocation2 + $0xe8] sm:$0xf]  ;;  %vm2938_vm11 = vcmask 128000  }
 0x194   : > { %1239 = vst.msk [vmem:[#allocation3 + $0x8] sm:$0xf] %vm1238_vm0, %v1167_v53  ;;  %v1606_v13 = vpop.permute.xlu1 %1605  ;;  %v1286_v53 = vld [vmem:[#allocation2 + $0xd8] sm:$0xf] }
 0x195   : > { %v1169_v57 = vpop.permute.xlu0 %1168  ;;  %1678 = vst.msk [vmem:[#allocation3] sm:$0xff] %vm1677_vm1, %v1606_v13  ;;  %v1579_v13 = vld [vmem:[#allocation2 + $0xf0] sm:$0xff] }
 0x196   : > { %1240 = vst.msk [vmem:[#allocation3 + $0x10] sm:$0xff] %vm1236_vm13, %v1169_v57  ;;  %1488 = vrot.lane.b32.xlu1 %v1425_v59, %s4000_s8 }
 0x197   : > { %1343 = vrot.lane.b32.xlu0 %v4580_v25, %s3998_s23 }
 0x198   : > { %v1316_v60 = vpop.permute.xlu1 %1315 }
 0x199   : > { %v1314_v61 = vpop.permute.xlu0 %1313  ;;  %1387 = vst.msk [vmem:[#allocation3 + $0x10] sm:$0xff] %vm1383_vm14, %v1316_v60 }
 0x19a   : > { %1386 = vst.msk [vmem:[#allocation3 + $0x8] sm:$0xf] %vm1385_vm2, %v1314_v61  ;;  %1490 = vrot.lane.b32.xlu1 %v4619_v48, %s4000_s8 }
 0x19b   : > { %1631 = vrot.lane.b32.xlu0 %v1570_v62, %s4001_s14  ;;  %v1580_v62 = vld [vmem:[#allocation2 + $0xf8] sm:$0xf] }
 0x19c   : > { %v1461_v63 = vpop.permute.xlu1 %1460  ;;  %v1703_v1 = vld [vmem:[#allocation3] sm:$0xff] }
 0x19d   : > { %v1173_v0 = vpop.permute.xlu0 %1172  ;;  %1533 = vst.msk [vmem:[#allocation3 + $0x8] sm:$0xf] %vm1532_vm3, %v1461_v63  ;;  %v1751_v5 = vcombine.high %v1703_v1, %v1703_v1  ;;  %v1578_v63 = vld [vmem:[#allocation2 + $0xe8] sm:$0xf] }
 0x19e   : > { %1242 = vst.msk [vmem:[#allocation3 + $0x20] sm:$0xff] %vm1236_vm13, %v1173_v0  ;;  %1198 = vrot.lane.b32.xlu1 %v1133_v3, %s3999_s25 }
 0x19f   : > { %1635 = vrot.lane.b32.xlu0 %v1572_v4, %s4001_s14  ;;  %v1783_v6 = vcombine.low %v1703_v1, %v1751_v5 }
 0x1a0   : > { %v1171_v8 = vpop.permute.xlu1 %1170 }
 0x1a1   : > { %v1463_v9 = vpop.permute.xlu0 %1462  ;;  %1241 = vst.msk [vmem:[#allocation3 + $0x18] sm:$0xf] %vm1238_vm0, %v1171_v8  ;;  %3751 = vmatprep.mubr.msk.f32.mxu0 %vm1801_vm4, %v1783_v6 }
 0x1a2   : > { %1534 = vst.msk [vmem:[#allocation3 + $0x10] sm:$0xff] %vm1530_vm15, %v1463_v9  ;;  %1637 = vrot.lane.b32.xlu1 %v1573_v54, %s4001_s14 }
 0x1a3   : > { %1200 = vrot.lane.b32.xlu0 %v4580_v25, %s3999_s25  ;;  %v1427_v25 = vld [vmem:[#allocation2 + $0xb8] sm:$0xf] }
 0x1a4   : > { %v1608_v47 = vpop.permute.xlu1 %1607 }
 0x1a5   : > { %v1320_v10 = vpop.permute.xlu0 %1319  ;;  %1680 = vst.msk [vmem:[#allocation3 + $0x8] sm:$0xf] %vm1679_vm5, %v1608_v47 }
 0x1a6   : > { %1389 = vst.msk [vmem:[#allocation3 + $0x20] sm:$0xff] %vm1383_vm14, %v1320_v10  ;;  %1347 = vrot.lane.b32.xlu1 %v4619_v48, %s3998_s23 }
 0x1a7   : > { %1345 = vrot.lane.b32.xlu0 %v1280_v11, %s3998_s23 }
 0x1a8   : > { %v1318_v12 = vpop.permute.xlu1 %1317 }
 0x1a9   : > { %v1610_v14 = vpop.permute.xlu0 %1609  ;;  %1388 = vst.msk [vmem:[#allocation3 + $0x18] sm:$0xf] %vm1385_vm2, %v1318_v12 }
 0x1aa   : > { %1681 = vst.msk [vmem:[#allocation3 + $0x10] sm:$0xff] %vm1677_vm1, %v1610_v14  ;;  %1492 = vrot.lane.b32.xlu1 %v1427_v25, %s4000_s8 }
 0x1ab   : > { %1204 = vrot.lane.b32.xlu0 %v4619_v48, %s3999_s25  ;;  %v1574_v48 = vld [vmem:[#allocation2 + $0xc8] sm:$0xf] }
 0x1ac   : > { %v1465_v15 = vpop.permute.xlu1 %1464  ;;  %v1704_v20 = vld [vmem:[#allocation3 + $0x8] sm:$0xf] }
 0x1ad   : > { %v1467_v16 = vpop.permute.xlu0 %1466  ;;  %1535 = vst.msk [vmem:[#allocation3 + $0x18] sm:$0xf] %vm1532_vm3, %v1465_v15 }
 0x1ae   : > { %1536 = vst.msk [vmem:[#allocation3 + $0x20] sm:$0xff] %vm1530_vm15, %v1467_v16  ;;  %1202 = vrot.lane.b32.xlu1 %v1135_v17, %s3999_s25 }
 0x1af   : > { %1494 = vrot.lane.b32.xlu0 %v1573_v54, %s4000_s8 }
 0x1b0   : > { %v1177_v18 = vpop.permute.xlu1 %1176 }
 0x1b1   : > { %v1614_v19 = vpop.permute.xlu0 %1613  ;;  %v1705_v58 = vld [vmem:[#allocation3 + $0x10] sm:$0xff]  ;;  %1244 = vst.msk [vmem:[#allocation3 + $0x30] sm:$0xff] %vm1236_vm13, %v1177_v18 }
 0x1b2   : > { %1683 = vst.msk [vmem:[#allocation3 + $0x20] sm:$0xff] %vm1677_vm1, %v1614_v19  ;;  %v1784_v21 = vcombine.low %v1704_v20, %v1705_v58  ;;  %1639 = vrot.lane.b32.xlu1 %v1574_v48, %s4001_s14  ;;  %v1752_v32 = vcombine.high %v1705_v58, %v1705_v58 }
 0x1b3   : > { %1351 = vrot.lane.b32.xlu0 %v1573_v54, %s3998_s23 }
 0x1b4   : > { %3752 = vmatmul.mubr.msk.f32.vlgmr.msra.gmra.mrb[0].mxu0 %vm1801_vm4, %v1784_v21  ;;  %v1175_v22 = vpop.permute.xlu1 %1174 }
 0x1b5   : > { %v1612_v2 = vpop.permute.xlu0 %1611  ;;  %1243 = vst.msk [vmem:[#allocation3 + $0x28] sm:$0xf] %vm1238_vm0, %v1175_v22 }
 0x1b6   : > { %1682 = vst.msk [vmem:[#allocation3 + $0x18] sm:$0xf] %vm1679_vm5, %v1612_v2  ;;  %1349 = vrot.lane.b32.xlu1 %v1282_v24, %s3998_s23 }
 0x1b7   : > { %1641 = vrot.lane.b32.xlu0 %v1575_v26, %s4001_s14 }
 0x1b8   : > { %v1179_v28 = vpop.permute.xlu1 %1178 }
 0x1b9   : > { %v1324_v29 = vpop.permute.xlu0 %1323  ;;  %v1707_v30 = vld [vmem:[#allocation3 + $0x20] sm:$0xff]  ;;  %1245 = vst.msk [vmem:[#allocation3 + $0x38] sm:$0xf] %vm1238_vm0, %v1179_v28 }
 0x1ba   : > { %1391 = vst.msk [vmem:[#allocation3 + $0x30] sm:$0xff] %vm1383_vm14, %v1324_v29  ;;  %1496 = vrot.lane.b32.xlu1 %v1429_v27, %s4000_s8  ;;  %v1753_v31 = vcombine.high %v1707_v30, %v1707_v30 }
 0x1bb   : > { %1498 = vrot.lane.b32.xlu0 %v1575_v26, %s4000_s8 }
 0x1bc   : > { %v1471_v33 = vpop.permute.xlu1 %1470  ;;  %v1786_v37 = vcombine.low %v1707_v30, %v1753_v31 }
 0x1bd   : > { %v1322_v34 = vpop.permute.xlu0 %1321  ;;  %v1706_v35 = vld [vmem:[#allocation3 + $0x18] sm:$0xf]  ;;  %1538 = vst.msk [vmem:[#allocation3 + $0x30] sm:$0xff] %vm1530_vm15, %v1471_v33 }
 0x1be   : > { %1390 = vst.msk [vmem:[#allocation3 + $0x28] sm:$0xf] %vm1385_vm2, %v1322_v34  ;;  %v1785_v36 = vcombine.low %v1752_v32, %v1706_v35  ;;  %1208 = vrot.lane.b32.xlu1 %v1573_v54, %s3999_s25 }
 0x1bf   : > { %1645 = vrot.lane.b32.xlu0 %v1577_v7, %s4001_s14 }
 0x1c0   : > { %3754 = vmatprep.mubr.msk.f32.mxu0 %vm1801_vm4, %v1785_v36  ;;  %v1326_v38 = vpop.permute.xlu1 %1325 }
 0x1c1   : > { %v1181_v39 = vpop.permute.xlu0 %1180  ;;  %3755 = vmatmul.mubr.msk.f32.gmra.mrb[2].mxu0 %vm1801_vm4, %v1786_v37  ;;  %1392 = vst.msk [vmem:[#allocation3 + $0x38] sm:$0xf] %vm1385_vm2, %v1326_v38 }
 0x1c2   : > { %1246 = vst.msk [vmem:[#allocation3 + $0x40] sm:$0xff] %vm1236_vm13, %v1181_v39  ;;  %1206 = vrot.lane.b32.xlu1 %v1137_v40, %s3999_s25 }
 0x1c3   : > { %1643 = vrot.lane.b32.xlu0 %v1576_v41, %s4001_s14 }
 0x1c4   : > { %v1618_v42 = vpop.permute.xlu1 %1617 }
 0x1c5   : > { %v1469_v49 = vpop.permute.xlu0 %1468  ;;  %1685 = vst.msk [vmem:[#allocation3 + $0x30] sm:$0xff] %vm1677_vm1, %v1618_v42 }
 0x1c6   : > { %1537 = vst.msk [vmem:[#allocation3 + $0x28] sm:$0xf] %vm1532_vm3, %v1469_v49  ;;  %1210 = vrot.lane.b32.xlu1 %v1139_v43, %s3999_s25 }
 0x1c7   : > { %1355 = vrot.lane.b32.xlu0 %v1575_v26, %s3998_s23 }
 0x1c8   : > { %v1473_v44 = vpop.permute.xlu1 %1472 }
 0x1c9   : > { %v1328_v45 = vpop.permute.xlu0 %1327  ;;  %1539 = vst.msk [vmem:[#allocation3 + $0x38] sm:$0xf] %vm1532_vm3, %v1473_v44 }
 0x1ca   : > { %1393 = vst.msk [vmem:[#allocation3 + $0x40] sm:$0xff] %vm1383_vm14, %v1328_v45  ;;  %1502 = vrot.lane.b32.xlu1 %v1577_v7, %s4000_s8 }
 0x1cb   : > { %1353 = vrot.lane.b32.xlu0 %v1284_v46, %s3998_s23 }
 0x1cc   : > { %v1475_v50 = vpop.permute.xlu1 %1474  ;;  %v1709_v61 = vld [vmem:[#allocation3 + $0x30] sm:$0xff] }
 0x1cd   : > { %v1616_v51 = vpop.permute.xlu0 %1615  ;;  %1540 = vst.msk [vmem:[#allocation3 + $0x40] sm:$0xff] %vm1530_vm15, %v1475_v50  ;;  %v1754_v1 = vcombine.high %v1709_v61, %v1709_v61 }
 0x1ce   : > { %1684 = vst.msk [vmem:[#allocation3 + $0x28] sm:$0xf] %vm1679_vm5, %v1616_v51  ;;  %1500 = vrot.lane.b32.xlu1 %v1431_v52, %s4000_s8 }
 0x1cf   : > { %1357 = vrot.lane.b32.xlu0 %v1286_v53, %s3998_s23 }
 0x1d0   : > { %v1183_v55 = vpop.permute.xlu1 %1182 }
 0x1d1   : > { %v1620_v56 = vpop.permute.xlu0 %1619  ;;  %1247 = vst.msk [vmem:[#allocation3 + $0x48] sm:$0xf] %vm1238_vm0, %v1183_v55 }
 0x1d2   : > { %1686 = vst.msk [vmem:[#allocation3 + $0x38] sm:$0xf] %vm1679_vm5, %v1620_v56  ;;  %1504 = vrot.lane.b32.xlu1 %v1433_v23, %s4000_s8  ;;  %s4003_s8 = smov 64  }
 0x1d3   : > { %1649 = vrot.lane.b32.xlu0 %v1579_v13, %s4001_s14 }
 0x1d4   : > { %v1622_v57 = vpop.permute.xlu1 %1621 }
 0x1d5   : > { %v1185_v59 = vpop.permute.xlu0 %1184  ;;  %v1708_v60 = vld [vmem:[#allocation3 + $0x28] sm:$0xf]  ;;  %1687 = vst.msk [vmem:[#allocation3 + $0x40] sm:$0xff] %vm1677_vm1, %v1622_v57 }
 0x1d6   : > { %1248 = vst.msk [vmem:[#allocation3 + $0x50] sm:$0xff] %vm1236_vm13, %v1185_v59  ;;  %v1787_v0 = vcombine.low %v1708_v60, %v1709_v61  ;;  %1651 = vrot.lane.b32.xlu1 %v1580_v62, %s4001_s14 }
 0x1d7   : > { %1647 = vrot.lane.b32.xlu0 %v1578_v63, %s4001_s14 }
 0x1d8   : > { %3757 = vmatprep.mubr.msk.f32.mxu0 %vm1801_vm4, %v1787_v0  ;;  %v1332_v3 = vpop.permute.xlu1 %1331 }
 0x1d9   : > { %v1330_v4 = vpop.permute.xlu0 %1329  ;;  %v1710_v5 = vld [vmem:[#allocation3 + $0x38] sm:$0xf]  ;;  %1395 = vst.msk [vmem:[#allocation3 + $0x50] sm:$0xff] %vm1383_vm14, %v1332_v3 }
 0x1da   : > { %1394 = vst.msk [vmem:[#allocation3 + $0x48] sm:$0xf] %vm1385_vm2, %v1330_v4  ;;  %v1788_v6 = vcombine.low %v1754_v1, %v1710_v5 }
 0x1dc   : > { %3758 = vmatmul.mubr.msk.f32.gmra.mrb[4].mxu0 %vm1801_vm4, %v1788_v6  ;;  %v1477_v8 = vpop.permute.xlu1 %1476  ;;  %v1711_v54 = vld [vmem:[#allocation3 + $0x40] sm:$0xff] }
 0x1dd   : > { %v1189_v9 = vpop.permute.xlu0 %1188  ;;  %1541 = vst.msk [vmem:[#allocation3 + $0x48] sm:$0xf] %vm1532_vm3, %v1477_v8  ;;  %v1755_v47 = vcombine.high %v1711_v54, %v1711_v54 }
 0x1de   : > { %1250 = vst.msk [vmem:[#allocation3 + $0x60] sm:$0xff] %vm1236_vm13, %v1189_v9 }
 0x1df   : > { %v1789_v10 = vcombine.low %v1711_v54, %v1755_v47 }
 0x1e0   : > { %v1187_v11 = vpop.permute.xlu1 %1186 }
 0x1e1   : > { %v1479_v12 = vpop.permute.xlu0 %1478  ;;  %1249 = vst.msk [vmem:[#allocation3 + $0x58] sm:$0xf] %vm1238_vm0, %v1187_v11  ;;  %3760 = vmatprep.mubr.msk.f32.mxu0 %vm1801_vm4, %v1789_v10 }
 0x1e2   : > { %1542 = vst.msk [vmem:[#allocation3 + $0x50] sm:$0xff] %vm1530_vm15, %v1479_v12 }
 0x1e4   : > { %v1624_v14 = vpop.permute.xlu1 %1623 }
 0x1e5   : > { %v1336_v25 = vpop.permute.xlu0 %1335  ;;  %1688 = vst.msk [vmem:[#allocation3 + $0x48] sm:$0xf] %vm1679_vm5, %v1624_v14 }
 0x1e6   : > { %1397 = vst.msk [vmem:[#allocation3 + $0x60] sm:$0xff] %vm1383_vm14, %v1336_v25 }
 0x1e8   : > { %v1334_v15 = vpop.permute.xlu1 %1333 }
 0x1e9   : > { %v1626_v16 = vpop.permute.xlu0 %1625  ;;  %1396 = vst.msk [vmem:[#allocation3 + $0x58] sm:$0xf] %vm1385_vm2, %v1334_v15 }
 0x1ea   : > { %1689 = vst.msk [vmem:[#allocation3 + $0x50] sm:$0xff] %vm1677_vm1, %v1626_v16 }
 0x1ec   : > { %v1481_v17 = vpop.permute.xlu1 %1480  ;;  %v1712_v58 = vld [vmem:[#allocation3 + $0x48] sm:$0xf] }
 0x1ed   : > { %v1483_v18 = vpop.permute.xlu0 %1482  ;;  %1543 = vst.msk [vmem:[#allocation3 + $0x58] sm:$0xf] %vm1532_vm3, %v1481_v17 }
 0x1ee   : > { %1544 = vst.msk [vmem:[#allocation3 + $0x60] sm:$0xff] %vm1530_vm15, %v1483_v18 }
 0x1f0   : > { %v1193_v19 = vpop.permute.xlu1 %1192 }
 0x1f1   : > { %v1630_v20 = vpop.permute.xlu0 %1629  ;;  %v1713_v48 = vld [vmem:[#allocation3 + $0x50] sm:$0xff]  ;;  %1252 = vst.msk [vmem:[#allocation3 + $0x70] sm:$0xff] %vm1236_vm13, %v1193_v19 }
 0x1f2   : > { %1691 = vst.msk [vmem:[#allocation3 + $0x60] sm:$0xff] %vm1677_vm1, %v1630_v20  ;;  %v1790_v21 = vcombine.low %v1712_v58, %v1713_v48  ;;  %v1756_v30 = vcombine.high %v1713_v48, %v1713_v48 }
 0x1f4   : > { %3761 = vmatmul.mubr.msk.f32.gmra.mrb[6].mxu0 %vm1801_vm4, %v1790_v21  ;;  %v1191_v22 = vpop.permute.xlu1 %1190 }
 0x1f5   : > { %v1628_v2 = vpop.permute.xlu0 %1627  ;;  %1251 = vst.msk [vmem:[#allocation3 + $0x68] sm:$0xf] %vm1238_vm0, %v1191_v22 }
 0x1f6   : > { %1690 = vst.msk [vmem:[#allocation3 + $0x58] sm:$0xf] %vm1679_vm5, %v1628_v2 }
 0x1f8   : > { %v1195_v24 = vpop.permute.xlu1 %1194 }
 0x1f9   : > { %v1340_v26 = vpop.permute.xlu0 %1339  ;;  %v1715_v28 = vld [vmem:[#allocation3 + $0x60] sm:$0xff]  ;;  %1253 = vst.msk [vmem:[#allocation3 + $0x78] sm:$0xf] %vm1238_vm0, %v1195_v24 }
 0x1fa   : > { %1399 = vst.msk [vmem:[#allocation3 + $0x70] sm:$0xff] %vm1383_vm14, %v1340_v26  ;;  %v1757_v29 = vcombine.high %v1715_v28, %v1715_v28 }
 0x1fc   : > { %v1487_v27 = vpop.permute.xlu1 %1486  ;;  %v1792_v34 = vcombine.low %v1715_v28, %v1757_v29 }
 0x1fd   : > { %v1338_v31 = vpop.permute.xlu0 %1337  ;;  %v1714_v32 = vld [vmem:[#allocation3 + $0x58] sm:$0xf]  ;;  %1546 = vst.msk [vmem:[#allocation3 + $0x70] sm:$0xff] %vm1530_vm15, %v1487_v27 }
 0x1fe   : > { %1398 = vst.msk [vmem:[#allocation3 + $0x68] sm:$0xf] %vm1385_vm2, %v1338_v31  ;;  %v1791_v33 = vcombine.low %v1756_v30, %v1714_v32 }
 0x200   : > { %3763 = vmatprep.mubr.msk.f32.mxu0 %vm1801_vm4, %v1791_v33  ;;  %v1342_v35 = vpop.permute.xlu1 %1341  ;;  %v4002_v33 = vmov 1983009808  }
 0x201   : > { %v1197_v7 = vpop.permute.xlu0 %1196  ;;  %3764 = vmatmul.mubr.msk.f32.gmra.mrb[8].mxu0 %vm1801_vm4, %v1792_v34  ;;  %1400 = vst.msk [vmem:[#allocation3 + $0x78] sm:$0xf] %vm1385_vm2, %v1342_v35  ;;  %v2017_v34 = vunpack.c.l.s4 %v4002_v33  ;;  %v2019_v35 = vlaneseq }
 0x202   : > { %1254 = vst.msk [vmem:[#allocation3 + $0x80] sm:$0xff] %vm1236_vm13, %v1197_v7 }
 0x203   : > { %v2018_v7 = vunpack.c.0.s8 %v2017_v34 }
 0x204   : > { %v1634_v36 = vpop.permute.xlu1 %1633 }
 0x205   : > { %v1485_v37 = vpop.permute.xlu0 %1484  ;;  %1693 = vst.msk [vmem:[#allocation3 + $0x70] sm:$0xff] %vm1677_vm1, %v1634_v36  ;;  %v2020_v36 = vshrl.u32 %v2019_v35, 7 }
 0x206   : > { %1545 = vst.msk [vmem:[#allocation3 + $0x68] sm:$0xf] %vm1532_vm3, %v1485_v37  ;;  %v4889_v37 = vld [vmem:[%s5310_s2] ss:$0 sm:$0xff] }
 0x208   : > { %v1489_v38 = vpop.permute.xlu1 %1488 }
 0x209   : > { %v1344_v39 = vpop.permute.xlu0 %1343  ;;  %1547 = vst.msk [vmem:[#allocation3 + $0x78] sm:$0xf] %vm1532_vm3, %v1489_v38 }
 0x20a   : > { %1401 = vst.msk [vmem:[#allocation3 + $0x80] sm:$0xff] %vm1383_vm14, %v1344_v39  ;;  %v4891_v39 = vsub.s32 %v2018_v7, %v2020_v36 }
 0x20c   : > { %v1491_v40 = vpop.permute.xlu1 %1490  ;;  %v1717_v46 = vld [vmem:[#allocation3 + $0x70] sm:$0xff] }
 0x20d   : > { %v1632_v41 = vpop.permute.xlu0 %1631  ;;  %1548 = vst.msk [vmem:[#allocation3 + $0x80] sm:$0xff] %vm1530_vm15, %v1491_v40  ;;  %v1758_v51 = vcombine.high %v1717_v46, %v1717_v46 }
 0x20e   : > { %1692 = vst.msk [vmem:[#allocation3 + $0x68] sm:$0xf] %vm1679_vm5, %v1632_v41 }
 0x210   : > { %v1199_v42 = vpop.permute.xlu1 %1198 }
 0x211   : > { %v1636_v49 = vpop.permute.xlu0 %1635  ;;  %1255 = vst.msk [vmem:[#allocation3 + $0x88] sm:$0xf] %vm1238_vm0, %v1199_v42 }
 0x212   : > { %1694 = vst.msk [vmem:[#allocation3 + $0x78] sm:$0xf] %vm1679_vm5, %v1636_v49 }
 0x214   : > { %v1638_v43 = vpop.permute.xlu1 %1637 }
 0x215   : > { %v1201_v44 = vpop.permute.xlu0 %1200  ;;  %v1716_v45 = vld [vmem:[#allocation3 + $0x68] sm:$0xf]  ;;  %1695 = vst.msk [vmem:[#allocation3 + $0x80] sm:$0xff] %vm1677_vm1, %v1638_v43 }
 0x216   : > { %1256 = vst.msk [vmem:[#allocation3 + $0x90] sm:$0xff] %vm1236_vm13, %v1201_v44  ;;  %v1793_v50 = vcombine.low %v1716_v45, %v1717_v46 }
 0x218   : > { %3766 = vmatprep.mubr.msk.f32.mxu0 %vm1801_vm4, %v1793_v50  ;;  %v1348_v52 = vpop.permute.xlu1 %1347 }
 0x219   : > { %v1346_v53 = vpop.permute.xlu0 %1345  ;;  %v1718_v55 = vld [vmem:[#allocation3 + $0x78] sm:$0xf]  ;;  %1403 = vst.msk [vmem:[#allocation3 + $0x90] sm:$0xff] %vm1383_vm14, %v1348_v52 }
 0x21a   : > { %1402 = vst.msk [vmem:[#allocation3 + $0x88] sm:$0xf] %vm1385_vm2, %v1346_v53  ;;  %v1794_v56 = vcombine.low %v1758_v51, %v1718_v55 }
 0x21c   : > { %3767 = vmatmul.mubr.msk.f32.gmra.mrb[10].mxu0 %vm1801_vm4, %v1794_v56  ;;  %v1493_v23 = vpop.permute.xlu1 %1492  ;;  %v1719_v57 = vld [vmem:[#allocation3 + $0x80] sm:$0xff] }
 0x21d   : > { %v1205_v13 = vpop.permute.xlu0 %1204  ;;  %1549 = vst.msk [vmem:[#allocation3 + $0x88] sm:$0xf] %vm1532_vm3, %v1493_v23  ;;  %v1759_v59 = vcombine.high %v1719_v57, %v1719_v57 }
 0x21e   : > { %1258 = vst.msk [vmem:[#allocation3 + $0xa0] sm:$0xff] %vm1236_vm13, %v1205_v13 }
 0x21f   : > { %v1795_v60 = vcombine.low %v1719_v57, %v1759_v59 }
 0x220   : > { %v1203_v61 = vpop.permute.xlu1 %1202 }
 0x221   : > { %v1495_v62 = vpop.permute.xlu0 %1494  ;;  %1257 = vst.msk [vmem:[#allocation3 + $0x98] sm:$0xf] %vm1238_vm0, %v1203_v61  ;;  %3769 = vmatprep.mubr.msk.f32.mxu0 %vm1801_vm4, %v1795_v60  ;;  %v4898_v61 = vsub.s32 0, %v2020_v36 }
 0x222   : > { %1550 = vst.msk [vmem:[#allocation3 + $0x90] sm:$0xff] %vm1530_vm15, %v1495_v62 }
 0x224   : > { %v1640_v63 = vpop.permute.xlu1 %1639 }
 0x225   : > { %v1352_v0 = vpop.permute.xlu0 %1351  ;;  %1696 = vst.msk [vmem:[#allocation3 + $0x88] sm:$0xf] %vm1679_vm5, %v1640_v63 }
 0x226   : > { %1405 = vst.msk [vmem:[#allocation3 + $0xa0] sm:$0xff] %vm1383_vm14, %v1352_v0 }
 0x228   : > { %v1350_v1 = vpop.permute.xlu1 %1349 }
 0x229   : > { %v1642_v3 = vpop.permute.xlu0 %1641  ;;  %1404 = vst.msk [vmem:[#allocation3 + $0x98] sm:$0xf] %vm1385_vm2, %v1350_v1 }
 0x22a   : > { %1697 = vst.msk [vmem:[#allocation3 + $0x90] sm:$0xff] %vm1677_vm1, %v1642_v3 }
 0x22c   : > { %v1497_v4 = vpop.permute.xlu1 %1496  ;;  %v1720_v9 = vld [vmem:[#allocation3 + $0x88] sm:$0xf] }
 0x22d   : > { %v1499_v5 = vpop.permute.xlu0 %1498  ;;  %1551 = vst.msk [vmem:[#allocation3 + $0x98] sm:$0xf] %vm1532_vm3, %v1497_v4 }
 0x22e   : > { %1552 = vst.msk [vmem:[#allocation3 + $0xa0] sm:$0xff] %vm1530_vm15, %v1499_v5 }
 0x230   : > { %v1209_v6 = vpop.permute.xlu1 %1208 }
 0x231   : > { %v1646_v8 = vpop.permute.xlu0 %1645  ;;  %v1721_v54 = vld [vmem:[#allocation3 + $0x90] sm:$0xff]  ;;  %1260 = vst.msk [vmem:[#allocation3 + $0xb0] sm:$0xff] %vm1236_vm13, %v1209_v6  ;;  %vm2988_vm13 = vcmask 255104  }
 0x232   : > { %1699 = vst.msk [vmem:[#allocation3 + $0xa0] sm:$0xff] %vm1677_vm1, %v1646_v8  ;;  %v1796_v47 = vcombine.low %v1720_v9, %v1721_v54  ;;  %v1760_v16 = vcombine.high %v1721_v54, %v1721_v54 }
 0x234   : > { %3770 = vmatmul.mubr.msk.f32.gmra.mrb[12].mxu0 %vm1801_vm4, %v1796_v47  ;;  %v1207_v10 = vpop.permute.xlu1 %1206 }
 0x235   : > { %v1644_v11 = vpop.permute.xlu0 %1643  ;;  %1259 = vst.msk [vmem:[#allocation3 + $0xa8] sm:$0xf] %vm1238_vm0, %v1207_v10 }
 0x236   : > { %1698 = vst.msk [vmem:[#allocation3 + $0x98] sm:$0xf] %vm1679_vm5, %v1644_v11 }
 0x238   : > { %v1211_v12 = vpop.permute.xlu1 %1210 }
 0x239   : > { %v1356_v14 = vpop.permute.xlu0 %1355  ;;  %v1723_v25 = vld [vmem:[#allocation3 + $0xa0] sm:$0xff]  ;;  %1261 = vst.msk [vmem:[#allocation3 + $0xb8] sm:$0xf] %vm1238_vm0, %v1211_v12  ;;  %vm3099_vm0 = vcmask 648704  }
 0x23a   : > { %1407 = vst.msk [vmem:[#allocation3 + $0xb0] sm:$0xff] %vm1383_vm14, %v1356_v14  ;;  %v1761_v15 = vcombine.high %v1723_v25, %v1723_v25  ;;  %vm3025_vm14 = vcmask 386304  }
 0x23c   : > { %v1503_v17 = vpop.permute.xlu1 %1502  ;;  %v1798_v58 = vcombine.low %v1723_v25, %v1761_v15 }
 0x23d   : > { %v1354_v18 = vpop.permute.xlu0 %1353  ;;  %v1722_v19 = vld [vmem:[#allocation3 + $0x98] sm:$0xf]  ;;  %1554 = vst.msk [vmem:[#allocation3 + $0xb0] sm:$0xff] %vm1530_vm15, %v1503_v17  ;;  %vm3062_vm15 = vcmask 517504  }
 0x23e   : > { %1406 = vst.msk [vmem:[#allocation3 + $0xa8] sm:$0xf] %vm1385_vm2, %v1354_v18  ;;  %v1797_v20 = vcombine.low %v1760_v16, %v1722_v19 }
 0x240   : > { %3772 = vmatprep.mubr.msk.f32.mxu0 %vm1801_vm4, %v1797_v20  ;;  %v1501_v48 = vpop.permute.xlu1 %1500 }
 0x241   : > { %v1358_v21 = vpop.permute.xlu0 %1357  ;;  %3773 = vmatmul.mubr.msk.f32.gmra.mrb[14].mxu0 %vm1801_vm4, %v1798_v58  ;;  %1553 = vst.msk [vmem:[#allocation3 + $0xa8] sm:$0xf] %vm1532_vm3, %v1501_v48 }
 0x242   : > { %1408 = vst.msk [vmem:[#allocation3 + $0xb8] sm:$0xf] %vm1385_vm2, %v1358_v21  ;;  %vm3141_vm2 = vcmask 1042048  }
 0x244   : > { %v1505_v22 = vpop.permute.xlu1 %1504 }
 0x245   : > { %v1650_v2 = vpop.permute.xlu0 %1649  ;;  %1555 = vst.msk [vmem:[#allocation3 + $0xb8] sm:$0xf] %vm1532_vm3, %v1505_v22  ;;  %vm3142_vm3 = vcmask 257026  }
 0x246   : > { %1701 = vst.msk [vmem:[#allocation3 + $0xb0] sm:$0xff] %vm1677_vm1, %v1650_v2  ;;  %vm3108_vm1 = vcmask 648192  }
 0x248   : > { %v1652_v24 = vpop.permute.xlu1 %1651 }
 0x249   : > { %v1648_v26 = vpop.permute.xlu0 %1647  ;;  %1702 = vst.msk [vmem:[#allocation3 + $0xb8] sm:$0xf] %vm1679_vm5, %v1652_v24 }
 0x24a   : > { %1700 = vst.msk [vmem:[#allocation3 + $0xa8] sm:$0xf] %vm1679_vm5, %v1648_v26  ;;  %vm3143_vm5 = vmor %vm3142_vm3, %vm3141_vm2 }
 0x24d   : > { %v1725_v28 = vld [vmem:[#allocation3 + $0xb0] sm:$0xff] }
 0x24e   : > { %v1762_v29 = vcombine.high %v1725_v28, %v1725_v28 }
 0x250   : > { %v1726_v27 = vld [vmem:[#allocation3 + $0xb8] sm:$0xf] }
 0x251   : > { %v1724_v30 = vld [vmem:[#allocation3 + $0xa8] sm:$0xf]  ;;  %v1800_v32 = vcombine.low %v1762_v29, %v1726_v27 }
 0x252   : > { %v1799_v31 = vcombine.low %v1724_v30, %v1725_v28 }
 0x254   : > { %3775 = vmatprep.mubr.msk.f32.mxu0 %vm1801_vm4, %v1799_v31 }
 0x255   : > { %3776 = vmatmul.mubr.msk.f32.gmra.mrb[16].mxu0 %vm1801_vm4, %v1800_v32  ;;  %vm3136_vm4 = vcmask 654336  }
 0x287   : > { %v3753_v38 = vpop.f32.mrb[0].mxu0 }
 0x288   : > { %v1914_v40 = vadd.f32 %v3753_v38, %v4889_v37  ;;  %v1908_v41 = vpop.f32.mrb[1].mxu0 }
 0x289   : > { %v1909_v42 = vadd.f32 %v4889_v37, %v1908_v41 }
 0x28a   : > { %v2032_v49 = vcombine.high %v1914_v40, %v1914_v40  ;;  %v2039_v62 = vrot.slane %v1914_v40, %v4891_v39 }
 0x28b   : > { %v2022_v43 = vrot.slane %v1909_v42, %v4891_v39  ;;  %v2015_v45 = vcombine.high %v1909_v42, %v1909_v42 }
 0x28c   : > { %v2046_v44 = vrot.slane %v2032_v49, %v4891_v39  ;;  %v2047_v8 = vcombine.high %v2039_v62, %v2039_v62  ;;  %v3576_v11 = vrot.slane %v2039_v62, 9 }
 0x28d   : > { %v2030_v46 = vcombine.high %v2022_v43, %v2022_v43  ;;  %v3572_v50 = vrot.slane %v2022_v43, 9  ;;  %v2029_v13 = vrot.slane %v2015_v45, %v4891_v39 }
 0x28e   : > { %v2048_v51 = vcombine.high %v2046_v44, %v2046_v44  ;;  %v3578_v52 = vrot.slane %v2046_v44, 9  ;;  %v3577_v16 = vrot.slane %v2047_v8, 9  ;;  %v2613_v48 = vmax.f32 %v2039_v62, %v3576_v11 }
 0x28f   : > { %v3573_v53 = vrot.slane %v2030_v46, 9  ;;  %v2609_v55 = vmax.f32 %v2022_v43, %v3572_v50  ;;  %v2031_v1 = vcombine.high %v2029_v13, %v2029_v13  ;;  %v3574_v9 = vrot.slane %v2029_v13, 9 }
 0x290   : > { %v3579_v56 = vrot.slane %v2048_v51, 9  ;;  %v2615_v23 = vmax.f32 %v2046_v44, %v3578_v52  ;;  %v2614_v28 = vmax.f32 %v2047_v8, %v3577_v16 }
 0x291   : > { %v2610_v57 = vmax.f32 %v2030_v46, %v3573_v53  ;;  %v3575_v12 = vrot.slane %v2031_v1, 9  ;;  %v2611_v17 = vmax.f32 %v2029_v13, %v3574_v9 }
 0x292   : > { %v2616_v59 = vmax.f32 %v2048_v51, %v3579_v56  ;;  %v2681_v60 = vmax.f32 %v2609_v55, %v2615_v23 }
 0x293   : > { %v2612_v21 = vmax.f32 %v2031_v1, %v3575_v12 }
 0x294   : > { %v2682_v63 = vmax.f32 %v2610_v57, %v2616_v59  ;;  %v3756_v0 = vpop.f32.mrb[2].mxu0  ;;  %v2756_v4 = vrot.slane %v2681_v60, %v4898_v61 }
 0x295   : > { %v1918_v3 = vpop.f32.mrb[3].mxu0  ;;  %v1924_v32 = vadd.f32 %v3756_v0, %v4889_v37 }
 0x296   : > { %v2760_v5 = vrot.slane %v2682_v63, %v4898_v61  ;;  %v1919_v6 = vadd.f32 %v4889_v37, %v1918_v3 }
 0x297   : > { %v2066_v40 = vcombine.high %v1924_v32, %v1924_v32  ;;  %v2073_v43 = vrot.slane %v1924_v32, %v4891_v39 }
 0x298   : > { %v2898_v54 = vsel %vm2897_vm6, %v2760_v5, %v2756_v4  ;;  %v2049_v47 = vcombine.high %v1919_v6, %v1919_v6  ;;  %v2056_v10 = vrot.slane %v1919_v6, %v4891_v39 }
 0x299   : > { %v2080_v49 = vrot.slane %v2066_v40, %v4891_v39  ;;  %v2081_v45 = vcombine.high %v2073_v43, %v2073_v43  ;;  %v3584_v57 = vrot.slane %v2073_v43, 9 }
 0x29a   : > { %v2063_v14 = vrot.slane %v2049_v47, %v4891_v39  ;;  %v2064_v25 = vcombine.high %v2056_v10, %v2056_v10  ;;  %v3580_v15 = vrot.slane %v2056_v10, 9 }
 0x29b   : > { %v2082_v44 = vcombine.high %v2080_v49, %v2080_v49  ;;  %v3586_v51 = vrot.slane %v2080_v49, 9  ;;  %v3585_v59 = vrot.slane %v2081_v45, 9 }
 0x29c   : > { %v2065_v18 = vcombine.high %v2063_v14, %v2063_v14  ;;  %v3581_v19 = vrot.slane %v2064_v25, 9  ;;  %v3582_v20 = vrot.slane %v2063_v14, 9  ;;  %v2617_v58 = vmax.f32 %v2056_v10, %v3580_v15 }
 0x29d   : > { %v3587_v55 = vrot.slane %v2082_v44, 9  ;;  %v2623_v63 = vmax.f32 %v2080_v49, %v3586_v51 }
 0x29e   : > { %v3583_v22 = vrot.slane %v2065_v18, 9  ;;  %v2618_v2 = vmax.f32 %v2064_v25, %v3581_v19  ;;  %v2619_v24 = vmax.f32 %v2063_v14, %v3582_v20  ;;  %v2683_v26 = vmax.f32 %v2611_v17, %v2617_v58 }
 0x29f   : > { %v2624_v4 = vmax.f32 %v2082_v44, %v3587_v55  ;;  %v2621_v19 = vmax.f32 %v2073_v43, %v3584_v57 }
 0x2a0   : > { %v2620_v29 = vmax.f32 %v2065_v18, %v3583_v22  ;;  %v2684_v30 = vmax.f32 %v2612_v21, %v2618_v2  ;;  %v2685_v27 = vmax.f32 %v2613_v48, %v2619_v24  ;;  %v2764_v31 = vrot.slane %v2683_v26, %v4898_v61 }
 0x2a1   : > { %v2622_v24 = vmax.f32 %v2081_v45, %v3585_v59 }
 0x2a2   : > { %v2686_v33 = vmax.f32 %v2614_v28, %v2620_v29  ;;  %v2768_v34 = vrot.slane %v2684_v30, %v4898_v61  ;;  %v2772_v35 = vrot.slane %v2685_v27, %v4898_v61  ;;  %v2900_v7 = vsel %vm2899_vm7, %v2764_v31, %v2898_v54 }
 0x2a4   : > { %v2776_v36 = vrot.slane %v2686_v33, %v4898_v61  ;;  %v2902_v38 = vsel %vm2901_vm8, %v2768_v34, %v2900_v7 }
 0x2a5   : > { %v2904_v41 = vsel %vm2903_vm9, %v2772_v35, %v2902_v38 }
 0x2a6   : > { %v2906_v42 = vsel %vm2905_vm10, %v2776_v36, %v2904_v41 }
 0x2a7   : > { %2939 = vst.msk [vmem:[#allocation4] sm:$0x3f] %vm2938_vm11, %v2906_v42 }
 0x2ae   : > { %v2945_v50 = vld [vmem:[#allocation4] sm:$0x3] }
 0x2af   : > { %v3759_v46 = vpop.f32.mrb[4].mxu0  ;;  %2952 = vst.msk [vmem:[#allocation5] sm:$0x3] %vm2951_vm12, %v2945_v50 }
 0x2b0   : > { %v1934_v52 = vadd.f32 %v3759_v46, %v4889_v37  ;;  %v1928_v53 = vpop.f32.mrb[5].mxu0 }
 0x2b1   : > { %v1929_v56 = vadd.f32 %v4889_v37, %v1928_v53 }
 0x2b2   : > { %v2100_v23 = vcombine.high %v1934_v52, %v1934_v52  ;;  %v2107_v13 = vrot.slane %v1934_v52, %v4891_v39 }
 0x2b3   : > { %v2083_v60 = vcombine.high %v1929_v56, %v1929_v56  ;;  %v2090_v62 = vrot.slane %v1929_v56, %v4891_v39 }
 0x2b4   : > { %v2114_v0 = vrot.slane %v2100_v23, %v4891_v39  ;;  %v2115_v1 = vcombine.high %v2107_v13, %v2107_v13  ;;  %v3592_v3 = vrot.slane %v2107_v13, 9 }
 0x2b5   : > { %v2097_v5 = vrot.slane %v2083_v60, %v4891_v39  ;;  %v2098_v6 = vcombine.high %v2090_v62, %v2090_v62  ;;  %v3588_v8 = vrot.slane %v2090_v62, 9 }
 0x2b6   : > { %v2116_v9 = vcombine.high %v2114_v0, %v2114_v0  ;;  %v3593_v54 = vrot.slane %v2115_v1, 9  ;;  %v3594_v47 = vrot.slane %v2114_v0, 9  ;;  %v2629_v10 = vmax.f32 %v2107_v13, %v3592_v3 }
 0x2b7   : > { %v2099_v11 = vcombine.high %v2097_v5, %v2097_v5  ;;  %v3589_v12 = vrot.slane %v2098_v6, 9  ;;  %v3590_v14 = vrot.slane %v2097_v5, 9  ;;  %v2625_v25 = vmax.f32 %v2090_v62, %v3588_v8 }
 0x2b8   : > { %v3595_v15 = vrot.slane %v2116_v9, 9  ;;  %v2630_v16 = vmax.f32 %v2115_v1, %v3593_v54  ;;  %v2631_v17 = vmax.f32 %v2114_v0, %v3594_v47  ;;  %v2689_v18 = vmax.f32 %v2623_v63, %v2629_v10 }
 0x2b9   : > { %v3591_v20 = vrot.slane %v2099_v11, 9  ;;  %v2626_v58 = vmax.f32 %v2098_v6, %v3589_v12  ;;  %v2627_v48 = vmax.f32 %v2097_v5, %v3590_v14 }
 0x2ba   : > { %v2632_v21 = vmax.f32 %v2116_v9, %v3595_v15  ;;  %v2690_v22 = vmax.f32 %v2624_v4, %v2630_v16  ;;  %v2691_v2 = vmax.f32 %v2625_v25, %v2631_v17  ;;  %v2788_v32 = vrot.slane %v2689_v18, %v4898_v61 }
 0x2bb   : > { %v2628_v26 = vmax.f32 %v2099_v11, %v3591_v20  ;;  %v2687_v28 = vmax.f32 %v2621_v19, %v2627_v48 }
 0x2bc   : > { %v2692_v29 = vmax.f32 %v2626_v58, %v2632_v21  ;;  %v2792_v33 = vrot.slane %v2690_v22, %v4898_v61  ;;  %v2796_v35 = vrot.slane %v2691_v2, %v4898_v61 }
 0x2bd   : > { %v2688_v30 = vmax.f32 %v2622_v24, %v2628_v26  ;;  %v2780_v27 = vrot.slane %v2687_v28, %v4898_v61 }
 0x2be   : > { %v2800_v36 = vrot.slane %v2692_v29, %v4898_v61 }
 0x2bf   : > { %v2784_v31 = vrot.slane %v2688_v30, %v4898_v61 }
 0x2c1   : > { %v2907_v34 = vsel %vm2897_vm6, %v2784_v31, %v2780_v27 }
 0x2c2   : > { %v2908_v7 = vsel %vm2899_vm7, %v2788_v32, %v2907_v34 }
 0x2c3   : > { %v2909_v38 = vsel %vm2901_vm8, %v2792_v33, %v2908_v7 }
 0x2c4   : > { %v2910_v40 = vsel %vm2903_vm9, %v2796_v35, %v2909_v38 }
 0x2c5   : > { %v2911_v41 = vsel %vm2905_vm10, %v2800_v36, %v2910_v40 }
 0x2c6   : > { %2940 = vst.msk [vmem:[#allocation4 + $0x8] sm:$0x3f] %vm2938_vm11, %v2911_v41 }
 0x2c7   : > { %v3762_v42 = vpop.f32.mrb[6].mxu0 }
 0x2c8   : > { %v1944_v49 = vadd.f32 %v3762_v42, %v4889_v37  ;;  %v1938_v43 = vpop.f32.mrb[7].mxu0 }
 0x2c9   : > { %v1939_v44 = vadd.f32 %v4889_v37, %v1938_v43 }
 0x2ca   : > { %v2134_v45 = vcombine.high %v1944_v49, %v1944_v49  ;;  %v2141_v6 = vrot.slane %v1944_v49, %v4891_v39 }
 0x2cb   : > { %v2124_v46 = vrot.slane %v1939_v44, %v4891_v39  ;;  %v2117_v51 = vcombine.high %v1939_v44, %v1939_v44 }
 0x2cc   : > { %v2148_v50 = vrot.slane %v2134_v45, %v4891_v39  ;;  %v2149_v25 = vcombine.high %v2141_v6, %v2141_v6  ;;  %v3600_v19 = vrot.slane %v2141_v6, 9 }
 0x2cd   : > { %v2132_v52 = vcombine.high %v2124_v46, %v2124_v46  ;;  %v3596_v53 = vrot.slane %v2124_v46, 9  ;;  %v3070_v55 = vld [vmem:[#allocation4 + $0xc] sm:$0x3]  ;;  %v2959_v56 = vld [vmem:[#allocation4 + $0x9] sm:$0x3]  ;;  %v2131_v0 = vrot.slane %v2117_v51, %v4891_v39 }
 0x2ce   : > { %v2150_v23 = vcombine.high %v2148_v50, %v2148_v50  ;;  %v3602_v13 = vrot.slane %v2148_v50, 9  ;;  %3083 = vrot.lane.b32.xlu1 %v3070_v55, %s4003_s8  ;;  %2972 = vrot.lane.b32.xlu0 %v2959_v56, %s3997_s13  ;;  %v2946_v60 = vld [vmem:[#allocation4 + $0x8] sm:$0x3]  ;;  %v2996_v3 = vld [vmem:[#allocation4 + $0xa] sm:$0x3]  ;;  %v3601_v22 = vrot.slane %v2149_v25, 9  ;;  %v2637_v30 = vmax.f32 %v2141_v6, %v3600_v19 }
 0x2cf   : > { %v3597_v57 = vrot.slane %v2132_v52, 9  ;;  %v2633_v59 = vmax.f32 %v2124_v46, %v3596_v53  ;;  %2953 = vst.msk [vmem:[#allocation5 + $0x2] sm:$0x3] %vm2951_vm12, %v2946_v60  ;;  %v2133_v54 = vcombine.high %v2131_v0, %v2131_v0  ;;  %v3033_v10 = vld [vmem:[#allocation4 + $0xb] sm:$0x3]  ;;  %v3598_v15 = vrot.slane %v2131_v0, 9 }
 0x2d0   : > { %v3603_v62 = vrot.slane %v2150_v23, 9  ;;  %v2639_v63 = vmax.f32 %v2148_v50, %v3602_v13  ;;  %v2638_v35 = vmax.f32 %v2149_v25, %v3601_v22 }
 0x2d1   : > { %v2634_v1 = vmax.f32 %v2132_v52, %v3597_v57  ;;  %v3599_v20 = vrot.slane %v2133_v54, 9  ;;  %v2635_v2 = vmax.f32 %v2131_v0, %v3598_v15 }
 0x2d2   : > { %v2640_v4 = vmax.f32 %v2150_v23, %v3603_v62  ;;  %v2693_v5 = vmax.f32 %v2633_v59, %v2639_v63  ;;  %3009 = vrot.lane.b32.xlu0 %v2996_v3, %s4004_s26 }
 0x2d3   : > { %v2636_v27 = vmax.f32 %v2133_v54, %v3599_v20 }
 0x2d4   : > { %v2694_v8 = vmax.f32 %v2634_v1, %v2640_v4  ;;  %v3765_v9 = vpop.f32.mrb[8].mxu0  ;;  %v2804_v11 = vrot.slane %v2693_v5, %v4898_v61 }
 0x2d5   : > { %v1948_v47 = vpop.f32.mrb[9].mxu0  ;;  %v1954_v41 = vadd.f32 %v3765_v9, %v4889_v37 }
 0x2d6   : > { %v2808_v12 = vrot.slane %v2694_v8, %v4898_v61  ;;  %v1949_v14 = vadd.f32 %v4889_v37, %v1948_v47  ;;  %3046 = vrot.lane.b32.xlu0 %v3033_v10, %s4005_s30 }
 0x2d7   : > { %v2168_v50 = vcombine.high %v1954_v41, %v1954_v41  ;;  %v2175_v55 = vrot.slane %v1954_v41, %v4891_v39 }
 0x2d8   : > { %v2912_v16 = vsel %vm2897_vm6, %v2808_v12, %v2804_v11  ;;  %v2151_v17 = vcombine.high %v1949_v14, %v1949_v14  ;;  %v2158_v18 = vrot.slane %v1949_v14, %v4891_v39 }
 0x2d9   : > { %v2182_v53 = vrot.slane %v2168_v50, %v4891_v39  ;;  %v2183_v57 = vcombine.high %v2175_v55, %v2175_v55  ;;  %v3608_v8 = vrot.slane %v2175_v55, 9 }
 0x2da   : > { %v2165_v58 = vrot.slane %v2151_v17, %v4891_v39  ;;  %v2166_v48 = vcombine.high %v2158_v18, %v2158_v18  ;;  %v3604_v21 = vrot.slane %v2158_v18, 9 }
 0x2db   : > { %v2184_v56 = vcombine.high %v2182_v53, %v2182_v53  ;;  %v3610_v62 = vrot.slane %v2182_v53, 9  ;;  %v3609_v9 = vrot.slane %v2183_v57, 9 }
 0x2dc   : > { %v2167_v24 = vcombine.high %v2165_v58, %v2165_v58  ;;  %v3605_v26 = vrot.slane %v2166_v48, 9  ;;  %v3606_v28 = vrot.slane %v2165_v58, 9  ;;  %v2641_v29 = vmax.f32 %v2158_v18, %v3604_v21 }
 0x2dd   : > { %v3611_v1 = vrot.slane %v2184_v56, 9  ;;  %v2647_v10 = vmax.f32 %v2182_v53, %v3610_v62 }
 0x2de   : > { %v3607_v31 = vrot.slane %v2167_v24, 9  ;;  %v2642_v32 = vmax.f32 %v2166_v48, %v3605_v26  ;;  %v2643_v33 = vmax.f32 %v2165_v58, %v3606_v28  ;;  %v2695_v34 = vmax.f32 %v2635_v2, %v2641_v29 }
 0x2df   : > { %v2648_v25 = vmax.f32 %v2184_v56, %v3611_v1 }
 0x2e0   : > { %v2644_v7 = vmax.f32 %v2167_v24, %v3607_v31  ;;  %v2696_v36 = vmax.f32 %v2636_v27, %v2642_v32  ;;  %v2697_v38 = vmax.f32 %v2637_v30, %v2643_v33  ;;  %v2812_v40 = vrot.slane %v2695_v34, %v4898_v61 }
 0x2e1   : > { %v2645_v27 = vmax.f32 %v2175_v55, %v3608_v8 }
 0x2e2   : > { %v2698_v42 = vmax.f32 %v2638_v35, %v2644_v7  ;;  %v2816_v49 = vrot.slane %v2696_v36, %v4898_v61  ;;  %v2820_v43 = vrot.slane %v2697_v38, %v4898_v61  ;;  %v2913_v44 = vsel %vm2899_vm7, %v2812_v40, %v2912_v16 }
 0x2e3   : > { %v2646_v36 = vmax.f32 %v2183_v57, %v3609_v9 }
 0x2e4   : > { %v2824_v45 = vrot.slane %v2698_v42, %v4898_v61  ;;  %v2914_v46 = vsel %vm2901_vm8, %v2816_v49, %v2913_v44 }
 0x2e5   : > { %v2915_v51 = vsel %vm2903_vm9, %v2820_v43, %v2914_v46 }
 0x2e6   : > { %v2916_v52 = vsel %vm2905_vm10, %v2824_v45, %v2915_v51 }
 0x2e7   : > { %2941 = vst.msk [vmem:[#allocation4 + $0x10] sm:$0x3f] %vm2938_vm11, %v2916_v52 }
 0x2ee   : > { %v2960_v23 = vld [vmem:[#allocation4 + $0x11] sm:$0x3]  ;;  %v3071_v13 = vld [vmem:[#allocation4 + $0x14] sm:$0x3] }
 0x2ef   : > { %v3768_v59 = vpop.f32.mrb[10].mxu0  ;;  %2974 = vrot.lane.b32.xlu1 %v2960_v23, %s3997_s13  ;;  %3085 = vrot.lane.b32.xlu0 %v3071_v13, %s4003_s8  ;;  %v2947_v60 = vld [vmem:[#allocation4 + $0x10] sm:$0x3]  ;;  %v2997_v6 = vld [vmem:[#allocation4 + $0x12] sm:$0x3] }
 0x2f0   : > { %v1964_v63 = vadd.f32 %v3768_v59, %v4889_v37  ;;  %v1958_v0 = vpop.f32.mrb[11].mxu0  ;;  %2954 = vst.msk [vmem:[#allocation5 + $0x4] sm:$0x3] %vm2951_vm12, %v2947_v60  ;;  %v3034_v48 = vld [vmem:[#allocation4 + $0x13] sm:$0x3] }
 0x2f1   : > { %v1959_v3 = vadd.f32 %v4889_v37, %v1958_v0 }
 0x2f2   : > { %v2202_v4 = vcombine.high %v1964_v63, %v1964_v63  ;;  %v2209_v5 = vrot.slane %v1964_v63, %v4891_v39 }
 0x2f3   : > { %v2185_v54 = vcombine.high %v1959_v3, %v1959_v3  ;;  %v2192_v47 = vrot.slane %v1959_v3, %v4891_v39  ;;  %3011 = vrot.lane.b32.xlu1 %v2997_v6, %s4004_s26 }
 0x2f4   : > { %v2216_v11 = vrot.slane %v2202_v4, %v4891_v39  ;;  %v2217_v12 = vcombine.high %v2209_v5, %v2209_v5  ;;  %v3616_v14 = vrot.slane %v2209_v5, 9 }
 0x2f5   : > { %v2199_v15 = vrot.slane %v2185_v54, %v4891_v39  ;;  %v2200_v16 = vcombine.high %v2192_v47, %v2192_v47  ;;  %v3612_v17 = vrot.slane %v2192_v47, 9 }
 0x2f6   : > { %v2218_v18 = vcombine.high %v2216_v11, %v2216_v11  ;;  %v3617_v19 = vrot.slane %v2217_v12, 9  ;;  %v3618_v20 = vrot.slane %v2216_v11, 9  ;;  %v2653_v58 = vmax.f32 %v2209_v5, %v3616_v14 }
 0x2f7   : > { %v2201_v21 = vcombine.high %v2199_v15, %v2199_v15  ;;  %v3613_v22 = vrot.slane %v2200_v16, 9  ;;  %v3614_v2 = vrot.slane %v2199_v15, 9  ;;  %v2649_v24 = vmax.f32 %v2192_v47, %v3612_v17  ;;  %3048 = vrot.lane.b32.xlu1 %v3034_v48, %s4005_s30 }
 0x2f8   : > { %v3619_v26 = vrot.slane %v2218_v18, 9  ;;  %v2654_v28 = vmax.f32 %v2217_v12, %v3617_v19  ;;  %v2655_v29 = vmax.f32 %v2216_v11, %v3618_v20  ;;  %v2701_v30 = vmax.f32 %v2647_v10, %v2653_v58 }
 0x2f9   : > { %v3615_v31 = vrot.slane %v2201_v21, 9  ;;  %v2650_v32 = vmax.f32 %v2200_v16, %v3613_v22  ;;  %v2651_v33 = vmax.f32 %v2199_v15, %v3614_v2 }
 0x2fa   : > { %v2656_v34 = vmax.f32 %v2218_v18, %v3619_v26  ;;  %v2702_v35 = vmax.f32 %v2648_v25, %v2654_v28  ;;  %v2703_v7 = vmax.f32 %v2649_v24, %v2655_v29  ;;  %v2836_v44 = vrot.slane %v2701_v30, %v4898_v61 }
 0x2fb   : > { %v2652_v38 = vmax.f32 %v2201_v21, %v3615_v31  ;;  %v2699_v40 = vmax.f32 %v2645_v27, %v2651_v33 }
 0x2fc   : > { %v2704_v41 = vmax.f32 %v2650_v32, %v2656_v34  ;;  %v2840_v45 = vrot.slane %v2702_v35, %v4898_v61  ;;  %v2844_v50 = vrot.slane %v2703_v7, %v4898_v61 }
 0x2fd   : > { %v2700_v42 = vmax.f32 %v2646_v36, %v2652_v38  ;;  %v2828_v49 = vrot.slane %v2699_v40, %v4898_v61 }
 0x2fe   : > { %v2848_v52 = vrot.slane %v2704_v41, %v4898_v61 }
 0x2ff   : > { %v2832_v43 = vrot.slane %v2700_v42, %v4898_v61 }
 0x301   : > { %v2917_v46 = vsel %vm2897_vm6, %v2832_v43, %v2828_v49 }
 0x302   : > { %v2918_v51 = vsel %vm2899_vm7, %v2836_v44, %v2917_v46 }
 0x303   : > { %v2919_v53 = vsel %vm2901_vm8, %v2840_v45, %v2918_v51 }
 0x304   : > { %v2920_v55 = vsel %vm2903_vm9, %v2844_v50, %v2919_v53 }
 0x305   : > { %v2921_v56 = vsel %vm2905_vm10, %v2848_v52, %v2920_v55 }
 0x306   : > { %2942 = vst.msk [vmem:[#allocation4 + $0x18] sm:$0x3f] %vm2938_vm11, %v2921_v56 }
 0x307   : > { %v3771_v23 = vpop.f32.mrb[12].mxu0 }
 0x308   : > { %v1974_v13 = vadd.f32 %v3771_v23, %v4889_v37  ;;  %v1968_v57 = vpop.f32.mrb[13].mxu0 }
 0x309   : > { %v1969_v59 = vadd.f32 %v4889_v37, %v1968_v57 }
 0x30a   : > { %v2236_v60 = vcombine.high %v1974_v13, %v1974_v13  ;;  %v2243_v18 = vrot.slane %v1974_v13, %v4891_v39 }
 0x30b   : > { %v2226_v62 = vrot.slane %v1969_v59, %v4891_v39  ;;  %v2219_v0 = vcombine.high %v1969_v59, %v1969_v59 }
 0x30c   : > { %v2250_v63 = vrot.slane %v2236_v60, %v4891_v39  ;;  %v2251_v24 = vcombine.high %v2243_v18, %v2243_v18  ;;  %v3624_v27 = vrot.slane %v2243_v18, 9 }
 0x30d   : > { %v2234_v1 = vcombine.high %v2226_v62, %v2226_v62  ;;  %v3620_v3 = vrot.slane %v2226_v62, 9  ;;  %v2998_v4 = vld [vmem:[#allocation4 + $0x1a] sm:$0x3]  ;;  %v2948_v47 = vld [vmem:[#allocation4 + $0x18] sm:$0x3]  ;;  %v2233_v12 = vrot.slane %v2219_v0, %v4891_v39 }
 0x30e   : > { %v2961_v5 = vld [vmem:[#allocation4 + $0x19] sm:$0x3]  ;;  %v2252_v6 = vcombine.high %v2250_v63, %v2250_v63  ;;  %v3626_v8 = vrot.slane %v2250_v63, 9  ;;  %3013 = vrot.lane.b32.xlu1 %v2998_v4, %s4004_s26  ;;  %2955 = vst.msk [vmem:[#allocation5 + $0x6] sm:$0x3] %vm2951_vm12, %v2948_v47  ;;  %v3625_v7 = vrot.slane %v2251_v24, 9  ;;  %v2661_v49 = vmax.f32 %v2243_v18, %v3624_v27 }
 0x30f   : > { %2976 = vrot.lane.b32.xlu0 %v2961_v5, %s3997_s13  ;;  %v3621_v9 = vrot.slane %v2234_v1, 9  ;;  %v2657_v54 = vmax.f32 %v2226_v62, %v3620_v3  ;;  %v3072_v25 = vld [vmem:[#allocation4 + $0x1c] sm:$0x3]  ;;  %v2235_v58 = vcombine.high %v2233_v12, %v2233_v12  ;;  %v3622_v26 = vrot.slane %v2233_v12, 9 }
 0x310   : > { %v3627_v10 = vrot.slane %v2252_v6, 9  ;;  %v2663_v11 = vmax.f32 %v2250_v63, %v3626_v8  ;;  %v3035_v15 = vld [vmem:[#allocation4 + $0x1b] sm:$0x3]  ;;  %v2662_v52 = vmax.f32 %v2251_v24, %v3625_v7 }
 0x311   : > { %v2658_v14 = vmax.f32 %v2234_v1, %v3621_v9  ;;  %v3623_v31 = vrot.slane %v2235_v58, 9  ;;  %v2659_v36 = vmax.f32 %v2233_v12, %v3622_v26 }
 0x312   : > { %v2664_v16 = vmax.f32 %v2252_v6, %v3627_v10  ;;  %v2705_v17 = vmax.f32 %v2657_v54, %v2663_v11  ;;  %3087 = vrot.lane.b32.xlu1 %v3072_v25, %s4003_s8 }
 0x313   : > { %3050 = vrot.lane.b32.xlu0 %v3035_v15, %s4005_s30  ;;  %v2660_v43 = vmax.f32 %v2235_v58, %v3623_v31 }
 0x314   : > { %v2706_v19 = vmax.f32 %v2658_v14, %v2664_v16  ;;  %v3774_v20 = vpop.f32.mrb[14].mxu0  ;;  %v2852_v21 = vrot.slane %v2705_v17, %v4898_v61 }
 0x315   : > { %v1978_v48 = vpop.f32.mrb[15].mxu0  ;;  %v1984_v32 = vadd.f32 %v3774_v20, %v4889_v37 }
 0x316   : > { %v2856_v22 = vrot.slane %v2706_v19, %v4898_v61  ;;  %v1979_v2 = vadd.f32 %v4889_v37, %v1978_v48 }
 0x317   : > { %v2270_v44 = vcombine.high %v1984_v32, %v1984_v32  ;;  %v2277_v63 = vrot.slane %v1984_v32, %v4891_v39 }
 0x318   : > { %v2922_v28 = vsel %vm2897_vm6, %v2856_v22, %v2852_v21  ;;  %v2253_v29 = vcombine.high %v1979_v2, %v1979_v2  ;;  %v2260_v30 = vrot.slane %v1979_v2, %v4891_v39 }
 0x319   : > { %v2284_v13 = vrot.slane %v2270_v44, %v4891_v39  ;;  %v2285_v6 = vcombine.high %v2277_v63, %v2277_v63  ;;  %v3632_v25 = vrot.slane %v2277_v63, 9 }
 0x31a   : > { %v2267_v33 = vrot.slane %v2253_v29, %v4891_v39  ;;  %v2268_v34 = vcombine.high %v2260_v30, %v2260_v30  ;;  %v3628_v35 = vrot.slane %v2260_v30, 9 }
 0x31b   : > { %v2286_v4 = vcombine.high %v2284_v13, %v2284_v13  ;;  %v3634_v9 = vrot.slane %v2284_v13, 9  ;;  %v3633_v15 = vrot.slane %v2285_v6, 9 }
 0x31c   : > { %v2269_v38 = vcombine.high %v2267_v33, %v2267_v33  ;;  %v3629_v40 = vrot.slane %v2268_v34, 9  ;;  %v3630_v41 = vrot.slane %v2267_v33, 9  ;;  %v2665_v42 = vmax.f32 %v2260_v30, %v3628_v35 }
 0x31d   : > { %v3635_v10 = vrot.slane %v2286_v4, 9  ;;  %v2671_v18 = vmax.f32 %v2284_v13, %v3634_v9 }
 0x31e   : > { %v3631_v45 = vrot.slane %v2269_v38, 9  ;;  %v2666_v46 = vmax.f32 %v2268_v34, %v3629_v40  ;;  %v2667_v50 = vmax.f32 %v2267_v33, %v3630_v41  ;;  %v2707_v51 = vmax.f32 %v2659_v36, %v2665_v42 }
 0x31f   : > { %v2672_v48 = vmax.f32 %v2286_v4, %v3635_v10  ;;  %v2669_v40 = vmax.f32 %v2277_v63, %v3632_v25  ;;  %v3069_v25 = vld [vmem:[#allocation4 + $0x4] sm:$0x3] }
 0x320   : > { %v2668_v53 = vmax.f32 %v2269_v38, %v3631_v45  ;;  %v2708_v55 = vmax.f32 %v2660_v43, %v2666_v46  ;;  %v2709_v56 = vmax.f32 %v2661_v49, %v2667_v50  ;;  %v2860_v23 = vrot.slane %v2707_v51, %v4898_v61 }
 0x321   : > { %v2670_v50 = vmax.f32 %v2285_v6, %v3633_v15  ;;  %v2958_v15 = vld [vmem:[#allocation4 + $0x1] sm:$0x3] }
 0x322   : > { %v2710_v57 = vmax.f32 %v2662_v52, %v2668_v53  ;;  %v2864_v59 = vrot.slane %v2708_v55, %v4898_v61  ;;  %v2868_v60 = vrot.slane %v2709_v56, %v4898_v61  ;;  %v2923_v62 = vsel %vm2899_vm7, %v2860_v23, %v2922_v28 }
 0x324   : > { %v2872_v0 = vrot.slane %v2710_v57, %v4898_v61  ;;  %v2924_v1 = vsel %vm2901_vm8, %v2864_v59, %v2923_v62 }
 0x325   : > { %v2925_v3 = vsel %vm2903_vm9, %v2868_v60, %v2924_v1 }
 0x326   : > { %v2926_v5 = vsel %vm2905_vm10, %v2872_v0, %v2925_v3 }
 0x327   : > { %2943 = vst.msk [vmem:[#allocation4 + $0x20] sm:$0x3f] %vm2938_vm11, %v2926_v5 }
 0x328   : > { %v3777_v8 = vpop.f32.mrb[16].mxu0 }
 0x329   : > { %v1994_v54 = vadd.f32 %v3777_v8, %v4889_v37  ;;  %v1988_v47 = vpop.f32.mrb[17].mxu0 }
 0x32a   : > { %v1989_v11 = vadd.f32 %v4889_v37, %v1988_v47 }
 0x32b   : > { %v2304_v12 = vcombine.high %v1994_v54, %v1994_v54  ;;  %v2311_v14 = vrot.slane %v1994_v54, %v4891_v39 }
 0x32c   : > { %v2287_v16 = vcombine.high %v1989_v11, %v1989_v11  ;;  %v2294_v17 = vrot.slane %v1989_v11, %v4891_v39 }
 0x32d   : > { %v2318_v19 = vrot.slane %v2304_v12, %v4891_v39  ;;  %v2319_v20 = vcombine.high %v2311_v14, %v2311_v14  ;;  %v3640_v58 = vrot.slane %v2311_v14, 9  ;;  %v2995_v12 = vld [vmem:[#allocation4 + $0x2] sm:$0x3] }
 0x32e   : > { %v2301_v21 = vrot.slane %v2287_v16, %v4891_v39  ;;  %v2302_v22 = vcombine.high %v2294_v17, %v2294_v17  ;;  %v3636_v2 = vrot.slane %v2294_v17, 9  ;;  %v2962_v24 = vld [vmem:[#allocation4 + $0x21] sm:$0x3]  ;;  %v3036_v43 = vld [vmem:[#allocation4 + $0x23] sm:$0x3] }
 0x32f   : > { %v2999_v37 = vld [vmem:[#allocation4 + $0x22] sm:$0x3]  ;;  %v2320_v26 = vcombine.high %v2318_v19, %v2318_v19  ;;  %v3641_v28 = vrot.slane %v2319_v20, 9  ;;  %v3642_v29 = vrot.slane %v2318_v19, 9  ;;  %v2677_v30 = vmax.f32 %v2311_v14, %v3640_v58  ;;  %2978 = vrot.lane.b32.xlu1 %v2962_v24, %s3997_s13  ;;  %v2949_v34 = vld [vmem:[#allocation4 + $0x20] sm:$0x3] }
 0x330   : > { %3015 = vrot.lane.b32.xlu0 %v2999_v37, %s4004_s26  ;;  %v2303_v27 = vcombine.high %v2301_v21, %v2301_v21  ;;  %v3637_v31 = vrot.slane %v2302_v22, 9  ;;  %v3638_v32 = vrot.slane %v2301_v21, 9  ;;  %v2673_v33 = vmax.f32 %v2294_v17, %v3636_v2  ;;  %2956 = vst.msk [vmem:[#allocation5 + $0x8] sm:$0x3] %vm2951_vm12, %v2949_v34  ;;  %v3073_v11 = vld [vmem:[#allocation4 + $0x24] sm:$0x3] }
 0x331   : > { %v3643_v35 = vrot.slane %v2320_v26, 9  ;;  %v2678_v7 = vmax.f32 %v2319_v20, %v3641_v28  ;;  %v2679_v36 = vmax.f32 %v2318_v19, %v3642_v29  ;;  %v2713_v38 = vmax.f32 %v2671_v18, %v2677_v30  ;;  %v3032_v16 = vld [vmem:[#allocation4 + $0x3] sm:$0x3]  ;;  %v3279_v24 = vld [vmem:[%s5311_s3 + $0x108] sm:$0xff] }
 0x332   : > { %v3639_v41 = vrot.slane %v2303_v27, 9  ;;  %v2674_v42 = vmax.f32 %v2302_v22, %v3637_v31  ;;  %v2675_v49 = vmax.f32 %v2301_v21, %v3638_v32  ;;  %v3278_v2 = vld [vmem:[%s5311_s3 + $0x100] sm:$0xff]  ;;  %v4006_v29 = vmov 0.0|0.0   ;;  %v3247_v32 = vld [vmem:[%s5311_s3 + $0x8] sm:$0xff] }
 0x333   : > { %v2680_v44 = vmax.f32 %v2320_v26, %v3643_v35  ;;  %v2714_v45 = vmax.f32 %v2672_v48, %v2678_v7  ;;  %v2715_v46 = vmax.f32 %v2673_v33, %v2679_v36  ;;  %3052 = vrot.lane.b32.xlu1 %v3036_v43, %s4005_s30  ;;  %v2884_v13 = vrot.slane %v2713_v38, %v4898_v61  ;;  %v3262_v37 = vld [vmem:[%s5311_s3 + $0x80] sm:$0xff]  ;;  %v3280_v35 = vld [vmem:[%s5311_s3 + $0x110] sm:$0xff]  ;;  %v3281_v7 = vld [vmem:[%s5311_s3 + $0x118] sm:$0xff] }
 0x334   : > { %v2676_v51 = vmax.f32 %v2303_v27, %v3639_v41  ;;  %v2711_v52 = vmax.f32 %v2669_v40, %v2675_v49  ;;  %3834 = vmatprep.subr.bf16.mxu0 %v4006_v29  ;;  %v3835_v30 = vpack.c.bf16 %v3279_v24, %v3278_v2  ;;  %v3263_v27 = vld [vmem:[%s5311_s3 + $0x88] sm:$0xff]  ;;  %v3246_v31 = vld [vmem:[%s5311_s3] sm:$0xff]  ;;  %v3264_v36 = vld [vmem:[%s5311_s3 + $0x90] sm:$0xff]  ;;  %v3838_v38 = vpack.c.bf16 %v3281_v7, %v3280_v35 }
 0x335   : > { %v2716_v53 = vmax.f32 %v2674_v42, %v2680_v44  ;;  %v2888_v57 = vrot.slane %v2714_v45, %v4898_v61  ;;  %v2892_v60 = vrot.slane %v2715_v46, %v4898_v61  ;;  %v3802_v33 = vpack.c.bf16 %v3263_v27, %v3262_v37  ;;  %v3265_v40 = vld [vmem:[%s5311_s3 + $0x98] sm:$0xff]  ;;  %v3248_v41 = vld [vmem:[%s5311_s3 + $0x10] sm:$0xff]  ;;  %v3282_v43 = vld [vmem:[%s5311_s3 + $0x120] sm:$0xff] }
 0x336   : > { %v2712_v55 = vmax.f32 %v2670_v50, %v2676_v51  ;;  %v2876_v56 = vrot.slane %v2711_v52, %v4898_v61  ;;  %v3804_v34 = vpack.c.bf16 %v3247_v32, %v3246_v31  ;;  %3836 = vmatpush1.bf16.msra.mxu0 %v3835_v30  ;;  %v3249_v42 = vld [vmem:[%s5311_s3 + $0x18] sm:$0xff]  ;;  %v3806_v49 = vpack.c.bf16 %v3265_v40, %v3264_v36  ;;  %v3283_v44 = vld [vmem:[%s5311_s3 + $0x128] sm:$0xff]  ;;  %v3272_v2 = vld [vmem:[%s5311_s3 + $0xd0] sm:$0xff] }
 0x337   : > { %v2896_v63 = vrot.slane %v2716_v53, %v4898_v61  ;;  %3803 = vmatprep.subr.bf16.mxu1 %v3802_v33  ;;  %3837 = vmatprep.subr.bf16.mxu0 %v4006_v29  ;;  %v3808_v45 = vpack.c.bf16 %v3249_v42, %v3248_v41  ;;  %v3841_v46 = vpack.c.bf16 %v3283_v44, %v3282_v43  ;;  %v3273_v24 = vld [vmem:[%s5311_s3 + $0xd8] sm:$0xff]  ;;  %v3256_v37 = vld [vmem:[%s5311_s3 + $0x50] sm:$0xff]  ;;  %v3290_v30 = vld [vmem:[%s5311_s3 + $0x160] sm:$0xff] }
 0x338   : > { %v2880_v23 = vrot.slane %v2712_v55, %v4898_v61  ;;  %3805 = vmatpush3.bf16.msra.mxu1 %v3804_v34  ;;  %v3291_v27 = vld [vmem:[%s5311_s3 + $0x168] sm:$0xff]  ;;  %v3274_v35 = vld [vmem:[%s5311_s3 + $0xe0] sm:$0xff]  ;;  %v3292_v42 = vld [vmem:[%s5311_s3 + $0x170] sm:$0xff] }
 0x339   : > { %3807 = vmatprep.subr.bf16.mxu1 %v3806_v49  ;;  %v3853_v34 = vpack.c.bf16 %v3291_v27, %v3290_v30  ;;  %v3275_v7 = vld [vmem:[%s5311_s3 + $0xe8] sm:$0xff]  ;;  %v3258_v40 = vld [vmem:[%s5311_s3 + $0x60] sm:$0xff]  ;;  %v3293_v49 = vld [vmem:[%s5311_s3 + $0x178] sm:$0xff] }
 0x33a   : > { %v2927_v59 = vsel %vm2897_vm6, %v2880_v23, %v2876_v56  ;;  %3839 = vmatpush1.bf16.msra.mxu0 %v3838_v38  ;;  %v3266_v23 = vld [vmem:[%s5311_s3 + $0xa0] sm:$0xff]  ;;  %v3826_v38 = vpack.c.bf16 %v3275_v7, %v3274_v35  ;;  %v3259_v41 = vld [vmem:[%s5311_s3 + $0x68] sm:$0xff]  ;;  %v3276_v43 = vld [vmem:[%s5311_s3 + $0xf0] sm:$0xff]  ;;  %vm3204_vm6 = vcmask 1042304  }
 0x33b   : > { %v2928_v62 = vsel %vm2899_vm7, %v2884_v13, %v2927_v59  ;;  %3840 = vmatprep.subr.bf16.mxu0 %v4006_v29  ;;  %v3267_v13 = vld [vmem:[%s5311_s3 + $0xa8] sm:$0xff]  ;;  %v3828_v44 = vpack.c.bf16 %v3259_v41, %v3258_v40  ;;  %vm3205_vm7 = vcmask 519170  }
 0x33c   : > { %v2929_v0 = vsel %vm2901_vm8, %v2888_v57, %v2928_v62  ;;  %3809 = vmatpush3.bf16.msra.mxu1 %v3808_v45  ;;  %v3250_v62 = vld [vmem:[%s5311_s3 + $0x20] sm:$0xff]  ;;  %v3277_v45 = vld [vmem:[%s5311_s3 + $0xf8] sm:$0xff]  ;;  %vm3239_vm8 = vcmask 1041920  }
 0x33d   : > { %v2930_v1 = vsel %vm2903_vm9, %v2892_v60, %v2929_v0  ;;  %v3810_v60 = vpack.c.bf16 %v3267_v13, %v3266_v23  ;;  %v3284_v0 = vld [vmem:[%s5311_s3 + $0x130] sm:$0xff]  ;;  %v3294_v23 = vld [vmem:[%s5311_s3 + $0x180] sm:$0xff]  ;;  %v3295_v13 = vld [vmem:[%s5311_s3 + $0x188] sm:$0xff]  ;;  %vm3240_vm9 = vcmask 125954  }
 0x33e   : > { %v2931_v3 = vsel %vm2905_vm10, %v2896_v63, %v2930_v1  ;;  %3842 = vmatpush1.bf16.msra.mxu0 %v3841_v46  ;;  %v3251_v63 = vld [vmem:[%s5311_s3 + $0x28] sm:$0xff]  ;;  %vm3199_vm10 = vcmask 916480  }
 0x33f   : > { %2944 = vst.msk [vmem:[#allocation4 + $0x28] sm:$0x3f] %vm2938_vm11, %v2931_v3  ;;  %3843 = vmatprep.subr.bf16.mxu0 %v4006_v29  ;;  %v3812_v1 = vpack.c.bf16 %v3251_v63, %v3250_v62  ;;  %v3285_v3 = vld [vmem:[%s5311_s3 + $0x138] sm:$0xff]  ;;  %3811 = vmatprep.subr.bf16.mxu1 %v3810_v60  ;;  %vm3171_vm11 = vcmask 910592  }
 0x340   : > { %v2973_v4 = vpop.permute.xlu0 %2972  ;;  %v3084_v54 = vpop.permute.xlu1 %3083 }
 0x341   : > { %2990 = vst.msk [vmem:[#allocation5 + $0x2] sm:$0x3] %vm2988_vm13, %v2973_v4  ;;  %v3844_v4 = vpack.c.bf16 %v3285_v3, %v3284_v0  ;;  %3813 = vmatpush3.bf16.msra.mxu1 %v3812_v1 }
 0x343   : > { %3845 = vmatpush1.bf16.msra.mxu0 %v3844_v4 }
 0x344   : > { %v3010_v5 = vpop.permute.xlu0 %3009  ;;  %3846 = vmatprep.subr.bf16.mxu0 %v4006_v29 }
 0x345   : > { %3027 = vst.msk [vmem:[#allocation5 + $0x2] sm:$0x3] %vm3025_vm14, %v3010_v5  ;;  %v3268_v5 = vld [vmem:[%s5311_s3 + $0xb0] sm:$0xff] }
 0x346   : > { %v3000_v6 = vld [vmem:[#allocation4 + $0x2a] sm:$0x3]  ;;  %v2950_v61 = vld [vmem:[#allocation4 + $0x28] sm:$0x3]  ;;  %v3074_v47 = vld [vmem:[#allocation4 + $0x2c] sm:$0x3] }
 0x347   : > { %v2963_v8 = vld [vmem:[#allocation4 + $0x29] sm:$0x3]  ;;  %3017 = vrot.lane.b32.xlu1 %v3000_v6, %s4004_s26  ;;  %2957 = vst.msk [vmem:[#allocation5 + $0xa] sm:$0x3] %vm2951_vm12, %v2950_v61  ;;  %v3037_v10 = vld [vmem:[#allocation4 + $0x2b] sm:$0x3] }
 0x348   : > { %2980 = vrot.lane.b32.xlu0 %v2963_v8, %s3997_s13  ;;  %v3047_v9 = vpop.permute.xlu0 %3046  ;;  %v3269_v6 = vld [vmem:[%s5311_s3 + $0xb8] sm:$0xff]  ;;  %vm3234_vm12 = vcmask 523264  }
 0x349   : > { %3064 = vst.msk [vmem:[#allocation5 + $0x2] sm:$0x3] %vm3062_vm15, %v3047_v9  ;;  %v3814_v61 = vpack.c.bf16 %v3269_v6, %v3268_v5  ;;  %v3252_v9 = vld [vmem:[%s5311_s3 + $0x30] sm:$0xff] }
 0x34a   : > { %3101 = vst.msk [vmem:[#allocation5 + $0x2] sm:$0x3] %vm3099_vm0, %v3084_v54  ;;  %v3253_v54 = vld [vmem:[%s5311_s3 + $0x38] sm:$0xff] }
 0x34b   : > { %3091 = vrot.lane.b32.xlu1 %v3074_v47, %s4003_s8  ;;  %v3286_v47 = vld [vmem:[%s5311_s3 + $0x140] sm:$0xff]  ;;  %3815 = vmatprep.subr.bf16.mxu1 %v3814_v61 }
 0x34c   : > { %3054 = vrot.lane.b32.xlu0 %v3037_v10, %s4005_s30  ;;  %v3816_v10 = vpack.c.bf16 %v3253_v54, %v3252_v9 }
 0x34e   : > { %3817 = vmatpush3.bf16.msra.mxu1 %v3816_v10 }
 0x34f   : > { %3007 = vrot.lane.b32.xlu1 %v2995_v12, %s4004_s26 }
 0x350   : > { %3089 = vrot.lane.b32.xlu0 %v3073_v11, %s4003_s8  ;;  %v3287_v11 = vld [vmem:[%s5311_s3 + $0x148] sm:$0xff] }
 0x351   : > { %v3107_v14 = vld [vmem:[#allocation5 + $0x2] sm:$0x3]  ;;  %v3847_v12 = vpack.c.bf16 %v3287_v11, %v3286_v47 }
 0x352   : > { %3110 = vst.msk [vmem:[#allocation6 + $0x8] sm:$0x3] %vm3108_vm1, %v3107_v14  ;;  %v3644_v17 = vld.sshfl [vmem:[#allocation5 + $0x2] sm:$0x3 pattern:$0x76325410] }
 0x353   : > { %3081 = vrot.lane.b32.xlu1 %v3069_v25, %s4003_s8  ;;  %v3270_v25 = vld [vmem:[%s5311_s3 + $0xc0] sm:$0xff]  ;;  %3848 = vmatpush1.bf16.msra.mxu0 %v3847_v12 }
 0x354   : > { %2970 = vrot.lane.b32.xlu0 %v2958_v15, %s3997_s13  ;;  %s4007_s13 = smov 112   ;;  %v3271_v15 = vld [vmem:[%s5311_s3 + $0xc8] sm:$0xff]  ;;  %3849 = vmatprep.subr.bf16.mxu0 %v4006_v29 }
 0x358   : > { %3044 = vrot.lane.b32.xlu0 %v3032_v16, %s4005_s30  ;;  %s5266_s30 = scalar_lea.hbm %s5313_s5, %s3655_s15 }
 0x35c   : > { %3130 = vrot.lane.b32.xlu0 %v3644_v17, %s4001_s14  ;;  %v3818_v17 = vpack.c.bf16 %v3271_v15, %v3270_v25 }
 0x35e   : > { %3819 = vmatprep.subr.bf16.mxu1 %v3818_v17 }
 0x361   : > { %v2975_v18 = vpop.permute.xlu1 %2974  ;;  %v3086_v58 = vpop.permute.xlu0 %3085 }
 0x362   : > { %2991 = vst.msk [vmem:[#allocation5 + $0x4] sm:$0x3] %vm2988_vm13, %v2975_v18  ;;  %v3254_v18 = vld [vmem:[%s5311_s3 + $0x40] sm:$0xff] }
 0x365   : > { %v3012_v19 = vpop.permute.xlu1 %3011 }
 0x366   : > { %3028 = vst.msk [vmem:[#allocation5 + $0x4] sm:$0x3] %vm3025_vm14, %v3012_v19  ;;  %v3255_v19 = vld [vmem:[%s5311_s3 + $0x48] sm:$0xff] }
 0x369   : > { %v3049_v20 = vpop.permute.xlu1 %3048 }
 0x36a   : > { %3065 = vst.msk [vmem:[#allocation5 + $0x4] sm:$0x3] %vm3062_vm15, %v3049_v20  ;;  %v3288_v20 = vld [vmem:[%s5311_s3 + $0x150] sm:$0xff] }
 0x36b   : > { %3102 = vst.msk [vmem:[#allocation5 + $0x4] sm:$0x3] %vm3099_vm0, %v3086_v58  ;;  %v3820_v58 = vpack.c.bf16 %v3255_v19, %v3254_v18 }
 0x36d   : > { %3821 = vmatpush3.bf16.msra.mxu1 %v3820_v58  ;;  %v3652_v58 = vld [vmem:[%s5312_s4] ss:$0 sm:$0xff] }
 0x372   : > { %v5061_v48 = vld.sshfl [vmem:[#allocation5 + $0x4] sm:$0x3 pattern:$0x76325410] }
 0x373   : > { %3132 = vrot.lane.b32.xlu1 %v5061_v48, %s4001_s14 }
 0x380   : > { %v3014_v21 = vpop.permute.xlu1 %3013 }
 0x381   : > { %v2977_v22 = vpop.permute.xlu0 %2976 }
 0x382   : > { %2992 = vst.msk [vmem:[#allocation5 + $0x6] sm:$0x3] %vm2988_vm13, %v2977_v22 }
 0x383   : > { %3029 = vst.msk [vmem:[#allocation5 + $0x6] sm:$0x3] %vm3025_vm14, %v3014_v21  ;;  %v3289_v21 = vld [vmem:[%s5311_s3 + $0x158] sm:$0xff] }
 0x384   : > { %v3088_v26 = vpop.permute.xlu1 %3087  ;;  %v3850_v22 = vpack.c.bf16 %v3289_v21, %v3288_v20 }
 0x385   : > { %v3051_v28 = vpop.permute.xlu0 %3050 }
 0x386   : > { %3066 = vst.msk [vmem:[#allocation5 + $0x6] sm:$0x3] %vm3062_vm15, %v3051_v28  ;;  %v3257_v28 = vld [vmem:[%s5311_s3 + $0x58] sm:$0xff]  ;;  %3851 = vmatpush1.bf16.msra.mxu0 %v3850_v22 }
 0x387   : > { %3103 = vst.msk [vmem:[#allocation5 + $0x6] sm:$0x3] %vm3099_vm0, %v3088_v26  ;;  %v3822_v26 = vpack.c.bf16 %v3273_v24, %v3272_v2  ;;  %v3824_v33 = vpack.c.bf16 %v3257_v28, %v3256_v37  ;;  %3852 = vmatprep.subr.bf16.mxu0 %v4006_v29 }
 0x389   : > { %3823 = vmatprep.subr.bf16.mxu1 %v3822_v26 }
 0x38a   : > { %3825 = vmatpush3.bf16.msra.mxu1 %v3824_v33  ;;  %3854 = vmatpush1.bf16.msra.mxu0 %v3853_v34 }
 0x38b   : > { %3827 = vmatprep.subr.bf16.mxu1 %v3826_v38  ;;  %3855 = vmatprep.subr.bf16.mxu0 %v4006_v29 }
 0x38e   : > { %v5114_v50 = vld.sshfl [vmem:[#allocation5 + $0x6] sm:$0x3 pattern:$0x76325410]  ;;  %3829 = vmatpush3.bf16.msra.mxu1 %v3828_v44 }
 0x38f   : > { %3193 = vrot.lane.b32.xlu0 %v5114_v50, %s4007_s13 }
 0x3a1   : > { %v2979_v51 = vpop.permute.xlu1 %2978 }
 0x3a2   : > { %v3016_v52 = vpop.permute.xlu0 %3015  ;;  %2993 = vst.msk [vmem:[#allocation5 + $0x8] sm:$0x3] %vm2988_vm13, %v2979_v51 }
 0x3a3   : > { %3030 = vst.msk [vmem:[#allocation5 + $0x8] sm:$0x3] %vm3025_vm14, %v3016_v52  ;;  %v3856_v52 = vpack.c.bf16 %v3293_v49, %v3292_v42 }
 0x3a5   : > { %v3053_v53 = vpop.permute.xlu1 %3052  ;;  %3857 = vmatpush1.bf16.msra.mxu0 %v3856_v52 }
 0x3a6   : > { %3067 = vst.msk [vmem:[#allocation5 + $0x8] sm:$0x3] %vm3062_vm15, %v3053_v53  ;;  %v3830_v53 = vpack.c.bf16 %v3277_v45, %v3276_v43  ;;  %3858 = vmatprep.subr.bf16.mxu0 %v4006_v29 }
 0x3a8   : > { %3831 = vmatprep.subr.bf16.mxu1 %v3830_v53 }
 0x3b9   : > { %v3018_v55 = vpop.permute.xlu1 %3017 }
 0x3ba   : > { %v2981_v56 = vpop.permute.xlu0 %2980 }
 0x3bb   : > { %2994 = vst.msk [vmem:[#allocation5 + $0xa] sm:$0x3] %vm2988_vm13, %v2981_v56  ;;  %v3261_v56 = vld [vmem:[%s5311_s3 + $0x78] sm:$0xff] }
 0x3bc   : > { %3031 = vst.msk [vmem:[#allocation5 + $0xa] sm:$0x3] %vm3025_vm14, %v3018_v55  ;;  %v3260_v55 = vld [vmem:[%s5311_s3 + $0x70] sm:$0xff] }
 0x3bd   : > { %v3092_v57 = vpop.permute.xlu1 %3091 }
 0x3be   : > { %v3055_v59 = vpop.permute.xlu0 %3054 }
 0x3bf   : > { %3068 = vst.msk [vmem:[#allocation5 + $0xa] sm:$0x3] %vm3062_vm15, %v3055_v59  ;;  %v3832_v59 = vpack.c.bf16 %v3261_v56, %v3260_v55 }
 0x3c0   : > { %3105 = vst.msk [vmem:[#allocation5 + $0xa] sm:$0x3] %vm3099_vm0, %v3092_v57 }
 0x3c1   : > { %v3008_v14 = vpop.permute.xlu1 %3007  ;;  %3833 = vmatpush3.bf16.msra.mxu1 %v3832_v59 }
 0x3c2   : > { %v3090_v8 = vpop.permute.xlu0 %3089 }
 0x3c3   : > { %3104 = vst.msk [vmem:[#allocation5 + $0x8] sm:$0x3] %vm3099_vm0, %v3090_v8 }
 0x3c5   : > { %v3082_v36 = vpop.permute.xlu1 %3081 }
 0x3c6   : > { %v2971_v16 = vpop.permute.xlu0 %2970 }
 0x3c7   : > { %2989 = vst.msk [vmem:[#allocation5] sm:$0x3] %vm2988_vm13, %v2971_v16  ;;  %v3651_v51 = vld.sshfl [vmem:[#allocation5 + $0xa] sm:$0x3 pattern:$0x76325410]  ;;  %vm3206_vm13 = vmor %vm3205_vm7, %vm3204_vm6 }
 0x3c8   : > { %3026 = vst.msk [vmem:[#allocation5] sm:$0x3] %vm3025_vm14, %v3008_v14  ;;  %vm3241_vm14 = vmor %vm3240_vm9, %vm3239_vm8 }
 0x3ca   : > { %v3045_v31 = vpop.permute.xlu0 %3044  ;;  %v3649_v32 = vld.sshfl [vmem:[#allocation5 + $0x8] sm:$0x3 pattern:$0x76325410] }
 0x3cb   : > { %3063 = vst.msk [vmem:[#allocation5] sm:$0x3] %vm3062_vm15, %v3045_v31  ;;  %3195 = vrot.lane.b32.xlu1 %v3649_v32, %s4007_s13  ;;  %3228 = vrot.lane.b32.xlu0 %v3649_v32, %s4003_s8  ;;  %vm3326_vm15 = vcmask 130048  }
 0x3cc   : > { %3100 = vst.msk [vmem:[#allocation5] sm:$0x3] %vm3099_vm0, %v3082_v36  ;;  %vm3470_vm0 = vcmask 125952  }
 0x3ce   : > { %v3131_v46 = vpop.permute.xlu0 %3130 }
 0x3cf   : > { %3230 = vrot.lane.b32.xlu1 %v3651_v51, %s4003_s8  ;;  %3165 = vrot.lane.b32.xlu0 %v5061_v48, %s4004_s26  ;;  %v3134_v57 = vrot.slane %v3131_v46, 6  ;;  %v3859_v48 = vpack.c.bf16 %v3295_v13, %v3294_v23  ;;  %s215_s8 = sand.u32 1, %s3984_s19  }
 0x3d0   : > { %s3473_s6 = scalar_lea.sflag [#allocation8], %s215_s8 }
 0x3d1   : > { %v3137_v62 = vsel %vm3136_vm4, %v3134_v57, %v3131_v46  ;;  %3860 = vmatpush1.bf16.msra.mxu0 %v3859_v48 }
 0x3d3   : > { %3167 = vrot.lane.b32.xlu1 %v5114_v50, %s4004_s26  ;;  %v3106_v60 = vld [vmem:[#allocation5] sm:$0x3]  ;;  %s3549_s26 = sshll.u32 %s215_s8, 2 }
 0x3d4   : > { %3109 = vst.msk [vmem:[#allocation6] sm:$0x3] %vm3108_vm1, %v3106_v60  ;;  %s217_s16 = scalar_lea.vmem [#allocation7], %s3549_s26 }
 0x3d5   : > { %3144 = vst.msk [vmem:[#allocation6] sm:$0xf] %vm3143_vm5, %v3137_v62  ;;  %s3486_s17 = sshll.u32 %s217_s16, 4  ;;  %s5268_s17 = int_to_ptr.vmem [resolvable:$true] %s3486_s17 }
 0x3d6   : > { %s3930_s7 = scalar_lea.vmem %s5268_s17, 64  ;;  %p3937_p0 = scmp.lt.s32.totalorder %s5268_s17, %s3935_s9 }
 0x3d7   : > { %p3931_p11 = scmp.ne.s32.totalorder %s5268_s17, %s3930_s7  ;;  %p3938_p1 = scmp.lt.s32.totalorder %s3936_s10, %s3930_s7 }
 0x3d9   : > { %p3932_p12 = pnand %p3931_p11, %p4077_p5  ;;  %p3939_p2 = por %p3938_p1, %p3937_p0 }
 0x3db   : > { %p3933_p13 = pneg %p3932_p12 }
 0x3dd   : > { %p3940_p3 = pnand %p3939_p2, %p3933_p13 }
 0x3e5   : > { %v3133_v63 = vpop.permute.xlu1 %3132 }
 0x3e6   : > { %v3135_v0 = vrot.slane %v3133_v63, 6 }
 0x3e8   : > { %v3138_v1 = vsel %vm3136_vm4, %v3135_v0, %v3133_v63 }
 0x3e9   : > { %3145 = vst.msk [vmem:[#allocation6 + $0x8] sm:$0xf] %vm3143_vm5, %v3138_v1 }
 0x401   : > { %v3194_v3 = vpop.permute.xlu0 %3193 }
 0x402   : > { %v3197_v50 = vrot.slane %v3194_v3, 6 }
 0x404   : > { %v3200_v61 = vsel %vm3199_vm10, %v3197_v50, %v3194_v3 }
 0x43d   : > { %v3196_v4 = vpop.permute.xlu1 %3195  ;;  %v3229_v5 = vpop.permute.xlu0 %3228 }
 0x43e   : > { %v3232_v29 = vrot.slane %v3229_v5, 6  ;;  %v3198_v9 = vrot.slane %v3196_v4, 6 }
 0x440   : > { %v3235_v54 = vsel %vm3234_vm12, %v3232_v29, %v3229_v5  ;;  %v3201_v11 = vsel %vm3199_vm10, %v3198_v9, %v3196_v4 }
 0x441   : > { %v3231_v6 = vpop.permute.xlu1 %3230  ;;  %v3166_v8 = vpop.permute.xlu0 %3165 }
 0x442   : > { %3172 = vst.msk [vmem:[#allocation6 + $0x2] sm:$0x3] %vm3171_vm11, %v3166_v8  ;;  %v3233_v47 = vrot.slane %v3231_v6, 6 }
 0x443   : > { %3207 = vst.msk [vmem:[#allocation6 + $0x2] sm:$0xf] %vm3206_vm13, %v3200_v61 }
 0x444   : > { %3242 = vst.msk [vmem:[#allocation6 + $0x4] sm:$0xf] %vm3241_vm14, %v3235_v54  ;;  %v3236_v12 = vsel %vm3234_vm12, %v3233_v47, %v3231_v6 }
 0x445   : > { %v3168_v10 = vpop.permute.xlu1 %3167 }
 0x446   : > { %3173 = vst.msk [vmem:[#allocation6 + $0xa] sm:$0x3] %vm3171_vm11, %v3168_v10 }
 0x447   : > { %3208 = vst.msk [vmem:[#allocation6 + $0xa] sm:$0xf] %vm3206_vm13, %v3201_v11 }
 0x448   : > { %3243 = vst.msk [vmem:[#allocation6 + $0xc] sm:$0xf] %vm3241_vm14, %v3236_v12 }
 0x44e   : > { %v3927_v14 = vld [vmem:[#allocation6] ss:$8 sps:$4 sm:$0xff]  }
 0x44f   : > { %v3929_v25 = vld [vmem:[#allocation6 + $0x4] ss:$8 sps:$4 sm:$0xff]   ;;  %v3313_v15 = vrot.slane %v3927_v14, %v4891_v39 }
 0x450   : > { %v3320_v16 = vrot.slane %v3929_v25, %v4891_v39 }
 0x451   : > { %v3321_v17 = vcombine.high %v3313_v15, %v3313_v15 }
 0x452   : > { %v3322_v18 = vcombine.high %v3320_v16, %v3320_v16 }
 0x453   : > { %3393 = vmatprep.mubr.f32.mxu1 %v3321_v17 }
 0x454   : > { %3653 = vmatprep.mubr.msk.f32.mxu0 %vm3326_vm15, %v3322_v18  ;;  %3394 = vmatmul.mubr.f32.vlgmr.msra.gmra.mrb[0].mxu1 %v3313_v15 }
 0x455   : > { %3464 = vmatmul.mubr.f32.vlgmr.msra.gmra.mrb[18].mxu0 %v3320_v16 }
 0x527   : > { %v3722_v19 = vpop.f32.mrb[0].mxu1 }
 0x528   : > { %v3465_v20 = vpop.f32.mrb[18].mxu0  ;;  %v3723_v21 = vpop.f32.mrb[1].mxu1 }
 0x529   : > { %v3467_v22 = vpop.f32.mrb[19].mxu0  ;;  %v3724_v39 = vadd.f32 %v3723_v21, %v3722_v19 }
 0x52b   : > { %v3396_v2 = vadd.f32 %v3724_v39, %v3652_v58 }
 0x52d   : > { %v3466_v24 = vadd.f32 %v3465_v20, %v3396_v2 }
 0x52f   : > { %v3469_v37 = vmax.f32 %v3466_v24, 0.0 }
 0x531   : > { %3471 = vst.msk [vmem:[%s217_s16] sm:$0xf] %vm3470_vm0, %v3469_v37 }
 0x532   : > { %3943 = shalt.err (!%p3940_p3)
}
 0x533   : > { %s3944_s11 = scalar_lea.hbm %s5266_s30, 64  ;;  %s3948_s26 = scalar_lea.hbm %s5313_s5, 128 }
 0x534   : > { %p3945_p4 = scmp.ne.s32.totalorder %s5266_s30, %s3944_s11  ;;  %p3949_p9 = scmp.lt.u32.totalorder %s5266_s30, %s5313_s5 }
 0x535   : > { %p3950_p10 = scmp.lt.u32.totalorder %s3948_s26, %s3944_s11  ;;  %p3952_p12 = scmp.lt.u32.totalorder %s3944_s11, %s5266_s30 }
 0x536   : > { %p3946_p7 = pnand %p3945_p4, %p4077_p5 }
 0x537   : > { %p3951_p11 = por %p3950_p10, %p3949_p9 }
 0x538   : > { %p3947_p8 = pneg %p3946_p7 }
 0x539   : > { %p3953_p13 = por %p3952_p12, %p3951_p11 }
 0x53b   : > { %p3954_p0 = pnand %p3953_p13, %p3947_p8 }
 0x53d   : > { %3957 = shalt.err (!%p3954_p0)
}
 0x53e   : > { %3861 = dma.vmem_to_hbm [thread:$0]  (%p4077_p5), %s5268_s17, 64, %s5266_s30, %s3473_s6  }
 0x53f PF: > { %p3867_p1 = scmp.ge.s32.totalorder %s3992_s21, 2  ;;  %s3498_s15 = sand.u32 1, %s3980_s18  }
 0x540   : > { %s3499_s16 = scalar_lea.sflag [#allocation8], %s3498_s15 }
 0x541   : > { %p3864_p2 = pnand %p3867_p1, %p4081_p6 }
 0x543   : > { %3975 = dma.done.wait (!%p3864_p2), %s3499_s16, 64  }
 0x544   : > { %3977 = vsyncadd (!%p3864_p2), %s3499_s16, 4294967232  ;;  %p15_p3 = scmp.ge.s32.totalorder %s4064_s24, 4   ;;  %s5316_s18 = smov %s3984_s19 }
 0x545   : > { %s5317_s19 = smov %s3988_s20  ;;  %s5318_s20 = smov %s4075_s27 }
 0x546   : > { %s5319_s21 = smov %s4064_s24  ;;  %17 = sbr.rel (!%p15_p3) target bundleno = 3 (0x3), region = 83 }
 0x54d   :  { %3504 = vsyncpa [#allocation8], 1 }
 0x54e   :  { %3506 = vsyncpa [#allocation8 + $0x1], 1 }

</bundles_post_ra>
